<compile_context>
chip_gen: v6e
topology: v6e:2x2x1
jax: 0.10.0
libtpu: 0.0.40
codegen_flags: <defaults>
</compile_context>

<pallas_src>
import math
import functools

import jax
import jax.numpy as jnp
import numpy as np
from jax.experimental import pallas as pl
from jax.experimental.pallas import tpu as pltpu

LN_EPS = 1e-5


def _gelu_exact(x):
    # matches torch.nn.GELU() (approximate='none'): 0.5*x*(1+erf(x/sqrt(2)))
    return 0.5 * x * (1.0 + jax.lax.erf(x * (1.0 / math.sqrt(2.0))))


# --------------------------------------------------------------------------
# Kernel: operates on one batch element's flat (H, W*C) slab; lane index is
# n = w*C + c.  All weights arrive pre-laid-out (see wrapper) and are shared
# (batch-independent) across the grid.
# --------------------------------------------------------------------------
def mixer_block_kernel(
    x_ref,        # (H, W*C)        activation slab for one batch element
    m_ref,        # (W*C, W*C)      block-diag group-mean matrix (LN over C)
    rows_n_ref,   # (6, W*C)        [ln1_g, ln1_b, ln2_g, ln2_b, b2w_row, b2c_row]
    rows_fn_ref,  # (2, F*W*C)      [b1w_row, b1c_row]
    w1h_ref,      # (Hf, H)
    b1h_ref,      # (Hf, 1)
    w2h_ref,      # (H, Hf)
    b2h_ref,      # (H, 1)
    k1w_ref,      # (W*C, Wf*C)     kron(w1w^T, I_C)
    k2w_ref,      # (Wf*C, W*C)     kron(w2w^T, I_C)
    k1c_ref,      # (W*C, W*Cf)     kron(I_W, w1c^T)
    k2c_ref,      # (W*Cf, W*C)     kron(I_W, w2c^T)
    o_ref,        # (H, W*C)
):
    dot = functools.partial(
        jnp.dot,
        preferred_element_type=jnp.float32,
        precision=jax.lax.Precision.HIGHEST,
    )

    x = x_ref[...]                       # (H, WC)
    m = m_ref[...]                       # (WC, WC)
    rows_n = rows_n_ref[...]             # (6, WC)
    rows_fn = rows_fn_ref[...]           # (2, F*WC)

    ln1_g, ln1_b = rows_n[0:1], rows_n[1:2]
    ln2_g, ln2_b = rows_n[2:3], rows_n[3:4]
    b2w_row, b2c_row = rows_n[4:5], rows_n[5:6]
    b1w_row, b1c_row = rows_fn[0:1], rows_fn[1:2]

    def layernorm(z, g, b):
        # Per-w group statistics over C via a block-diagonal matmul: stays
        # lane-dense, no reshape to a narrow-C layout.
        mu = dot(z, m)
        d = z - mu
        var = dot(d * d, m)
        return d * jax.lax.rsqrt(var + LN_EPS) * g + b

    # -------- token mixing --------
    y = layernorm(x, ln1_g, ln1_b)                               # (H, WC)

    # MLP over H: left-multiplies on the slab (contract over sublane axis).
    t = _gelu_exact(dot(w1h_ref[...], y) + b1h_ref[...])         # (Hf, WC)
    t = dot(w2h_ref[...], t) + b2h_ref[...]                      # (H, WC)

    # MLP over W: kron-expanded right-multiplies (no transpose).
    u = _gelu_exact(dot(t, k1w_ref[...]) + b1w_row)              # (H, Wf*C)
    u = dot(u, k2w_ref[...]) + b2w_row                           # (H, WC)

    x1 = x + u                                                   # residual 1

    # -------- channel mixing --------
    y2 = layernorm(x1, ln2_g, ln2_b)                             # (H, WC)
    v = _gelu_exact(dot(y2, k1c_ref[...]) + b1c_row)             # (H, W*Cf)
    v = dot(v, k2c_ref[...]) + b2c_row                           # (H, WC)

    o_ref[...] = x1 + v                                          # residual 2


# --------------------------------------------------------------------------
# Wrapper-side parameter re-layout (pure XLA, outside the kernel).
# All of these are batch-independent.
# --------------------------------------------------------------------------
def prepare_kernel_params(params, H, W, C):
    (ln1_g, ln1_b, w1h, b1h, w2h, b2h,
     w1w, b1w, w2w, b2w, ln2_g, ln2_b, w1c, b1c, w2c, b2c) = params
    dt = jnp.float32

    eye_c = jnp.eye(C, dtype=dt)
    eye_w = jnp.eye(W, dtype=dt)

    # Block-diagonal group-mean matrix: (X @ m)[h, w*C+c] = mean_c X[h, w*C+c]
    m_avg = jnp.kron(eye_w, jnp.full((C, C), 1.0 / C, dtype=dt))

    def tile_c(v):            # (1, C) -> (W*C,)  broadcast over w
        return jnp.tile(v.reshape(-1), W)

    rows_n = jnp.stack([
        tile_c(ln1_g), tile_c(ln1_b),
        tile_c(ln2_g), tile_c(ln2_b),
        jnp.repeat(b2w.reshape(-1), C),            # b2w[w]  at n = w*C + c
        tile_c(b2c),                               # b2c[c]
    ])                                             # (6, W*C)

    rows_fn = jnp.stack([
        jnp.repeat(b1w.reshape(-1), C),            # b1w[w'] at n' = w'*C + c
        jnp.tile(b1c.reshape(-1), W),              # b1c[c'] at n' = w*Cf + c'
    ])                                             # (2, F*W*C)

    # Kron-expanded weights (right-multiplies on the flat row slab).
    k1w = jnp.kron(w1w.T.astype(dt), eye_c)        # (W*C, Wf*C)
    k2w = jnp.kron(w2w.T.astype(dt), eye_c)        # (Wf*C, W*C)
    k1c = jnp.kron(eye_w, w1c.T.astype(dt))        # (W*C, W*Cf)
    k2c = jnp.kron(eye_w, w2c.T.astype(dt))        # (W*Cf, W*C)

    b1h_col = b1h.reshape(-1, 1)                   # (Hf, 1)
    b2h_col = b2h.reshape(-1, 1)                   # (H, 1)

    return (m_avg, rows_n, rows_fn, w1h, b1h_col, w2h, b2h_col,
            k1w, k2w, k1c, k2c)


def _const_spec(shape):
    # Full-array block whose index never changes across the grid -> DMA'd once.
    n = len(shape)
    return pl.BlockSpec(shape, lambda b, _n=n: (0,) * _n)


def mixer_block(x, params):
    B, H, W, C = x.shape
    WC = W * C

    kparams = prepare_kernel_params(params, H, W, C)

    # Lane-dense per-batch slab: (B, H, W*C); last dim is a multiple of 128.
    xs = x.reshape(B, H, WC)

    x_spec = pl.BlockSpec((None, H, WC), lambda b: (b, 0, 0))
    in_specs = [x_spec] + [_const_spec(p.shape) for p in kparams]

    out = pl.pallas_call(
        mixer_block_kernel,
        out_shape=jax.ShapeDtypeStruct((B, H, WC), jnp.float32),
        grid=(B,),
        in_specs=in_specs,
        out_specs=pl.BlockSpec((None, H, WC), lambda b: (b, 0, 0)),
        compiler_params=pltpu.CompilerParams(
            dimension_semantics=("parallel",)),
    )(xs, *kparams)

    return out.reshape(B, H, W, C)


# --------------------------------------------------------------------------
# Pure-JAX reference matching the PyTorch MixerBlock semantics.
# --------------------------------------------------------------------------
def _layernorm_ref(x, gamma, beta):
    mu = jnp.mean(x, axis=-1, keepdims=True)
    var = jnp.mean((x - mu) ** 2, axis=-1, keepdims=True)
    return (x - mu) * jax.lax.rsqrt(var + LN_EPS) * gamma + beta


def mixer_block_reference(x, params):
    (ln1_g, ln1_b, w1h, b1h, w2h, b2h,
     w1w, b1w, w2w, b2w, ln2_g, ln2_b, w1c, b1c, w2c, b2c) = params

    y = _layernorm_ref(x, ln1_g, ln1_b)                          # (B,H,W,C)
    # b h w c -> b c w h ; Linear over h
    y = jnp.transpose(y, (0, 3, 2, 1))                           # (B,C,W,H)
    y = _gelu_exact(y @ w1h.T + b1h) @ w2h.T + b2h               # (B,C,W,H)
    # b c w h -> b c h w ; Linear over w
    y = jnp.transpose(y, (0, 1, 3, 2))                           # (B,C,H,W)
    y = _gelu_exact(y @ w1w.T + b1w) @ w2w.T + b2w               # (B,C,H,W)
    # b c h w -> b h w c
    y = jnp.transpose(y, (0, 2, 3, 1))                           # (B,H,W,C)
    x1 = x + y

    y2 = _layernorm_ref(x1, ln2_g, ln2_b)
    y2 = _gelu_exact(y2 @ w1c.T + b1c) @ w2c.T + b2c
    return x1 + y2


def make_params(key, H, W, C, f_hidden):
    Hf, Wf, Cf = H * f_hidden, W * f_hidden, C * f_hidden
    ks = jax.random.split(key, 10)
    s = 0.05
    ln1_g = jnp.ones((1, C), jnp.float32)
    ln1_b = jnp.zeros((1, C), jnp.float32)
    w1h = s * jax.random.normal(ks[0], (Hf, H), jnp.float32)
    b1h = s * jax.random.normal(ks[1], (1, Hf), jnp.float32)
    w2h = s * jax.random.normal(ks[2], (H, Hf), jnp.float32)
    b2h = s * jax.random.normal(ks[3], (1, H), jnp.float32)
    w1w = s * jax.random.normal(ks[4], (Wf, W), jnp.float32)
    b1w = s * jax.random.normal(ks[5], (1, Wf), jnp.float32)
    w2w = s * jax.random.normal(ks[6], (W, Wf), jnp.float32)
    b2w = s * jax.random.normal(ks[7], (1, W), jnp.float32)
    ln2_g = jnp.ones((1, C), jnp.float32)
    ln2_b = jnp.zeros((1, C), jnp.float32)
    w1c = s * jax.random.normal(ks[8], (Cf, C), jnp.float32)
    b1c = jnp.zeros((1, Cf), jnp.float32)
    w2c = s * jax.random.normal(ks[9], (C, Cf), jnp.float32)
    b2c = jnp.zeros((1, C), jnp.float32)
    return (ln1_g, ln1_b, w1h, b1h, w2h, b2h,
            w1w, b1w, w2w, b2w, ln2_g, ln2_b, w1c, b1c, w2c, b2c)


if __name__ == "__main__":
    # dim=16, num_patches_h=8, num_patches_w=8, f_hidden=2, drop=0.0
    B, H, W, C, F = 2, 8, 8, 16, 2

    key = jax.random.PRNGKey(0)
    kx, kp = jax.random.split(key)
    x = jax.random.normal(kx, (B, H, W, C), jnp.float32)
    params = make_params(kp, H, W, C, F)

    with jax.default_matmul_precision("highest"):
        out = jax.jit(mixer_block)(x, params)
        out = jax.block_until_ready(out)
        ref = mixer_block_reference(x, params)

    np.testing.assert_allclose(np.asarray(out), np.asarray(ref),
                               rtol=1e-4, atol=1e-4)

    print("KERNEL_OK")
</pallas_src>

<mosaic_0001>
module attributes {stable_mosaic.version = 11 : i64} {
  func.func @mixer_block_kernel(%arg0: i32, %arg1: memref<1x8x128xf32, #tpu.memory_space<vmem>>, %arg2: memref<128x128xf32, #tpu.memory_space<vmem>>, %arg3: memref<6x128xf32, #tpu.memory_space<vmem>>, %arg4: memref<2x256xf32, #tpu.memory_space<vmem>>, %arg5: memref<16x8xf32, #tpu.memory_space<vmem>>, %arg6: memref<16x1xf32, #tpu.memory_space<vmem>>, %arg7: memref<8x16xf32, #tpu.memory_space<vmem>>, %arg8: memref<8x1xf32, #tpu.memory_space<vmem>>, %arg9: memref<128x256xf32, #tpu.memory_space<vmem>>, %arg10: memref<256x128xf32, #tpu.memory_space<vmem>>, %arg11: memref<128x256xf32, #tpu.memory_space<vmem>>, %arg12: memref<256x128xf32, #tpu.memory_space<vmem>>, %arg13: memref<1x8x128xf32, #tpu.memory_space<vmem>>) attributes {dimension_semantics = [#tpu.dimension_semantics<parallel>], iteration_bounds = array<i64: 2>, scalar_prefetch = 0 : i64, scratch_operands = 0 : i64, tpu.core_type = #tpu.core_type<tc>, window_params = [{transform_indices = @transform_0, window_bounds = array<i64: 1, 8, 128>}, {pipeline_mode = #tpu.pipeline_mode<synchronous>, transform_indices = @transform_1, window_bounds = array<i64: 128, 128>}, {pipeline_mode = #tpu.pipeline_mode<synchronous>, transform_indices = @transform_2, window_bounds = array<i64: 6, 128>}, {pipeline_mode = #tpu.pipeline_mode<synchronous>, transform_indices = @transform_3, window_bounds = array<i64: 2, 256>}, {pipeline_mode = #tpu.pipeline_mode<synchronous>, transform_indices = @transform_4, window_bounds = array<i64: 16, 8>}, {pipeline_mode = #tpu.pipeline_mode<synchronous>, transform_indices = @transform_5, window_bounds = array<i64: 16, 1>}, {pipeline_mode = #tpu.pipeline_mode<synchronous>, transform_indices = @transform_6, window_bounds = array<i64: 8, 16>}, {pipeline_mode = #tpu.pipeline_mode<synchronous>, transform_indices = @transform_7, window_bounds = array<i64: 8, 1>}, {pipeline_mode = #tpu.pipeline_mode<synchronous>, transform_indices = @transform_8, window_bounds = array<i64: 128, 256>}, {pipeline_mode = #tpu.pipeline_mode<synchronous>, transform_indices = @transform_9, window_bounds = array<i64: 256, 128>}, {pipeline_mode = #tpu.pipeline_mode<synchronous>, transform_indices = @transform_10, window_bounds = array<i64: 128, 256>}, {pipeline_mode = #tpu.pipeline_mode<synchronous>, transform_indices = @transform_11, window_bounds = array<i64: 256, 128>}, {transform_indices = @transform_12, window_bounds = array<i64: 1, 8, 128>}]} {
    %c0 = arith.constant 0 : index
    %c0_0 = arith.constant 0 : index
    %c0_1 = arith.constant 0 : index
    %0 = vector.load %arg1[%c0, %c0_0, %c0_1] : memref<1x8x128xf32, #tpu.memory_space<vmem>>, vector<1x8x128xf32>
    %1 = vector.shape_cast %0 : vector<1x8x128xf32> to vector<8x128xf32>
    %c0_2 = arith.constant 0 : index
    %c0_3 = arith.constant 0 : index
    %2 = vector.load %arg2[%c0_2, %c0_3] : memref<128x128xf32, #tpu.memory_space<vmem>>, vector<128x128xf32>
    %c0_4 = arith.constant 0 : index
    %c0_5 = arith.constant 0 : index
    %3 = vector.load %arg3[%c0_4, %c0_5] : memref<6x128xf32, #tpu.memory_space<vmem>>, vector<6x128xf32>
    %c0_6 = arith.constant 0 : index
    %c0_7 = arith.constant 0 : index
    %4 = vector.load %arg4[%c0_6, %c0_7] : memref<2x256xf32, #tpu.memory_space<vmem>>, vector<2x256xf32>
    %5 = vector.extract_strided_slice %3 {offsets = [0, 0], sizes = [1, 128], strides = [1, 1]} : vector<6x128xf32> to vector<1x128xf32>
    %6 = vector.extract_strided_slice %3 {offsets = [1, 0], sizes = [1, 128], strides = [1, 1]} : vector<6x128xf32> to vector<1x128xf32>
    %7 = vector.extract_strided_slice %3 {offsets = [2, 0], sizes = [1, 128], strides = [1, 1]} : vector<6x128xf32> to vector<1x128xf32>
    %8 = vector.extract_strided_slice %3 {offsets = [3, 0], sizes = [1, 128], strides = [1, 1]} : vector<6x128xf32> to vector<1x128xf32>
    %9 = vector.extract_strided_slice %3 {offsets = [4, 0], sizes = [1, 128], strides = [1, 1]} : vector<6x128xf32> to vector<1x128xf32>
    %10 = vector.extract_strided_slice %3 {offsets = [5, 0], sizes = [1, 128], strides = [1, 1]} : vector<6x128xf32> to vector<1x128xf32>
    %11 = vector.extract_strided_slice %4 {offsets = [0, 0], sizes = [1, 256], strides = [1, 1]} : vector<2x256xf32> to vector<1x256xf32>
    %12 = vector.extract_strided_slice %4 {offsets = [1, 0], sizes = [1, 256], strides = [1, 1]} : vector<2x256xf32> to vector<1x256xf32>
    %cst = arith.constant dense<0.000000e+00> : vector<8x128xf32>
    %13 = tpu.matmul %1, %2, %cst {dimension_numbers = #tpu.dot_dimension_numbers<[1], [0], [0], [1], [0, 0, 1, 1], [], []>, precision = #tpu.contract_precision<fp32>} : vector<8x128xf32>, vector<128x128xf32>, vector<8x128xf32> -> vector<8x128xf32>
    %14 = arith.subf %1, %13 : vector<8x128xf32>
    %15 = arith.mulf %14, %14 : vector<8x128xf32>
    %cst_8 = arith.constant dense<0.000000e+00> : vector<8x128xf32>
    %16 = tpu.matmul %15, %2, %cst_8 {dimension_numbers = #tpu.dot_dimension_numbers<[1], [0], [0], [1], [0, 0, 1, 1], [], []>, precision = #tpu.contract_precision<fp32>} : vector<8x128xf32>, vector<128x128xf32>, vector<8x128xf32> -> vector<8x128xf32>
    %cst_9 = arith.constant 9.99999974E-6 : f32
    %17 = vector.broadcast %cst_9 : f32 to vector<8x128xf32>
    %18 = arith.addf %16, %17 : vector<8x128xf32>
    %19 = math.rsqrt %18 : vector<8x128xf32>
    %20 = arith.mulf %14, %19 : vector<8x128xf32>
    %21 = vector.broadcast %5 : vector<1x128xf32> to vector<8x128xf32>
    %22 = arith.mulf %20, %21 : vector<8x128xf32>
    %23 = vector.broadcast %6 : vector<1x128xf32> to vector<8x128xf32>
    %24 = arith.addf %22, %23 : vector<8x128xf32>
    %c0_10 = arith.constant 0 : index
    %c0_11 = arith.constant 0 : index
    %25 = vector.load %arg5[%c0_10, %c0_11] : memref<16x8xf32, #tpu.memory_space<vmem>>, vector<16x8xf32>
    %cst_12 = arith.constant dense<0.000000e+00> : vector<16x128xf32>
    %26 = tpu.matmul %25, %24, %cst_12 {dimension_numbers = #tpu.dot_dimension_numbers<[1], [0], [0], [1], [0, 0, 1, 1], [], []>, precision = #tpu.contract_precision<fp32>} : vector<16x8xf32>, vector<8x128xf32>, vector<16x128xf32> -> vector<16x128xf32>
    %c0_13 = arith.constant 0 : index
    %c0_14 = arith.constant 0 : index
    %27 = vector.load %arg6[%c0_13, %c0_14] : memref<16x1xf32, #tpu.memory_space<vmem>>, vector<16x1xf32>
    %28 = vector.broadcast %27 : vector<16x1xf32> to vector<16x128xf32>
    %29 = arith.addf %26, %28 : vector<16x128xf32>
    %cst_15 = arith.constant 5.000000e-01 : f32
    %30 = vector.broadcast %cst_15 : f32 to vector<16x128xf32>
    %31 = arith.mulf %30, %29 : vector<16x128xf32>
    %cst_16 = arith.constant 0.707106769 : f32
    %32 = vector.broadcast %cst_16 : f32 to vector<16x128xf32>
    %33 = arith.mulf %29, %32 : vector<16x128xf32>
    %34 = math.erf %33 : vector<16x128xf32>
    %cst_17 = arith.constant 1.000000e+00 : f32
    %35 = vector.broadcast %cst_17 : f32 to vector<16x128xf32>
    %36 = arith.addf %35, %34 : vector<16x128xf32>
    %37 = arith.mulf %31, %36 : vector<16x128xf32>
    %c0_18 = arith.constant 0 : index
    %c0_19 = arith.constant 0 : index
    %38 = vector.load %arg7[%c0_18, %c0_19] : memref<8x16xf32, #tpu.memory_space<vmem>>, vector<8x16xf32>
    %cst_20 = arith.constant dense<0.000000e+00> : vector<8x128xf32>
    %39 = tpu.matmul %38, %37, %cst_20 {dimension_numbers = #tpu.dot_dimension_numbers<[1], [0], [0], [1], [0, 0, 1, 1], [], []>, precision = #tpu.contract_precision<fp32>} : vector<8x16xf32>, vector<16x128xf32>, vector<8x128xf32> -> vector<8x128xf32>
    %c0_21 = arith.constant 0 : index
    %c0_22 = arith.constant 0 : index
    %40 = vector.load %arg8[%c0_21, %c0_22] : memref<8x1xf32, #tpu.memory_space<vmem>>, vector<8x1xf32>
    %41 = vector.broadcast %40 : vector<8x1xf32> to vector<8x128xf32>
    %42 = arith.addf %39, %41 : vector<8x128xf32>
    %c0_23 = arith.constant 0 : index
    %c0_24 = arith.constant 0 : index
    %43 = vector.load %arg9[%c0_23, %c0_24] : memref<128x256xf32, #tpu.memory_space<vmem>>, vector<128x256xf32>
    %cst_25 = arith.constant dense<0.000000e+00> : vector<8x256xf32>
    %44 = tpu.matmul %42, %43, %cst_25 {dimension_numbers = #tpu.dot_dimension_numbers<[1], [0], [0], [1], [0, 0, 1, 1], [], []>, precision = #tpu.contract_precision<fp32>} : vector<8x128xf32>, vector<128x256xf32>, vector<8x256xf32> -> vector<8x256xf32>
    %45 = vector.broadcast %11 : vector<1x256xf32> to vector<8x256xf32>
    %46 = arith.addf %44, %45 : vector<8x256xf32>
    %cst_26 = arith.constant 5.000000e-01 : f32
    %47 = vector.broadcast %cst_26 : f32 to vector<8x256xf32>
    %48 = arith.mulf %47, %46 : vector<8x256xf32>
    %cst_27 = arith.constant 0.707106769 : f32
    %49 = vector.broadcast %cst_27 : f32 to vector<8x256xf32>
    %50 = arith.mulf %46, %49 : vector<8x256xf32>
    %51 = math.erf %50 : vector<8x256xf32>
    %cst_28 = arith.constant 1.000000e+00 : f32
    %52 = vector.broadcast %cst_28 : f32 to vector<8x256xf32>
    %53 = arith.addf %52, %51 : vector<8x256xf32>
    %54 = arith.mulf %48, %53 : vector<8x256xf32>
    %c0_29 = arith.constant 0 : index
    %c0_30 = arith.constant 0 : index
    %55 = vector.load %arg10[%c0_29, %c0_30] : memref<256x128xf32, #tpu.memory_space<vmem>>, vector<256x128xf32>
    %cst_31 = arith.constant dense<0.000000e+00> : vector<8x128xf32>
    %56 = tpu.matmul %54, %55, %cst_31 {dimension_numbers = #tpu.dot_dimension_numbers<[1], [0], [0], [1], [0, 0, 1, 1], [], []>, precision = #tpu.contract_precision<fp32>} : vector<8x256xf32>, vector<256x128xf32>, vector<8x128xf32> -> vector<8x128xf32>
    %57 = vector.broadcast %9 : vector<1x128xf32> to vector<8x128xf32>
    %58 = arith.addf %56, %57 : vector<8x128xf32>
    %59 = arith.addf %1, %58 : vector<8x128xf32>
    %cst_32 = arith.constant dense<0.000000e+00> : vector<8x128xf32>
    %60 = tpu.matmul %59, %2, %cst_32 {dimension_numbers = #tpu.dot_dimension_numbers<[1], [0], [0], [1], [0, 0, 1, 1], [], []>, precision = #tpu.contract_precision<fp32>} : vector<8x128xf32>, vector<128x128xf32>, vector<8x128xf32> -> vector<8x128xf32>
    %61 = arith.subf %59, %60 : vector<8x128xf32>
    %62 = arith.mulf %61, %61 : vector<8x128xf32>
    %cst_33 = arith.constant dense<0.000000e+00> : vector<8x128xf32>
    %63 = tpu.matmul %62, %2, %cst_33 {dimension_numbers = #tpu.dot_dimension_numbers<[1], [0], [0], [1], [0, 0, 1, 1], [], []>, precision = #tpu.contract_precision<fp32>} : vector<8x128xf32>, vector<128x128xf32>, vector<8x128xf32> -> vector<8x128xf32>
    %cst_34 = arith.constant 9.99999974E-6 : f32
    %64 = vector.broadcast %cst_34 : f32 to vector<8x128xf32>
    %65 = arith.addf %63, %64 : vector<8x128xf32>
    %66 = math.rsqrt %65 : vector<8x128xf32>
    %67 = arith.mulf %61, %66 : vector<8x128xf32>
    %68 = vector.broadcast %7 : vector<1x128xf32> to vector<8x128xf32>
    %69 = arith.mulf %67, %68 : vector<8x128xf32>
    %70 = vector.broadcast %8 : vector<1x128xf32> to vector<8x128xf32>
    %71 = arith.addf %69, %70 : vector<8x128xf32>
    %c0_35 = arith.constant 0 : index
    %c0_36 = arith.constant 0 : index
    %72 = vector.load %arg11[%c0_35, %c0_36] : memref<128x256xf32, #tpu.memory_space<vmem>>, vector<128x256xf32>
    %cst_37 = arith.constant dense<0.000000e+00> : vector<8x256xf32>
    %73 = tpu.matmul %71, %72, %cst_37 {dimension_numbers = #tpu.dot_dimension_numbers<[1], [0], [0], [1], [0, 0, 1, 1], [], []>, precision = #tpu.contract_precision<fp32>} : vector<8x128xf32>, vector<128x256xf32>, vector<8x256xf32> -> vector<8x256xf32>
    %74 = vector.broadcast %12 : vector<1x256xf32> to vector<8x256xf32>
    %75 = arith.addf %73, %74 : vector<8x256xf32>
    %cst_38 = arith.constant 5.000000e-01 : f32
    %76 = vector.broadcast %cst_38 : f32 to vector<8x256xf32>
    %77 = arith.mulf %76, %75 : vector<8x256xf32>
    %cst_39 = arith.constant 0.707106769 : f32
    %78 = vector.broadcast %cst_39 : f32 to vector<8x256xf32>
    %79 = arith.mulf %75, %78 : vector<8x256xf32>
    %80 = math.erf %79 : vector<8x256xf32>
    %cst_40 = arith.constant 1.000000e+00 : f32
    %81 = vector.broadcast %cst_40 : f32 to vector<8x256xf32>
    %82 = arith.addf %81, %80 : vector<8x256xf32>
    %83 = arith.mulf %77, %82 : vector<8x256xf32>
    %c0_41 = arith.constant 0 : index
    %c0_42 = arith.constant 0 : index
    %84 = vector.load %arg12[%c0_41, %c0_42] : memref<256x128xf32, #tpu.memory_space<vmem>>, vector<256x128xf32>
    %cst_43 = arith.constant dense<0.000000e+00> : vector<8x128xf32>
    %85 = tpu.matmul %83, %84, %cst_43 {dimension_numbers = #tpu.dot_dimension_numbers<[1], [0], [0], [1], [0, 0, 1, 1], [], []>, precision = #tpu.contract_precision<fp32>} : vector<8x256xf32>, vector<256x128xf32>, vector<8x128xf32> -> vector<8x128xf32>
    %86 = vector.broadcast %10 : vector<1x128xf32> to vector<8x128xf32>
    %87 = arith.addf %85, %86 : vector<8x128xf32>
    %88 = arith.addf %59, %87 : vector<8x128xf32>
    %c0_44 = arith.constant 0 : index
    %c0_45 = arith.constant 0 : index
    %c0_46 = arith.constant 0 : index
    %89 = vector.load %arg13[%c0_44, %c0_45, %c0_46] : memref<1x8x128xf32, #tpu.memory_space<vmem>>, vector<1x8x128xf32>
    %90 = vector.shape_cast %89 : vector<1x8x128xf32> to vector<8x128xf32>
    %91 = vector.shape_cast %88 : vector<8x128xf32> to vector<1x8x128xf32>
    tpu.vector_store %arg13[%c0_44, %c0_45, %c0_46], %91 {strides = array<i32>} : memref<1x8x128xf32, #tpu.memory_space<vmem>>, vector<1x8x128xf32>,
    return
  }
  func.func @transform_0(%arg0: i32) -> (i32, i32, i32) {
    %c0_i32 = arith.constant 0 : i32
    %c0_i32_0 = arith.constant 0 : i32
    %c0_i32_1 = arith.constant 0 : i32
    return %arg0, %c0_i32, %c0_i32_0 : i32, i32, i32
  }
  func.func @transform_1(%arg0: i32) -> (i32, i32) {
    %c0_i32 = arith.constant 0 : i32
    %c0_i32_0 = arith.constant 0 : i32
    %c0_i32_1 = arith.constant 0 : i32
    return %c0_i32, %c0_i32_0 : i32, i32
  }
  func.func @transform_2(%arg0: i32) -> (i32, i32) {
    %c0_i32 = arith.constant 0 : i32
    %c0_i32_0 = arith.constant 0 : i32
    %c0_i32_1 = arith.constant 0 : i32
    return %c0_i32, %c0_i32_0 : i32, i32
  }
  func.func @transform_3(%arg0: i32) -> (i32, i32) {
    %c0_i32 = arith.constant 0 : i32
    %c0_i32_0 = arith.constant 0 : i32
    %c0_i32_1 = arith.constant 0 : i32
    return %c0_i32, %c0_i32_0 : i32, i32
  }
  func.func @transform_4(%arg0: i32) -> (i32, i32) {
    %c0_i32 = arith.constant 0 : i32
    %c0_i32_0 = arith.constant 0 : i32
    %c0_i32_1 = arith.constant 0 : i32
    return %c0_i32, %c0_i32_0 : i32, i32
  }
  func.func @transform_5(%arg0: i32) -> (i32, i32) {
    %c0_i32 = arith.constant 0 : i32
    %c0_i32_0 = arith.constant 0 : i32
    %c0_i32_1 = arith.constant 0 : i32
    return %c0_i32, %c0_i32_0 : i32, i32
  }
  func.func @transform_6(%arg0: i32) -> (i32, i32) {
    %c0_i32 = arith.constant 0 : i32
    %c0_i32_0 = arith.constant 0 : i32
    %c0_i32_1 = arith.constant 0 : i32
    return %c0_i32, %c0_i32_0 : i32, i32
  }
  func.func @transform_7(%arg0: i32) -> (i32, i32) {
    %c0_i32 = arith.constant 0 : i32
    %c0_i32_0 = arith.constant 0 : i32
    %c0_i32_1 = arith.constant 0 : i32
    return %c0_i32, %c0_i32_0 : i32, i32
  }
  func.func @transform_8(%arg0: i32) -> (i32, i32) {
    %c0_i32 = arith.constant 0 : i32
    %c0_i32_0 = arith.constant 0 : i32
    %c0_i32_1 = arith.constant 0 : i32
    return %c0_i32, %c0_i32_0 : i32, i32
  }
  func.func @transform_9(%arg0: i32) -> (i32, i32) {
    %c0_i32 = arith.constant 0 : i32
    %c0_i32_0 = arith.constant 0 : i32
    %c0_i32_1 = arith.constant 0 : i32
    return %c0_i32, %c0_i32_0 : i32, i32
  }
  func.func @transform_10(%arg0: i32) -> (i32, i32) {
    %c0_i32 = arith.constant 0 : i32
    %c0_i32_0 = arith.constant 0 : i32
    %c0_i32_1 = arith.constant 0 : i32
    return %c0_i32, %c0_i32_0 : i32, i32
  }
  func.func @transform_11(%arg0: i32) -> (i32, i32) {
    %c0_i32 = arith.constant 0 : i32
    %c0_i32_0 = arith.constant 0 : i32
    %c0_i32_1 = arith.constant 0 : i32
    return %c0_i32, %c0_i32_0 : i32, i32
  }
  func.func @transform_12(%arg0: i32) -> (i32, i32, i32) {
    %c0_i32 = arith.constant 0 : i32
    %c0_i32_0 = arith.constant 0 : i32
    %c0_i32_1 = arith.constant 0 : i32
    return %arg0, %c0_i32, %c0_i32_0 : i32, i32, i32
  }
}

</mosaic_0001>

<bundles_post_ra>
// kernel: tile.26
= control target key start
LH: loop header
LB: loop body
LE: loop exit
PB: predicated region body
PF: predicated region fallthrough
CT: control target
= control target key end

     0   :  { %s22_s0 = inlined_call_operand.vmem [shape: f32[16], index: 0, kind: input, shape index: {}]   ;;  %s23_s1 = inlined_call_operand.vmem [shape: f32[8,16], index: 1, kind: output, shape index: {}]  }
   0x1   :  { %v4_v0 = vld [vmem:[%s22_s0] ss:$0 sm:$0xff] }
   0x2   :  { %5 = vst [vmem:[%s23_s1] sm:$0xff] %v4_v0 }

// kernel: tile.46
= control target key start
LH: loop header
LB: loop body
LE: loop exit
PB: predicated region body
PF: predicated region fallthrough
CT: control target
= control target key end

     0   :  { %s22_s0 = inlined_call_operand.vmem [shape: f32[32], index: 0, kind: input, shape index: {}]   ;;  %s23_s1 = inlined_call_operand.vmem [shape: f32[8,32], index: 1, kind: output, shape index: {}]  }
   0x1   :  { %v4_v0 = vld [vmem:[%s22_s0] ss:$0 sm:$0xff] }
   0x2   :  { %5 = vst [vmem:[%s23_s1] sm:$0xff] %v4_v0 }

// kernel: tile.47
= control target key start
LH: loop header
LB: loop body
LE: loop exit
PB: predicated region body
PF: predicated region fallthrough
CT: control target
= control target key end

     0   :  { %s7_s6 = smov 3  ;;  %s14_s9 = smov 3  ;;  %vm4_vm0 = vcmask 261120   ;;  %vm11_vm1 = vcmask 1048320   ;;  %vm18_vm2 = vcmask 785920   ;;  %vm25_vm3 = vcmask 523520   ;;  %s79_s0 = inlined_call_operand.vmem [shape: f32[8,32], index: 0, kind: input, shape index: {}]   ;;  %s80_s1 = inlined_call_operand.vmem [shape: f32[1,256], index: 1, kind: output, shape index: {}]  }
   0x1   :  { %v41_v0 = vld [vmem:[%s79_s0 + $0x3] ss:$4 sm:%s7_s6]   ;;  %s48_s10 = smov 96   ;;  %s21_s11 = smov 3  ;;  %v42_v1 = vld [vmem:[%s79_s0 + $0x2] ss:$4 sm:%s14_s9]  }
   0x2   :  { %9 = vrot.lane.b32.xlu0 %v41_v0, %s48_s10  ;;  %v43_v2 = vld [vmem:[%s79_s0 + $0x1] ss:$4 sm:%s21_s11]   ;;  %s2_s16 = smov 3  ;;  %s49_s17 = smov 32  }
   0x3   :  { %23 = vrot.lane.b32.xlu1 %v43_v2, %s49_s17  ;;  %v3_v3 = vld [vmem:[%s79_s0] ss:$4 sm:%s2_s16]   ;;  %s50_s0 = smov 64  }
   0x4   :  { %5 = vst.msk [vmem:[#allocation0] ss:$8 sm:$0x3] %vm4_vm0, %v3_v3  }
   0x6   :  { %16 = vrot.lane.b32.xlu0 %v42_v1, %s50_s0 }
  0x74   :  { %v10_v4 = vpop.permute.xlu0 %9  }
  0x75   :  { %12 = vst.msk [vmem:[#allocation0] ss:$8 sm:$0x3] %vm11_vm1, %v10_v4   ;;  %v24_v5 = vpop.permute.xlu1 %23  }
  0x78   :  { %v17_v6 = vpop.permute.xlu0 %16  }
  0x79   :  { %19 = vst.msk [vmem:[#allocation0] ss:$8 sm:$0x3] %vm18_vm2, %v17_v6  }
  0x7a   :  { %26 = vst.msk [vmem:[#allocation0] ss:$8 sm:$0x3] %vm25_vm3, %v24_v5  }
  0x81   :  { %v31_v7 = vld [vmem:[#allocation0] sm:$0x1]  ;;  %v36_v8 = vld [vmem:[#allocation0 + $0x8] sm:$0x1] }
  0x82   :  { %34 = vst [vmem:[%s80_s1] sm:$0x1] %v31_v7  ;;  %44 = vst [vmem:[%s80_s1 + $0x1] sm:$0x1] %v36_v8 }

// kernel: mixer_block.1
= control target key start
LH: loop header
LB: loop body
LE: loop exit
PB: predicated region body
PF: predicated region fallthrough
CT: control target
= control target key end

     0   :  { %s9588_s21 = smov 0   ;;  %s13269_s0 = inlined_call_operand.vmem [shape: f32[2,8,128], index: 0, kind: input, shape index: {}]   ;;  %s13270_s1 = inlined_call_operand.vmem [shape: f32[128,128], index: 1, kind: input, shape index: {}]   ;;  %s13271_s2 = inlined_call_operand.vmem [shape: f32[6,128], index: 2, kind: input, shape index: {}]   ;;  %s13272_s3 = inlined_call_operand.vmem [shape: f32[2,256], index: 3, kind: input, shape index: {}]   ;;  %s13273_s4 = inlined_call_operand.vmem [shape: f32[16,8], index: 4, kind: input, shape index: {}]   ;;  %s13274_s5 = inlined_call_operand.vmem [shape: f32[16,1], index: 5, kind: input, shape index: {}]   ;;  %s13275_s6 = inlined_call_operand.vmem [shape: f32[8,16], index: 6, kind: input, shape index: {}]   ;;  %s13276_s7 = inlined_call_operand.vmem [shape: f32[8,1], index: 7, kind: input, shape index: {}]   ;;  %s13277_s8 = inlined_call_operand.vmem [shape: f32[128,256], index: 8, kind: input, shape index: {}]   ;;  %s13278_s9 = inlined_call_operand.vmem [shape: f32[256,128], index: 9, kind: input, shape index: {}]   ;;  %s13279_s10 = inlined_call_operand.vmem [shape: f32[128,256], index: 10, kind: input, shape index: {}]   ;;  %s13280_s11 = inlined_call_operand.vmem [shape: f32[256,128], index: 11, kind: input, shape index: {}]   ;;  %s13281_s12 = inlined_call_operand.vmem [shape: f32[2,8,128], index: 12, kind: output, shape index: {}]  }
   0x1 LB: > { %s7693_s22 = sadd.s32 4294967295, %s9518_s21   ;;  %p7697_p0 = scmp.ge.s32.totalorder %s9518_s21, 1  ;;  %s9518_s21 = sphi %s9588_s21, %s22_s21  }
   0x2   : > { %p361_p1 = scmp.lt.s32.totalorder %s9518_s21, 3 }
   0x4   : > { %p362_p2 = pnand %p7697_p0, %p361_p1 }
   0x6   : > { %365 = sbr.rel (%p362_p2) target bundleno = 2785 (0xae1), region = 68 }
   0xb   : > { %v425_v0 = vld [vmem:[%s13270_s1 + $0x78] sm:$0xff]  ;;  %v424_v1 = vld [vmem:[%s13270_s1 + $0x70] sm:$0xff]  ;;  %v423_v2 = vld [vmem:[%s13270_s1 + $0x68] sm:$0xff]  ;;  %p9607_p3 = scmp.lt.s32.totalorder %s7693_s22, 1  ;;  %v13324_v3 = vmov 0.0   ;;  %vm9521_vm0 = vmmov 0  }
   0xc   : > { %8566 = vmatprep.subr.mxu0 %v13324_v3  ;;  %v9612_v4 = vand.u32 4294901760, %v425_v0  ;;  %v9614_v5 = vand.u32 4294901760, %v424_v1  ;;  %v9616_v6 = vand.u32 4294901760, %v423_v2  ;;  %v422_v7 = vld [vmem:[%s13270_s1 + $0x60] sm:$0xff]  ;;  %8601 = vmatprep.subr.mxu1 %v13324_v3  ;;  %v421_v8 = vld [vmem:[%s13270_s1 + $0x58] sm:$0xff]  ;;  %v420_v9 = vld [vmem:[%s13270_s1 + $0x50] sm:$0xff] }
   0xd   : > { %v9628_v10 = vand.u32 4294901760, %v422_v7  ;;  %v9630_v11 = vand.u32 4294901760, %v421_v8  ;;  %v9632_v12 = vand.u32 4294901760, %v420_v9  ;;  %v419_v13 = vld [vmem:[%s13270_s1 + $0x48] sm:$0xff]  ;;  %v418_v14 = vld [vmem:[%s13270_s1 + $0x40] sm:$0xff]  ;;  %8598 = vmatprep.mubr.msk.f32.mxu0 %vm9521_vm0, %v13324_v3  ;;  %8633 = vmatprep.mubr.msk.f32.mxu1 %vm9521_vm0, %v13324_v3  ;;  %v417_v19 = vld [vmem:[%s13270_s1 + $0x38] sm:$0xff] }
   0xe   : > { %13709 = vst [vmem:[#allocation2_spill] sm:$0xff] %v9612_v4  ;;  %13710 = vst [vmem:[#allocation3_spill] sm:$0xff] %v9614_v5  ;;  %8567 = vmatpush3.msra.mxu0 %v9612_v4  ;;  %v9646_v15 = vsub.f32 %v425_v0, %v9612_v4  ;;  %v9649_v16 = vsub.f32 %v424_v1, %v9614_v5  ;;  %v9651_v17 = vand.u32 4294901760, %v419_v13  ;;  %s14222_s22 = smov (!%p9607_p3, %s7693_s22), 1  ;;  %v9682_v25 = vand.u32 4294901760, %v418_v14  ;;  %v416_v26 = vld [vmem:[%s13270_s1 + $0x30] sm:$0xff] }
   0xf   : > { %13711 = vst [vmem:[#allocation4_spill] sm:$0xff] %v9616_v6  ;;  %13712 = vst [vmem:[#allocation5_spill] sm:$0xff] %v9628_v10  ;;  %v9654_v18 = vsub.f32 %v423_v2, %v9616_v6  ;;  %8568 = vmatprep.subr.mxu0 %v13324_v3  ;;  %v9667_v20 = vsub.f32 %v422_v7, %v9628_v10  ;;  %v9670_v21 = vsub.f32 %v421_v8, %v9630_v11  ;;  %s7698_s28 = sshll.u32 %s14222_s22, 3  ;;  %v415_v36 = vld [vmem:[%s13270_s1 + $0x28] sm:$0xff]  ;;  %v414_v41 = vld [vmem:[%s13270_s1 + $0x20] sm:$0xff]  ;;  %vm1738_vm1 = vcmask 64512  }
  0x10   : > { %13713 = vst [vmem:[#allocation6_spill] sm:$0xff] %v9630_v11  ;;  %13714 = vst [vmem:[#allocation7_spill] sm:$0xff] %v9632_v12  ;;  %8569 = vmatpush3.msra.mxu0 %v9614_v5  ;;  %v9674_v22 = vand.u32 4294901760, %v9646_v15  ;;  %v9677_v23 = vand.u32 4294901760, %v9649_v16  ;;  %v9691_v28 = vand.u32 4294901760, %v417_v19  ;;  %v9697_v30 = vsub.f32 %v420_v9, %v9632_v12  ;;  %s9734_s17 = scalar_lea.vmem %s13269_s0, %s7698_s28  ;;  %v413_v49 = vld [vmem:[%s13270_s1 + $0x18] sm:$0xff]  ;;  %s408_s18 = scalar_lea.vmem %s13281_s12, %s7698_s28 }
  0x11   : > { %13715 = vst [vmem:[#allocation8_spill] sm:$0xff] %v9646_v15  ;;  %13716 = vst [vmem:[#allocation9_spill] sm:$0xff] %v9649_v16  ;;  %v9680_v24 = vand.u32 4294901760, %v9654_v18  ;;  %8570 = vmatprep.subr.mxu0 %v13324_v3  ;;  %v9689_v27 = vand.u32 4294901760, %v9667_v20  ;;  %v9694_v29 = vand.u32 4294901760, %v9670_v21  ;;  %v9708_v34 = vsub.f32 %v419_v13, %v9651_v17  ;;  %v9762_v50 = vld [vmem:[%s9734_s17] sm:$0xff] }
  0x12   : > { %13717 = vst [vmem:[#allocation10_spill] sm:$0xff] %v9651_v17  ;;  %13718 = vst [vmem:[#allocation11_spill] sm:$0xff] %v9654_v18  ;;  %8571 = vmatpush3.msra.mxu0 %v9616_v6  ;;  %v523_v31 = vsub.f32 %v9646_v15, %v9674_v22  ;;  %v530_v32 = vsub.f32 %v9649_v16, %v9677_v23  ;;  %v9711_v35 = vand.u32 4294901760, %v416_v26  ;;  %v9724_v40 = vand.u32 4294901760, %v9697_v30  ;;  %v412_v54 = vld [vmem:[%s13270_s1 + $0x10] sm:$0xff]  ;;  %v411_v60 = vld [vmem:[%s13270_s1 + $0x8] sm:$0xff] }
  0x13   : > { %13719 = vst [vmem:[#allocation12_spill] sm:$0xff] %v9667_v20  ;;  %13720 = vst [vmem:[#allocation13_spill] sm:$0xff] %v9670_v21  ;;  %v537_v33 = vsub.f32 %v9654_v18, %v9680_v24  ;;  %8572 = vmatprep.subr.mxu0 %v13324_v3  ;;  %v544_v39 = vsub.f32 %v9667_v20, %v9689_v27  ;;  %v551_v42 = vsub.f32 %v9670_v21, %v9694_v29  ;;  %v410_v7 = vld [vmem:[%s13270_s1] sm:$0xff]  ;;  %vm2251_vm2 = vcmask 130048  }
  0x14   : > { %13721 = vst [vmem:[#allocation14_spill] sm:$0xff] %v9674_v22  ;;  %13722 = vst [vmem:[#allocation15_spill] sm:$0xff] %v9677_v23  ;;  %8573 = vmatpush3.msra.mxu0 %v9628_v10  ;;  %v9717_v37 = vand.u32 4294901760, %v523_v31  ;;  %v9719_v38 = vand.u32 4294901760, %v530_v32  ;;  %v9740_v43 = vsub.f32 %v418_v14, %v9682_v25  ;;  %v9746_v45 = vand.u32 4294901760, %v415_v36 }
  0x15   : > { %13723 = vst [vmem:[#allocation16_spill] sm:$0xff] %v9680_v24  ;;  %13724 = vst [vmem:[#allocation17_spill] sm:$0xff] %v9682_v25  ;;  %8574 = vmatprep.subr.mxu0 %v13324_v3  ;;  %v9744_v44 = vand.u32 4294901760, %v537_v33  ;;  %v9749_v46 = vand.u32 4294901760, %v9708_v34  ;;  %v9752_v47 = vsub.f32 %v417_v19, %v9691_v28  ;;  %v9756_v48 = vand.u32 4294901760, %v414_v41 }
  0x16   : > { %13725 = vst [vmem:[#allocation18_spill] sm:$0xff] %v9689_v27  ;;  %13726 = vst [vmem:[#allocation19_spill] sm:$0xff] %v9691_v28  ;;  %8575 = vmatpush3.msra.mxu0 %v9630_v11  ;;  %8602 = vmatpush3.msra.mxu1 %v9717_v37  ;;  %v9766_v51 = vand.u32 4294901760, %v544_v39  ;;  %v558_v52 = vsub.f32 %v9697_v30, %v9724_v40  ;;  %v9771_v53 = vand.u32 4294901760, %v9740_v43  ;;  %v9781_v56 = vand.u32 4294901760, %v551_v42 }
  0x17   : > { %13727 = vst [vmem:[#allocation20_spill] sm:$0xff] %v9694_v29  ;;  %13728 = vst [vmem:[#allocation21_spill] sm:$0xff] %v9697_v30  ;;  %8576 = vmatprep.subr.mxu0 %v13324_v3  ;;  %8603 = vmatprep.subr.mxu1 %v13324_v3  ;;  %v9777_v55 = vsub.f32 %v416_v26, %v9711_v35  ;;  %v9784_v57 = vand.u32 4294901760, %v9752_v47  ;;  %v565_v58 = vsub.f32 %v9708_v34, %v9749_v46 }
  0x18   : > { %13729 = vst [vmem:[#allocation22_spill] sm:$0xff] %v9708_v34  ;;  %13730 = vst [vmem:[#allocation23_spill] sm:$0xff] %v9711_v35  ;;  %8577 = vmatpush3.msra.mxu0 %v9632_v12  ;;  %8604 = vmatpush3.msra.mxu1 %v9719_v38  ;;  %v9790_v59 = vand.u32 4294901760, %v413_v49  ;;  %v9796_v61 = vsub.f32 %v415_v36, %v9746_v45  ;;  %v9799_v62 = vand.u32 4294901760, %v9762_v50  ;;  %v9803_v63 = vand.u32 4294901760, %v412_v54 }
  0x19   : > { %13731 = vst [vmem:[#allocation24_spill] sm:$0xff] %v9717_v37  ;;  %13732 = vst [vmem:[#allocation25_spill] sm:$0xff] %v9719_v38  ;;  %8578 = vmatprep.subr.mxu0 %v13324_v3  ;;  %8605 = vmatprep.subr.mxu1 %v13324_v3  ;;  %v9807_v0 = vand.u32 4294901760, %v558_v52  ;;  %v572_v1 = vsub.f32 %v9740_v43, %v9771_v53  ;;  %v9812_v2 = vand.u32 4294901760, %v9777_v55  ;;  %v9824_v13 = vand.u32 4294901760, %v411_v60 }
  0x1a   : > { %13733 = vst [vmem:[#allocation26_spill] sm:$0xff] %v9724_v40  ;;  %13734 = vst [vmem:[#allocation27_spill] sm:$0xff] %v9740_v43  ;;  %8579 = vmatpush3.msra.mxu0 %v9651_v17  ;;  %8606 = vmatpush3.msra.mxu1 %v9744_v44  ;;  %v9818_v8 = vsub.f32 %v414_v41, %v9756_v48  ;;  %v579_v9 = vsub.f32 %v9752_v47, %v9784_v57  ;;  %v9828_v14 = vand.u32 4294901760, %v565_v58 }
  0x1b   : > { %13735 = vst [vmem:[#allocation28_spill] sm:$0xff] %v9744_v44  ;;  %13736 = vst [vmem:[#allocation29_spill] sm:$0xff] %v9746_v45  ;;  %8580 = vmatprep.subr.mxu0 %v13324_v3  ;;  %8607 = vmatprep.subr.mxu1 %v13324_v3  ;;  %v9831_v19 = vand.u32 4294901760, %v9796_v61  ;;  %v9835_v26 = vsub.f32 %v9762_v50, %v9799_v62  ;;  %v9838_v31 = vsub.f32 %v413_v49, %v9790_v59 }
  0x1c   : > { %13737 = vst [vmem:[#allocation30_spill] sm:$0xff] %v9749_v46  ;;  %13738 = vst [vmem:[#allocation31_spill] sm:$0xff] %v9752_v47  ;;  %8581 = vmatpush3.msra.mxu0 %v9682_v25  ;;  %8608 = vmatpush3.msra.mxu1 %v9766_v51  ;;  %v9842_v32 = vand.u32 4294901760, %v410_v7  ;;  %v9846_v33 = vand.u32 4294901760, %v572_v1  ;;  %v586_v36 = vsub.f32 %v9777_v55, %v9812_v2  ;;  %v9851_v39 = vand.u32 4294901760, %v9818_v8 }
  0x1d   : > { %13739 = vst [vmem:[#allocation32_spill] sm:$0xff] %v9756_v48  ;;  %13740 = vst [vmem:[#allocation33_spill] sm:$0xff] %v9762_v50  ;;  %8582 = vmatprep.subr.mxu0 %v13324_v3  ;;  %8609 = vmatprep.subr.mxu1 %v13324_v3  ;;  %v9854_v41 = vsub.f32 %v412_v54, %v9803_v63  ;;  %v9858_v42 = vand.u32 4294901760, %v579_v9  ;;  %v593_v49 = vsub.f32 %v9796_v61, %v9831_v19 }
  0x1e   : > { %13741 = vst [vmem:[#allocation34_spill] sm:$0xff] %v9766_v51  ;;  %13742 = vst [vmem:[#allocation35_spill] sm:$0xff] %v9771_v53  ;;  %8583 = vmatpush3.msra.mxu0 %v9691_v28  ;;  %8610 = vmatpush3.msra.mxu1 %v9781_v56  ;;  %v9866_v58 = vand.u32 4294901760, %v9838_v31  ;;  %v9869_v54 = vsub.f32 %v411_v60, %v9824_v13  ;;  %v9875_v1 = vand.u32 4294901760, %v586_v36  ;;  %v13767_v36 = vand.u32 4294901760, %v9835_v26 }
  0x1f   : > { %13743 = vst [vmem:[#allocation36_spill] sm:$0xff] %v9777_v55  ;;  %13744 = vst [vmem:[#allocation37_spill] sm:$0xff] %v9781_v56  ;;  %8584 = vmatprep.subr.mxu0 %v13324_v3  ;;  %8611 = vmatprep.subr.mxu1 %v13324_v3  ;;  %v600_v9 = vsub.f32 %v9818_v8, %v9851_v39  ;;  %v9880_v52 = vand.u32 4294901760, %v9854_v41  ;;  %v9883_v50 = vsub.f32 %v410_v7, %v9842_v32 }
  0x20   : > { %13745 = vst [vmem:[#allocation38_spill] sm:$0xff] %v9784_v57  ;;  %13746 = vst [vmem:[#allocation39_spill] sm:$0xff] %v9790_v59  ;;  %8585 = vmatpush3.msra.mxu0 %v9711_v35  ;;  %8612 = vmatpush3.msra.mxu1 %v9807_v0  ;;  %v9889_v60 = vand.u32 4294901760, %v593_v49  ;;  %v9897_v7 = vand.u32 4294901760, %v9869_v54 }
  0x21   : > { %13747 = vst [vmem:[#allocation40_spill] sm:$0xff] %v9796_v61  ;;  %13748 = vst [vmem:[#allocation41_spill] sm:$0xff] %v9803_v63  ;;  %8586 = vmatprep.subr.mxu0 %v13324_v3  ;;  %8613 = vmatprep.subr.mxu1 %v13324_v3  ;;  %v9903_v49 = vand.u32 4294901760, %v600_v9 }
  0x22   : > { %13749 = vst [vmem:[#allocation42_spill] sm:$0xff] %v9807_v0  ;;  %13750 = vst [vmem:[#allocation43_spill] sm:$0xff] %v9812_v2  ;;  %8587 = vmatpush3.msra.mxu0 %v9746_v45  ;;  %8614 = vmatpush3.msra.mxu1 %v9828_v14  ;;  %v621_v9 = vsub.f32 %v9869_v54, %v9897_v7 }
  0x23   : > { %13751 = vst [vmem:[#allocation44_spill] sm:$0xff] %v9818_v8  ;;  %13752 = vst [vmem:[#allocation45_spill] sm:$0xff] %v9824_v13  ;;  %8588 = vmatprep.subr.mxu0 %v13324_v3  ;;  %8615 = vmatprep.subr.mxu1 %v13324_v3 }
  0x24   : > { %13753 = vst [vmem:[#allocation46_spill] sm:$0xff] %v9828_v14  ;;  %13754 = vst [vmem:[#allocation47_spill] sm:$0xff] %v9831_v19  ;;  %8589 = vmatpush3.msra.mxu0 %v9756_v48  ;;  %8616 = vmatpush3.msra.mxu1 %v9846_v33  ;;  %v607_v14 = vsub.f32 %v9838_v31, %v9866_v58 }
  0x25   : > { %13755 = vst [vmem:[#allocation48_spill] sm:$0xff] %v9838_v31  ;;  %13756 = vst [vmem:[#allocation49_spill] sm:$0xff] %v9842_v32  ;;  %8590 = vmatprep.subr.mxu0 %v13324_v3  ;;  %8617 = vmatprep.subr.mxu1 %v13324_v3 }
  0x26   : > { %13757 = vst [vmem:[#allocation50_spill] sm:$0xff] %v9846_v33  ;;  %13758 = vst [vmem:[#allocation51_spill] sm:$0xff] %v9851_v39  ;;  %8591 = vmatpush3.msra.mxu0 %v9790_v59  ;;  %8618 = vmatpush3.msra.mxu1 %v9858_v42  ;;  %v512_v33 = vsub.f32 %v9835_v26, %v13767_v36  ;;  %v9908_v36 = vand.u32 4294901760, %v9883_v50  ;;  %v9914_v56 = vand.u32 4294901760, %v607_v14  ;;  %v9929_v14 = vand.u32 4294901760, %v621_v9 }
  0x27   : > { %13759 = vst [vmem:[#allocation52_spill] sm:$0xff] %v9854_v41  ;;  %13760 = vst [vmem:[#allocation53_spill] sm:$0xff] %v9858_v42  ;;  %8592 = vmatprep.subr.mxu0 %v13324_v3  ;;  %8619 = vmatprep.subr.mxu1 %v13324_v3  ;;  %v614_v42 = vsub.f32 %v9854_v41, %v9880_v52 }
  0x28   : > { %13761 = vst [vmem:[#allocation54_spill] sm:$0xff] %v9866_v58  ;;  %13762 = vst [vmem:[#allocation55_spill] sm:$0xff] %v9869_v54  ;;  %8593 = vmatpush3.msra.mxu0 %v9803_v63  ;;  %8620 = vmatpush3.msra.mxu1 %v9875_v1  ;;  %v513_v0 = vand.u32 4294901760, %v512_v33  ;;  %v628_v51 = vsub.f32 %v9883_v50, %v9908_v36 }
  0x29   : > { %13763 = vst [vmem:[#allocation56_spill] sm:$0xff] %v9875_v1  ;;  %13764 = vst [vmem:[#allocation57_spill] sm:$0xff] %v9880_v52  ;;  %8594 = vmatprep.subr.mxu0 %v13324_v3  ;;  %8621 = vmatprep.subr.mxu1 %v13324_v3  ;;  %v9922_v1 = vand.u32 4294901760, %v614_v42 }
  0x2a   : > { %13765 = vst [vmem:[#allocation58_spill] sm:$0xff] %v9883_v50  ;;  %13766 = vst [vmem:[#allocation59_spill] sm:$0xff] %v9889_v60  ;;  %8595 = vmatpush3.msra.mxu0 %v9824_v13  ;;  %8622 = vmatpush3.msra.mxu1 %v9889_v60  ;;  %v9935_v33 = vand.u32 4294901760, %v628_v51  ;;  %v13775_v51 = vand.u32 4294901760, %v9835_v26 }
  0x2b   : > { %13768 = vst [vmem:[#allocation60_spill] sm:$0xff] %v9897_v7  ;;  %13769 = vst [vmem:[#allocation61_spill] sm:$0xff] %v9903_v49  ;;  %8596 = vmatprep.subr.mxu0 %v13324_v3  ;;  %8623 = vmatprep.subr.mxu1 %v13324_v3  ;;  %v13779_v42 = vld [vmem:[#allocation46_spill] sm:$0xff] }
  0x2c   : > { %13770 = vst [vmem:[#allocation62_spill] sm:$0xff] %v9908_v36  ;;  %13771 = vst [vmem:[#allocation63_spill] sm:$0xff] %v9914_v56  ;;  %8597 = vmatpush3.msra.mxu0 %v9842_v32  ;;  %8624 = vmatpush3.msra.mxu1 %v9903_v49 }
  0x2d   : > { %13772 = vst [vmem:[#allocation64_spill] sm:$0xff] %v9922_v1  ;;  %8625 = vmatprep.subr.mxu1 %v13324_v3  ;;  %8636 = vmatprep.subr.mxu0 %v13324_v3  ;;  %13773 = vst [vmem:[#allocation65_spill] sm:$0xff] %v9929_v14  ;;  %v13780_v9 = vld [vmem:[#allocation50_spill] sm:$0xff] }
  0x2e   : > { %8599 = vmatmul.mubr.f32.vlgmr.msra.gmra.mxu0 %v513_v0  ;;  %8626 = vmatpush3.msra.mxu1 %v9914_v56  ;;  %13774 = vst [vmem:[#allocation66_spill] sm:$0xff] %v9935_v33  ;;  %v13777_v0 = vld [vmem:[#allocation37_spill] sm:$0xff] }
  0x2f   : > { %8637 = vmatpush3.msra.mxu0 %v9646_v15  ;;  %8627 = vmatprep.subr.mxu1 %v13324_v3 }
  0x30   : > { %8638 = vmatprep.subr.mxu0 %v13324_v3  ;;  %8628 = vmatpush3.msra.mxu1 %v9922_v1 }
  0x31   : > { %8639 = vmatpush3.msra.mxu0 %v9649_v16  ;;  %8629 = vmatprep.subr.mxu1 %v13324_v3 }
  0x32   : > { %8640 = vmatprep.subr.mxu0 %v13324_v3  ;;  %8630 = vmatpush3.msra.mxu1 %v9929_v14 }
  0x33   : > { %8641 = vmatpush3.msra.mxu0 %v9654_v18  ;;  %8631 = vmatprep.subr.mxu1 %v13324_v3 }
  0x34   : > { %8642 = vmatprep.subr.mxu0 %v13324_v3  ;;  %8632 = vmatpush3.msra.mxu1 %v9935_v33 }
  0x35   : > { %8643 = vmatpush3.msra.mxu0 %v9667_v20  ;;  %8634 = vmatmul.mubr.f32.vlgmr.msra.gmra.mxu1 %v9799_v62 }
  0x36   : > { %8644 = vmatprep.subr.mxu0 %v13324_v3  ;;  %8671 = vmatprep.subr.mxu1 %v13324_v3 }
  0x37   : > { %8645 = vmatpush3.msra.mxu0 %v9670_v21  ;;  %8672 = vmatpush3.msra.mxu1 %v9612_v4 }
  0x38   : > { %8646 = vmatprep.subr.mxu0 %v13324_v3  ;;  %8673 = vmatprep.subr.mxu1 %v13324_v3 }
  0x39   : > { %8647 = vmatpush3.msra.mxu0 %v9697_v30  ;;  %8674 = vmatpush3.msra.mxu1 %v9614_v5 }
  0x3a   : > { %8648 = vmatprep.subr.mxu0 %v13324_v3  ;;  %8675 = vmatprep.subr.mxu1 %v13324_v3 }
  0x3b   : > { %8649 = vmatpush3.msra.mxu0 %v9708_v34  ;;  %8676 = vmatpush3.msra.mxu1 %v9616_v6 }
  0x3c   : > { %8650 = vmatprep.subr.mxu0 %v13324_v3  ;;  %8677 = vmatprep.subr.mxu1 %v13324_v3 }
  0x3d   : > { %8651 = vmatpush3.msra.mxu0 %v9740_v43  ;;  %8678 = vmatpush3.msra.mxu1 %v9628_v10 }
  0x3e   : > { %8652 = vmatprep.subr.mxu0 %v13324_v3  ;;  %8679 = vmatprep.subr.mxu1 %v13324_v3 }
  0x3f   : > { %8653 = vmatpush3.msra.mxu0 %v9752_v47  ;;  %8680 = vmatpush3.msra.mxu1 %v9630_v11 }
  0x40   : > { %8654 = vmatprep.subr.mxu0 %v13324_v3  ;;  %8681 = vmatprep.subr.mxu1 %v13324_v3 }
  0x41   : > { %8655 = vmatpush3.msra.mxu0 %v9777_v55  ;;  %8682 = vmatpush3.msra.mxu1 %v9632_v12 }
  0x42   : > { %8656 = vmatprep.subr.mxu0 %v13324_v3  ;;  %8683 = vmatprep.subr.mxu1 %v13324_v3 }
  0x43   : > { %8657 = vmatpush3.msra.mxu0 %v9796_v61  ;;  %8684 = vmatpush3.msra.mxu1 %v9651_v17 }
  0x44   : > { %8658 = vmatprep.subr.mxu0 %v13324_v3  ;;  %8685 = vmatprep.subr.mxu1 %v13324_v3 }
  0x45   : > { %8659 = vmatpush3.msra.mxu0 %v9818_v8  ;;  %8686 = vmatpush3.msra.mxu1 %v9682_v25 }
  0x46   : > { %8660 = vmatprep.subr.mxu0 %v13324_v3  ;;  %8687 = vmatprep.subr.mxu1 %v13324_v3 }
  0x47   : > { %8661 = vmatpush3.msra.mxu0 %v9838_v31  ;;  %8688 = vmatpush3.msra.mxu1 %v9691_v28 }
  0x48   : > { %8662 = vmatprep.subr.mxu0 %v13324_v3  ;;  %8689 = vmatprep.subr.mxu1 %v13324_v3 }
  0x49   : > { %8663 = vmatpush3.msra.mxu0 %v9854_v41  ;;  %8690 = vmatpush3.msra.mxu1 %v9711_v35 }
  0x4a   : > { %8664 = vmatprep.subr.mxu0 %v13324_v3  ;;  %8691 = vmatprep.subr.mxu1 %v13324_v3 }
  0x4b   : > { %8665 = vmatpush3.msra.mxu0 %v9869_v54  ;;  %8692 = vmatpush3.msra.mxu1 %v9746_v45 }
  0x4c   : > { %8666 = vmatprep.subr.mxu0 %v13324_v3  ;;  %8693 = vmatprep.subr.mxu1 %v13324_v3 }
  0x4d   : > { %8667 = vmatpush3.msra.mxu0 %v9883_v50  ;;  %8668 = vmatprep.mubr.msk.f32.mxu0 %vm9521_vm0, %v13324_v3 }
  0x4e   : > { %8694 = vmatpush3.msra.mxu1 %v9756_v48  ;;  %8669 = vmatmul.mubr.f32.vlgmr.msra.gmra.mxu0 %v9835_v26  ;;  %v13778_v26 = vld [vmem:[#allocation42_spill] sm:$0xff] }
  0x4f   : > { %8695 = vmatprep.subr.mxu1 %v13324_v3  ;;  %8706 = vmatprep.subr.mxu0 %v13324_v3 }
  0x50   : > { %8696 = vmatpush3.msra.mxu1 %v9790_v59  ;;  %8707 = vmatpush3.msra.mxu0 %v9674_v22 }
  0x51   : > { %8697 = vmatprep.subr.mxu1 %v13324_v3  ;;  %8708 = vmatprep.subr.mxu0 %v13324_v3 }
  0x52   : > { %8698 = vmatpush3.msra.mxu1 %v9803_v63  ;;  %8709 = vmatpush3.msra.mxu0 %v9677_v23 }
  0x53   : > { %8699 = vmatprep.subr.mxu1 %v13324_v3  ;;  %8710 = vmatprep.subr.mxu0 %v13324_v3 }
  0x54   : > { %8700 = vmatpush3.msra.mxu1 %v9824_v13  ;;  %8711 = vmatpush3.msra.mxu0 %v9680_v24 }
  0x55   : > { %8701 = vmatprep.subr.mxu1 %v13324_v3  ;;  %8712 = vmatprep.subr.mxu0 %v13324_v3 }
  0x56   : > { %8702 = vmatpush3.msra.mxu1 %v9842_v32  ;;  %8703 = vmatprep.mubr.msk.f32.mxu1 %vm9521_vm0, %v13324_v3 }
  0x57   : > { %8713 = vmatpush3.msra.mxu0 %v9689_v27  ;;  %8704 = vmatmul.mubr.f32.vlgmr.msra.gmra.mxu1 %v13775_v51  ;;  %v13781_v51 = vld [vmem:[#allocation53_spill] sm:$0xff] }
  0x58   : > { %8714 = vmatprep.subr.mxu0 %v13324_v3  ;;  %8741 = vmatprep.subr.mxu1 %v13324_v3 }
  0x59   : > { %8715 = vmatpush3.msra.mxu0 %v9694_v29  ;;  %8742 = vmatpush3.msra.mxu1 %v9612_v4 }
  0x5a   : > { %8716 = vmatprep.subr.mxu0 %v13324_v3  ;;  %8743 = vmatprep.subr.mxu1 %v13324_v3 }
  0x5b   : > { %8717 = vmatpush3.msra.mxu0 %v9724_v40  ;;  %8744 = vmatpush3.msra.mxu1 %v9614_v5 }
  0x5c   : > { %8718 = vmatprep.subr.mxu0 %v13324_v3  ;;  %8745 = vmatprep.subr.mxu1 %v13324_v3 }
  0x5d   : > { %8719 = vmatpush3.msra.mxu0 %v9749_v46  ;;  %8746 = vmatpush3.msra.mxu1 %v9616_v6 }
  0x5e   : > { %8720 = vmatprep.subr.mxu0 %v13324_v3  ;;  %8747 = vmatprep.subr.mxu1 %v13324_v3 }
  0x5f   : > { %8721 = vmatpush3.msra.mxu0 %v9771_v53  ;;  %8748 = vmatpush3.msra.mxu1 %v9628_v10 }
  0x60   : > { %8722 = vmatprep.subr.mxu0 %v13324_v3  ;;  %8749 = vmatprep.subr.mxu1 %v13324_v3 }
  0x61   : > { %8723 = vmatpush3.msra.mxu0 %v9784_v57  ;;  %8750 = vmatpush3.msra.mxu1 %v9630_v11 }
  0x62   : > { %8724 = vmatprep.subr.mxu0 %v13324_v3  ;;  %8751 = vmatprep.subr.mxu1 %v13324_v3 }
  0x63   : > { %8725 = vmatpush3.msra.mxu0 %v9812_v2  ;;  %8752 = vmatpush3.msra.mxu1 %v9632_v12 }
  0x64   : > { %8726 = vmatprep.subr.mxu0 %v13324_v3  ;;  %8753 = vmatprep.subr.mxu1 %v13324_v3 }
  0x65   : > { %8727 = vmatpush3.msra.mxu0 %v9831_v19  ;;  %8754 = vmatpush3.msra.mxu1 %v9651_v17 }
  0x66   : > { %8728 = vmatprep.subr.mxu0 %v13324_v3  ;;  %8755 = vmatprep.subr.mxu1 %v13324_v3 }
  0x67   : > { %8729 = vmatpush3.msra.mxu0 %v9851_v39  ;;  %8756 = vmatpush3.msra.mxu1 %v9682_v25 }
  0x68   : > { %8730 = vmatprep.subr.mxu0 %v13324_v3  ;;  %8757 = vmatprep.subr.mxu1 %v13324_v3 }
  0x69   : > { %8731 = vmatpush3.msra.mxu0 %v9866_v58  ;;  %8758 = vmatpush3.msra.mxu1 %v9691_v28 }
  0x6a   : > { %8732 = vmatprep.subr.mxu0 %v13324_v3  ;;  %8759 = vmatprep.subr.mxu1 %v13324_v3 }
  0x6b   : > { %8733 = vmatpush3.msra.mxu0 %v9880_v52  ;;  %8760 = vmatpush3.msra.mxu1 %v9711_v35 }
  0x6c   : > { %8734 = vmatprep.subr.mxu0 %v13324_v3  ;;  %8761 = vmatprep.subr.mxu1 %v13324_v3 }
  0x6d   : > { %8735 = vmatpush3.msra.mxu0 %v9897_v7  ;;  %8762 = vmatpush3.msra.mxu1 %v9746_v45 }
  0x6e   : > { %8736 = vmatprep.subr.mxu0 %v13324_v3  ;;  %8763 = vmatprep.subr.mxu1 %v13324_v3 }
  0x6f   : > { %8737 = vmatpush3.msra.mxu0 %v9908_v36  ;;  %8738 = vmatprep.mubr.msk.f32.mxu0 %vm9521_vm0, %v13324_v3 }
  0x70   : > { %8764 = vmatpush3.msra.mxu1 %v9756_v48  ;;  %8739 = vmatmul.mubr.f32.vlgmr.msra.gmra.mxu0 %v9799_v62 }
  0x71   : > { %8765 = vmatprep.subr.mxu1 %v13324_v3  ;;  %8773 = vmatprep.mubr.msk.f32.mxu1 %vm9521_vm0, %v13324_v3 }
  0x72   : > { %8766 = vmatpush3.msra.mxu1 %v9790_v59  ;;  %8776 = vmatprep.subr.mxu0 %v13324_v3 }
  0x73   : > { %8767 = vmatprep.subr.mxu1 %v13324_v3  ;;  %8777 = vmatpush3.msra.mxu0 %v9612_v4 }
  0x74   : > { %8768 = vmatpush3.msra.mxu1 %v9803_v63  ;;  %8778 = vmatprep.subr.mxu0 %v13324_v3 }
  0x75   : > { %8769 = vmatprep.subr.mxu1 %v13324_v3  ;;  %8779 = vmatpush3.msra.mxu0 %v9614_v5 }
  0x76   : > { %8770 = vmatpush3.msra.mxu1 %v9824_v13  ;;  %8780 = vmatprep.subr.mxu0 %v13324_v3 }
  0x77   : > { %8771 = vmatprep.subr.mxu1 %v13324_v3  ;;  %8781 = vmatpush3.msra.mxu0 %v9616_v6 }
  0x78   : > { %8772 = vmatpush3.msra.mxu1 %v9842_v32  ;;  %8782 = vmatprep.subr.mxu0 %v13324_v3 }
  0x79   : > { %8774 = vmatmul.mubr.f32.vlgmr.msra.gmra.mxu1 %v9799_v62  ;;  %8811 = vmatprep.subr.mxu1 %v13324_v3  ;;  %v13776_v62 = vld [vmem:[#allocation34_spill] sm:$0xff] }
  0x7a   : > { %8812 = vmatpush3.msra.mxu1 %v9717_v37  ;;  %8783 = vmatpush3.msra.mxu0 %v9628_v10 }
  0x7b   : > { %8813 = vmatprep.subr.mxu1 %v13324_v3  ;;  %8784 = vmatprep.subr.mxu0 %v13324_v3 }
  0x7c   : > { %8814 = vmatpush3.msra.mxu1 %v9719_v38  ;;  %8785 = vmatpush3.msra.mxu0 %v9630_v11 }
  0x7d   : > { %8815 = vmatprep.subr.mxu1 %v13324_v3  ;;  %8786 = vmatprep.subr.mxu0 %v13324_v3 }
  0x7e   : > { %8816 = vmatpush3.msra.mxu1 %v9744_v44  ;;  %8787 = vmatpush3.msra.mxu0 %v9632_v12 }
  0x7f   : > { %8817 = vmatprep.subr.mxu1 %v13324_v3  ;;  %8788 = vmatprep.subr.mxu0 %v13324_v3 }
  0x80   : > { %8818 = vmatpush3.msra.mxu1 %v13776_v62  ;;  %8789 = vmatpush3.msra.mxu0 %v9651_v17 }
  0x81   : > { %8819 = vmatprep.subr.mxu1 %v13324_v3  ;;  %8790 = vmatprep.subr.mxu0 %v13324_v3 }
  0x82   : > { %8820 = vmatpush3.msra.mxu1 %v13777_v0  ;;  %8791 = vmatpush3.msra.mxu0 %v9682_v25 }
  0x83   : > { %8821 = vmatprep.subr.mxu1 %v13324_v3  ;;  %8792 = vmatprep.subr.mxu0 %v13324_v3 }
  0x84   : > { %8822 = vmatpush3.msra.mxu1 %v13778_v26  ;;  %8793 = vmatpush3.msra.mxu0 %v9691_v28 }
  0x85   : > { %8823 = vmatprep.subr.mxu1 %v13324_v3  ;;  %8794 = vmatprep.subr.mxu0 %v13324_v3 }
  0x86   : > { %8824 = vmatpush3.msra.mxu1 %v13779_v42  ;;  %8795 = vmatpush3.msra.mxu0 %v9711_v35  ;;  %v13782_v42 = vld [vmem:[#allocation56_spill] sm:$0xff] }
  0x87   : > { %8825 = vmatprep.subr.mxu1 %v13324_v3  ;;  %8796 = vmatprep.subr.mxu0 %v13324_v3 }
  0x88   : > { %8826 = vmatpush3.msra.mxu1 %v13780_v9  ;;  %8797 = vmatpush3.msra.mxu0 %v9746_v45 }
  0x89   : > { %8827 = vmatprep.subr.mxu1 %v13324_v3  ;;  %8798 = vmatprep.subr.mxu0 %v13324_v3 }
  0x8a   : > { %8828 = vmatpush3.msra.mxu1 %v13781_v51  ;;  %8799 = vmatpush3.msra.mxu0 %v9756_v48 }
  0x8b   : > { %8829 = vmatprep.subr.mxu1 %v13324_v3  ;;  %8800 = vmatprep.subr.mxu0 %v13324_v3 }
  0x8c   : > { %8830 = vmatpush3.msra.mxu1 %v13782_v42  ;;  %8843 = vmatprep.mubr.msk.f32.mxu1 %vm9521_vm0, %v13324_v3 }
  0x8d   : > { %8831 = vmatprep.subr.mxu1 %v13324_v3  ;;  %8801 = vmatpush3.msra.mxu0 %v9790_v59 }
  0x8e   : > { %8832 = vmatpush3.msra.mxu1 %v9889_v60  ;;  %8802 = vmatprep.subr.mxu0 %v13324_v3 }
  0x8f   : > { %8833 = vmatprep.subr.mxu1 %v13324_v3  ;;  %8803 = vmatpush3.msra.mxu0 %v9803_v63 }
  0x90   : > { %8834 = vmatpush3.msra.mxu1 %v9903_v49  ;;  %8804 = vmatprep.subr.mxu0 %v13324_v3 }
  0x91   : > { %8835 = vmatprep.subr.mxu1 %v13324_v3  ;;  %8805 = vmatpush3.msra.mxu0 %v9824_v13 }
  0x92   : > { %8836 = vmatpush3.msra.mxu1 %v9914_v56  ;;  %8806 = vmatprep.subr.mxu0 %v13324_v3 }
  0x93   : > { %8837 = vmatprep.subr.mxu1 %v13324_v3  ;;  %8807 = vmatpush3.msra.mxu0 %v9842_v32 }
  0x94   : > { %8838 = vmatpush3.msra.mxu1 %v9922_v1  ;;  %8808 = vmatprep.mubr.msk.f32.mxu0 %vm9521_vm0, %v13324_v3 }
  0x95   : > { %8839 = vmatprep.subr.mxu1 %v13324_v3  ;;  %8846 = vmatprep.subr.mxu0 %v13324_v3 }
  0x96   : > { %8840 = vmatpush3.msra.mxu1 %v9929_v14 }
  0x97   : > { %8841 = vmatprep.subr.mxu1 %v13324_v3 }
  0x98   : > { %8842 = vmatpush3.msra.mxu1 %v9935_v33  ;;  %v13783_v33 = vld [vmem:[#allocation33_spill] sm:$0xff] }
  0x99   : > { %8881 = vmatprep.subr.mxu1 %v13324_v3 }
  0xee   : > { %v515_v56 = vpop.f32.mrf.mxu0 }
  0xf0   : > { %v8600_v49 = vpop.f32.mrf.mxu0 }
  0xf5   : > { %v666_v60 = vpop.f32.mrf.mxu1 }
  0xf6   : > { %v667_v62 = vadd.f32 %v666_v60, %v515_v56  ;;  %v13784_v56 = vld [vmem:[#allocation54_spill] sm:$0xff] }
  0xf7   : > { %v8635_v42 = vpop.f32.mrf.mxu1  ;;  %v13787_v60 = vld [vmem:[#allocation62_spill] sm:$0xff] }
 0x10e   : > { %v770_v1 = vpop.f32.mrf.mxu0 }
 0x10f   : > { %v771_v38 = vadd.f32 %v770_v1, %v667_v62  ;;  %v13786_v1 = vld [vmem:[#allocation60_spill] sm:$0xff] }
 0x110   : > { %v8670_v51 = vpop.f32.mrf.mxu0 }
 0x117   : > { %v859_v9 = vpop.f32.mrf.mxu1 }
 0x118   : > { %v860_v37 = vadd.f32 %v859_v9, %v771_v38  ;;  %v1727_v9 = vld [vmem:[%s13274_s5 + $0x8] sm:$0xff] }
 0x119   : > { %v8705_v26 = vpop.f32.mrf.mxu1 }
 0x130   : > { %v978_v0 = vpop.f32.mrf.mxu0 }
 0x131   : > { %v979_v14 = vadd.f32 %v978_v0, %v860_v37 }
 0x132   : > { %v8740_v44 = vpop.f32.mrf.mxu0 }
 0x139   : > { %v1065_v36 = vpop.f32.mrf.mxu1 }
 0x13a   : > { %v1066_v7 = vadd.f32 %v1065_v36, %v979_v14 }
 0x13b   : > { %v8775_v52 = vpop.f32.mrf.mxu1 }
 0x13c   : > { %v10151_v58 = vsub.f32 %v13783_v33, %v1066_v7  ;;  %v13785_v52 = vld [vmem:[#allocation57_spill] sm:$0xff]  ;;  %v1724_v7 = vld [vmem:[%s13273_s4] sm:$0xff] }
 0x13d   : > { %v1740_v36 = vsel %vm1738_vm1, %v1724_v7, 0 }
 0x13e   : > { %v1070_v49 = vmul.f32 %v10151_v58, %v10151_v58  ;;  %v10304_v14 = vand.u32 4294901760, %v1740_v36 }
 0x140   : > { %v10155_v42 = vand.u32 4294901760, %v1070_v49  ;;  %v10307_v33 = vsub.f32 %v1740_v36, %v10304_v14 }
 0x142   : > { %v10158_v51 = vsub.f32 %v1070_v49, %v10155_v42  ;;  %8844 = vmatmul.mubr.f32.vlgmr.msra.gmra.mxu1 %v10155_v42  ;;  %v13323_v62 = vand.u32 4294901760, %v10307_v33  ;;  %v9522_v49 = vmov 0  }
 0x143   : > { %8882 = vmatpush3.msra.mxu1 %v9612_v4  ;;  %8913 = vmatprep.mubr.msk.f32.mxu1 %vm9521_vm0, %v13324_v3 }
 0x144   : > { %8883 = vmatprep.subr.mxu1 %v13324_v3  ;;  %v1154_v37 = vand.u32 4294901760, %v10158_v51  ;;  %v1814_v0 = vsub.f32 %v10307_v33, %v13323_v62  ;;  %9489 = vset.pattern.permute.xlu0 %v9522_v49 }
 0x145   : > { %8884 = vmatpush3.msra.mxu1 %v9614_v5  ;;  %9490 = vset.pattern.permute.xlu1 %v9522_v49 }
 0x146   : > { %8885 = vmatprep.subr.mxu1 %v13324_v3  ;;  %v1155_v38 = vsub.f32 %v10158_v51, %v1154_v37  ;;  %v1815_v26 = vand.u32 4294901760, %v1814_v0  ;;  %1735 = vperm.xlu0 %9489, %v1727_v9  }
 0x147   : > { %8886 = vmatpush3.msra.mxu1 %v9616_v6 }
 0x148   : > { %8887 = vmatprep.subr.mxu1 %v13324_v3  ;;  %v1156_v44 = vand.u32 4294901760, %v1155_v38 }
 0x149   : > { %8888 = vmatpush3.msra.mxu1 %v9628_v10 }
 0x14a   : > { %8889 = vmatprep.subr.mxu1 %v13324_v3  ;;  %8809 = vmatmul.mubr.f32.vlgmr.msra.gmra.mxu0 %v1156_v44 }
 0x14b   : > { %8847 = vmatpush3.msra.mxu0 %v9646_v15  ;;  %8890 = vmatpush3.msra.mxu1 %v9630_v11 }
 0x14c   : > { %8848 = vmatprep.subr.mxu0 %v13324_v3  ;;  %8891 = vmatprep.subr.mxu1 %v13324_v3 }
 0x14d   : > { %8849 = vmatpush3.msra.mxu0 %v9649_v16  ;;  %8892 = vmatpush3.msra.mxu1 %v9632_v12 }
 0x14e   : > { %8850 = vmatprep.subr.mxu0 %v13324_v3  ;;  %8893 = vmatprep.subr.mxu1 %v13324_v3 }
 0x14f   : > { %8851 = vmatpush3.msra.mxu0 %v9654_v18  ;;  %8894 = vmatpush3.msra.mxu1 %v9651_v17  ;;  %v2728_v18 = vld [vmem:[%s13277_s8 + $0x70] sm:$0xff] }
 0x150   : > { %8852 = vmatprep.subr.mxu0 %v13324_v3  ;;  %8895 = vmatprep.subr.mxu1 %v13324_v3 }
 0x151   : > { %8853 = vmatpush3.msra.mxu0 %v9667_v20  ;;  %8896 = vmatpush3.msra.mxu1 %v9682_v25 }
 0x152   : > { %8854 = vmatprep.subr.mxu0 %v13324_v3  ;;  %8897 = vmatprep.subr.mxu1 %v13324_v3 }
 0x153   : > { %8855 = vmatpush3.msra.mxu0 %v9670_v21  ;;  %8898 = vmatpush3.msra.mxu1 %v9691_v28  ;;  %v2729_v21 = vld [vmem:[%s13277_s8 + $0x78] sm:$0xff] }
 0x154   : > { %8856 = vmatprep.subr.mxu0 %v13324_v3  ;;  %8899 = vmatprep.subr.mxu1 %v13324_v3 }
 0x155   : > { %8857 = vmatpush3.msra.mxu0 %v9697_v30  ;;  %8900 = vmatpush3.msra.mxu1 %v9711_v35 }
 0x156   : > { %8858 = vmatprep.subr.mxu0 %v13324_v3  ;;  %8901 = vmatprep.subr.mxu1 %v13324_v3 }
 0x157   : > { %8859 = vmatpush3.msra.mxu0 %v9708_v34  ;;  %8902 = vmatpush3.msra.mxu1 %v9746_v45  ;;  %v2730_v34 = vld [vmem:[%s13277_s8 + $0x80] sm:$0xff] }
 0x158   : > { %8860 = vmatprep.subr.mxu0 %v13324_v3  ;;  %8903 = vmatprep.subr.mxu1 %v13324_v3 }
 0x159   : > { %8861 = vmatpush3.msra.mxu0 %v9740_v43  ;;  %8904 = vmatpush3.msra.mxu1 %v9756_v48 }
 0x15a   : > { %8862 = vmatprep.subr.mxu0 %v13324_v3  ;;  %8905 = vmatprep.subr.mxu1 %v13324_v3 }
 0x15b   : > { %8863 = vmatpush3.msra.mxu0 %v9752_v47  ;;  %8906 = vmatpush3.msra.mxu1 %v9790_v59 }
 0x15c   : > { %8864 = vmatprep.subr.mxu0 %v13324_v3  ;;  %8907 = vmatprep.subr.mxu1 %v13324_v3 }
 0x15d   : > { %8865 = vmatpush3.msra.mxu0 %v9777_v55  ;;  %8908 = vmatpush3.msra.mxu1 %v9803_v63 }
 0x15e   : > { %8866 = vmatprep.subr.mxu0 %v13324_v3  ;;  %8909 = vmatprep.subr.mxu1 %v13324_v3 }
 0x15f   : > { %8867 = vmatpush3.msra.mxu0 %v9796_v61  ;;  %8910 = vmatpush3.msra.mxu1 %v9824_v13 }
 0x160   : > { %8868 = vmatprep.subr.mxu0 %v13324_v3  ;;  %8911 = vmatprep.subr.mxu1 %v13324_v3 }
 0x161   : > { %8869 = vmatpush3.msra.mxu0 %v9818_v8  ;;  %8912 = vmatpush3.msra.mxu1 %v9842_v32 }
 0x162   : > { %8870 = vmatprep.subr.mxu0 %v13324_v3  ;;  %8914 = vmatmul.mubr.f32.vlgmr.msra.gmra.mxu1 %v1154_v37 }
 0x163   : > { %8951 = vmatprep.subr.mxu1 %v13324_v3  ;;  %8871 = vmatpush3.msra.mxu0 %v9838_v31 }
 0x164   : > { %8952 = vmatpush3.msra.mxu1 %v9612_v4  ;;  %8872 = vmatprep.subr.mxu0 %v13324_v3 }
 0x165   : > { %8953 = vmatprep.subr.mxu1 %v13324_v3  ;;  %8873 = vmatpush3.msra.mxu0 %v9854_v41 }
 0x166   : > { %8954 = vmatpush3.msra.mxu1 %v9614_v5  ;;  %8874 = vmatprep.subr.mxu0 %v13324_v3 }
 0x167   : > { %8955 = vmatprep.subr.mxu1 %v13324_v3  ;;  %8875 = vmatpush3.msra.mxu0 %v9869_v54  ;;  %v2735_v54 = vld [vmem:[%s13277_s8 + $0xa8] sm:$0xff] }
 0x168   : > { %8956 = vmatpush3.msra.mxu1 %v9616_v6  ;;  %8876 = vmatprep.subr.mxu0 %v13324_v3 }
 0x169   : > { %8957 = vmatprep.subr.mxu1 %v13324_v3  ;;  %8877 = vmatpush3.msra.mxu0 %v9883_v50 }
 0x16a   : > { %8878 = vmatprep.mubr.msk.f32.mxu0 %vm9521_vm0, %v13324_v3  ;;  %8958 = vmatpush3.msra.mxu1 %v9628_v10 }
 0x16b   : > { %8879 = vmatmul.mubr.f32.vlgmr.msra.gmra.mxu0 %v10158_v51  ;;  %8916 = vmatprep.subr.mxu0 %v13324_v3 }
 0x16c   : > { %8959 = vmatprep.subr.mxu1 %v13324_v3  ;;  %8917 = vmatpush3.msra.mxu0 %v9674_v22 }
 0x16d   : > { %8960 = vmatpush3.msra.mxu1 %v9630_v11  ;;  %8918 = vmatprep.subr.mxu0 %v13324_v3 }
 0x16e   : > { %8961 = vmatprep.subr.mxu1 %v13324_v3  ;;  %8919 = vmatpush3.msra.mxu0 %v9677_v23  ;;  %v2736_v23 = vld [vmem:[%s13277_s8 + $0xb0] sm:$0xff] }
 0x16f   : > { %8962 = vmatpush3.msra.mxu1 %v9632_v12  ;;  %8920 = vmatprep.subr.mxu0 %v13324_v3 }
 0x170   : > { %8963 = vmatprep.subr.mxu1 %v13324_v3  ;;  %8921 = vmatpush3.msra.mxu0 %v9680_v24 }
 0x171   : > { %8964 = vmatpush3.msra.mxu1 %v9651_v17  ;;  %8922 = vmatprep.subr.mxu0 %v13324_v3 }
 0x172   : > { %8965 = vmatprep.subr.mxu1 %v13324_v3  ;;  %8923 = vmatpush3.msra.mxu0 %v9689_v27 }
 0x173   : > { %8966 = vmatpush3.msra.mxu1 %v9682_v25  ;;  %8924 = vmatprep.subr.mxu0 %v13324_v3 }
 0x174   : > { %8967 = vmatprep.subr.mxu1 %v13324_v3  ;;  %8925 = vmatpush3.msra.mxu0 %v9694_v29 }
 0x175   : > { %8968 = vmatpush3.msra.mxu1 %v9691_v28  ;;  %8926 = vmatprep.subr.mxu0 %v13324_v3 }
 0x176   : > { %8969 = vmatprep.subr.mxu1 %v13324_v3  ;;  %8927 = vmatpush3.msra.mxu0 %v9724_v40 }
 0x177   : > { %8970 = vmatpush3.msra.mxu1 %v9711_v35  ;;  %8928 = vmatprep.subr.mxu0 %v13324_v3 }
 0x178   : > { %8971 = vmatprep.subr.mxu1 %v13324_v3  ;;  %8929 = vmatpush3.msra.mxu0 %v9749_v46 }
 0x179   : > { %8972 = vmatpush3.msra.mxu1 %v9746_v45  ;;  %8930 = vmatprep.subr.mxu0 %v13324_v3 }
 0x17a   : > { %8973 = vmatprep.subr.mxu1 %v13324_v3  ;;  %8931 = vmatpush3.msra.mxu0 %v9771_v53 }
 0x17b   : > { %8974 = vmatpush3.msra.mxu1 %v9756_v48  ;;  %8932 = vmatprep.subr.mxu0 %v13324_v3 }
 0x17c   : > { %8975 = vmatprep.subr.mxu1 %v13324_v3  ;;  %8933 = vmatpush3.msra.mxu0 %v9784_v57 }
 0x17d   : > { %8976 = vmatpush3.msra.mxu1 %v9790_v59  ;;  %8934 = vmatprep.subr.mxu0 %v13324_v3  ;;  %v10561_v59 = vand.u32 4294901760, %v2728_v18 }
 0x17e   : > { %8977 = vmatprep.subr.mxu1 %v13324_v3  ;;  %8935 = vmatpush3.msra.mxu0 %v9812_v2 }
 0x17f   : > { %8978 = vmatpush3.msra.mxu1 %v9803_v63  ;;  %8936 = vmatprep.subr.mxu0 %v13324_v3 }
 0x180   : > { %8979 = vmatprep.subr.mxu1 %v13324_v3  ;;  %8937 = vmatpush3.msra.mxu0 %v9831_v19 }
 0x181   : > { %8980 = vmatpush3.msra.mxu1 %v9824_v13  ;;  %8938 = vmatprep.subr.mxu0 %v13324_v3 }
 0x182   : > { %8981 = vmatprep.subr.mxu1 %v13324_v3  ;;  %8939 = vmatpush3.msra.mxu0 %v9851_v39 }
 0x183   : > { %8982 = vmatpush3.msra.mxu1 %v9842_v32  ;;  %8983 = vmatprep.mubr.msk.f32.mxu1 %vm9521_vm0, %v13324_v3 }
 0x184   : > { %8940 = vmatprep.subr.mxu0 %v13324_v3  ;;  %8984 = vmatmul.mubr.f32.vlgmr.msra.gmra.mxu1 %v10155_v42 }
 0x185   : > { %8941 = vmatpush3.msra.mxu0 %v13784_v56  ;;  %8948 = vmatprep.mubr.msk.f32.mxu0 %vm9521_vm0, %v13324_v3 }
 0x186   : > { %8942 = vmatprep.subr.mxu0 %v13324_v3  ;;  %8993 = vmatprep.mubr.f32.mxu1 %v10304_v14 }
 0x187   : > { %8943 = vmatpush3.msra.mxu0 %v13785_v52 }
 0x188   : > { %8944 = vmatprep.subr.mxu0 %v13324_v3 }
 0x189   : > { %8945 = vmatpush3.msra.mxu0 %v13786_v1 }
 0x18a   : > { %8946 = vmatprep.subr.mxu0 %v13324_v3 }
 0x18b   : > { %8947 = vmatpush3.msra.mxu0 %v13787_v60 }
 0x18c   : > { %8949 = vmatmul.mubr.f32.vlgmr.msra.gmra.mxu0 %v10155_v42  ;;  %v1726_v42 = vld [vmem:[%s13274_s5] sm:$0xff] }
 0x18d   : > { %8988 = vmatprep.mubr.f32.mxu0 %v1815_v26  ;;  %1730 = vperm.xlu0 %9489, %v1726_v42   ;;  %v1725_v42 = vld [vmem:[%s13273_s4 + $0x8] sm:$0xff] }
 0x202   : > { %v1309_v51 = vpop.f32.mrf.mxu1 }
 0x204   : > { %v8845_v37 = vpop.f32.mrf.mxu1 }
 0x205   : > { %v1714_v37 = vlaneseq }
 0x20a   : > { %v1158_v38 = vpop.f32.mrf.mxu0 }
 0x20b   : > { %v1159_v62 = vadd.f32 1e-05, %v1158_v38 }
 0x20c   : > { %v8810_v44 = vpop.f32.mrf.mxu0 }
 0x20d   : > { %v1310_v60 = vadd.f32 %v1309_v51, %v1159_v62  ;;  %v1743_v44 = vsel %vm1738_vm1, %v1725_v42, 0 }
 0x20e   : > { %v1821_v38 = vand.u32 4294901760, %v1743_v44 }
 0x222   : > { %v1502_v7 = vpop.f32.mrf.mxu1 }
 0x224   : > { %v8915_v36 = vpop.f32.mrf.mxu1 }
 0x225   : > { %v10324_v36 = vshrl.u32 %v1714_v37, 7 }
 0x227   : > { %13788 = vst [vmem:[#allocation33_spill] sm:$0xff] %v10324_v36  ;;  %v10327_v62 = vsub.s32 0, %v10324_v36 }
 0x229   : > { %13789 = vst [vmem:[#allocation67_spill] sm:$0xff] %v10327_v62 }
 0x22b   : > { %v1413_v0 = vpop.f32.mrf.mxu0 }
 0x22c   : > { %v1414_v52 = vadd.f32 %v1413_v0, %v1310_v60 }
 0x22d   : > { %v8880_v26 = vpop.f32.mrf.mxu0 }
 0x22e   : > { %v1503_v49 = vadd.f32 %v1502_v7, %v1414_v52 }
 0x244   : > { %v1708_v3 = vpop.f32.mrf.mxu1 }
 0x246   : > { %v8985_v1 = vpop.f32.mrf.mxu1 }
 0x247   : > { %v1822_v1 = vsub.f32 %v1743_v44, %v1821_v38 }
 0x24c   : > { %v1621_v9 = vpop.f32.mrf.mxu0 }
 0x24d   : > { %v1622_v56 = vadd.f32 %v1621_v9, %v1503_v49 }
 0x24e   : > { %v8950_v39 = vpop.f32.mrf.mxu0 }
 0x24f   : > { %v1709_v19 = vadd.f32 %v1708_v3, %v1622_v56  ;;  %v426_v39 = vld [vmem:[%s13271_s2] sm:$0x3f]  ;;  %v10333_v3 = vsub.s32 1, %v10324_v36 }
 0x250   : > { %v1717_v56 = vrot.slane %v426_v39, %v10327_v62 }
 0x251   : > { %9491 = vrsqrt.f32 %v1709_v19  ;;  %13790 = vst [vmem:[#allocation68_spill] sm:$0xff] %v10333_v3  ;;  %v1823_v19 = vand.u32 4294901760, %v1822_v1  ;;  %v1722_v51 = vrot.slane %v426_v39, %v10333_v3  ;;  %v13791_v39 = vmov 0.0  }
 0x253   : > { %v1824_v0 = vsub.f32 %v1822_v1, %v1823_v19 }
 0x255   : > { %v1825_v9 = vand.u32 4294901760, %v1824_v0 }
 0x25e   : > { %v9492_v52 = vpop.eup %9491 }
 0x25f   : > { %v1713_v60 = vmul.f32 %v9492_v52, %v10151_v58 }
 0x261   : > { %v1718_v7 = vmul.f32 %v1717_v56, %v1713_v60  ;;  %v13792_v56 = vand.u32 4294901760, %v10307_v33 }
 0x263   : > { %v1723_v26 = vadd.f32 %v1722_v51, %v1718_v7 }
 0x265   : > { %v1776_v49 = vand.u32 4294901760, %v1723_v26 }
 0x267   : > { %8986 = vmatprep.subr.mxu0 %v1776_v49  ;;  %v1863_v42 = vsub.f32 %v1723_v26, %v1776_v49 }
 0x268   : > { %8987 = vmatpush3.msra.mxu0 %v1776_v49 }
 0x269   : > { %8989 = vmatmul.mubr.f32.vlgmr.msra.gmra.mxu0 %v1825_v9  ;;  %8996 = vmatprep.subr.mxu0 %v1863_v42  ;;  %v1864_v37 = vand.u32 4294901760, %v1863_v42 }
 0x26a   : > { %8997 = vmatpush3.msra.mxu0 %v1863_v42  ;;  %8998 = vmatprep.mubr.f32.mxu0 %v10307_v33  ;;  %v2245_v33 = vld [vmem:[%s13276_s7] sm:$0xff] }
 0x26b   : > { %9006 = vmatprep.subr.mxu0 %v1864_v37  ;;  %v1865_v44 = vsub.f32 %v1863_v42, %v1864_v37  ;;  %2248 = vperm.xlu1 %9490, %v2245_v33  }
 0x26d   : > { %8999 = vmatmul.mubr.f32.vlgmr.msra.gmra.mxu0 %v1822_v1  ;;  %v1866_v58 = vand.u32 4294901760, %v1865_v44  ;;  %v1736_v1 = vpop.permute.xlu0 %1735 }
 0x26e   : > { %9007 = vmatpush3.msra.mxu0 %v1864_v37  ;;  %9008 = vmatprep.mubr.f32.mxu0 %v10304_v14 }
 0x26f   : > { %8991 = vmatprep.subr.mxu1 %v1866_v58  ;;  %9016 = vmatprep.subr.mxu0 %v13791_v39 }
 0x270   : > { %8992 = vmatpush3.msra.mxu1 %v1866_v58 }
 0x271   : > { %8994 = vmatmul.mubr.f32.vlgmr.msra.gmra.mxu1 %v1821_v38  ;;  %9001 = vmatprep.subr.mxu1 %v1776_v49  ;;  %v1731_v7 = vpop.permute.xlu0 %1730 }
 0x272   : > { %9002 = vmatpush3.msra.mxu1 %v1776_v49  ;;  %9003 = vmatprep.mubr.f32.mxu1 %v13792_v56 }
 0x273   : > { %9011 = vmatprep.subr.mxu1 %v1776_v49  ;;  %9009 = vmatmul.mubr.f32.vlgmr.msra.gmra.mxu0 %v1821_v38 }
 0x274   : > { %9020 = vmatprep.mubr.msk.f32.mxu0 %vm9521_vm0, %v13791_v39 }
 0x275   : > { %9004 = vmatmul.mubr.f32.vlgmr.msra.gmra.mxu1 %v1823_v19 }
 0x276   : > { %9012 = vmatpush3.msra.mxu1 %v1776_v49  ;;  %9013 = vmatprep.mubr.f32.mxu1 %v10304_v14 }
 0x277   : > { %9023 = vmatprep.subr.mxu1 %v13791_v39 }
 0x279   : > { %9014 = vmatmul.mubr.f32.vlgmr.msra.gmra.mxu1 %v1821_v38 }
 0x27a   : > { %9027 = vmatprep.mubr.msk.f32.mxu1 %vm9521_vm0, %v13791_v39 }
 0x329   : > { %v8990_v52 = vpop.f32.mrf.mxu0 }
 0x32a   : > { %v1828_v19 = vadd.f32 %v8990_v52, %v1736_v1  ;;  %v2244_v1 = vld [vmem:[%s13275_s6] sm:$0xff] }
 0x32b   : > { %v1817_v60 = vpop.f32.mrf.mxu0 }
 0x32c   : > { %v1818_v14 = vadd.f32 %v1817_v60, %v1731_v7  ;;  %v2253_v7 = vsel %vm2251_vm2, %v2244_v1, 0  ;;  %v2742_v1 = vld [vmem:[%s13277_s8 + $0xe0] sm:$0xff] }
 0x32d   : > { %v9000_v51 = vpop.f32.mrf.mxu0 }
 0x32f   : > { %v1983_v26 = vpop.f32.mrf.mxu0 }
 0x331   : > { %v8995_v0 = vpop.f32.mrf.mxu1 }
 0x332   : > { %v1910_v49 = vadd.f32 %v8995_v0, %v1828_v19  ;;  %v10355_v19 = vand.u32 4294901760, %v2253_v7 }
 0x333   : > { %v1903_v9 = vpop.f32.mrf.mxu1  ;;  %v9010_v44 = vpop.f32.mrf.mxu0 }
 0x334   : > { %v1904_v38 = vadd.f32 %v1903_v9, %v1818_v14  ;;  %v1991_v42 = vadd.f32 %v9000_v51, %v1910_v49 }
 0x335   : > { %v9005_v37 = vpop.f32.mrf.mxu1  ;;  %v2146_v57 = vpop.f32.mrf.mxu0 }
 0x336   : > { %v1984_v58 = vadd.f32 %v1983_v26, %v1904_v38  ;;  %v2073_v56 = vadd.f32 %v9005_v37, %v1991_v42  ;;  %v2743_v37 = vld [vmem:[%s13277_s8 + $0xe8] sm:$0xff] }
 0x337   : > { %v2064_v3 = vpop.f32.mrf.mxu1 }
 0x338   : > { %v2065_v2 = vadd.f32 %v2064_v3, %v1984_v58  ;;  %v2153_v33 = vadd.f32 %v9010_v44, %v2073_v56  ;;  %v10358_v3 = vsub.f32 %v2253_v7, %v10355_v19  ;;  %v2741_v7 = vld [vmem:[%s13277_s8 + $0xd8] sm:$0xff] }
 0x339   : > { %v9015_v53 = vpop.f32.mrf.mxu1 }
 0x33a   : > { %v2147_v46 = vadd.f32 %v2146_v57, %v2065_v2  ;;  %v2231_v40 = vadd.f32 %v9015_v53, %v2153_v33  ;;  %v13344_v57 = vand.u32 4294901760, %v10358_v3  ;;  %v2745_v2 = vld [vmem:[%s13277_s8 + $0xf8] sm:$0xff]  ;;  %v10379_v33 = vand.u32 4294901760, %v2743_v37 }
 0x33b   : > { %v2224_v29 = vpop.f32.mrf.mxu1  ;;  %v10370_v42 = vand.u32 4294901760, %v2745_v2  ;;  %v13799_v32 = vand.u32 4294901760, %v10358_v3 }
 0x33c   : > { %v2237_v52 = vmul.f32 0.70710677, %v2231_v40  ;;  %v2225_v60 = vadd.f32 %v2224_v29, %v2147_v46  ;;  %v2235_v0 = vmul.f32 0.5, %v2231_v40  ;;  %v2744_v29 = vld [vmem:[%s13277_s8 + $0xf0] sm:$0xff]  ;;  %v2325_v14 = vsub.f32 %v10358_v3, %v13344_v57 }
 0x33d   : > { %13793 = vst [vmem:[#allocation69_spill] sm:$0xff] %v10370_v42  ;;  %v10375_v40 = vand.u32 4294901760, %v2744_v29 }
 0x33e   : > { %9493 = verf.f32 %v2237_v52  ;;  %v2236_v51 = vmul.f32 0.70710677, %v2225_v60  ;;  %v2234_v9 = vmul.f32 0.5, %v2225_v60  ;;  %v2326_v56 = vand.u32 4294901760, %v2325_v14  ;;  %v2739_v14 = vld [vmem:[%s13277_s8 + $0xc8] sm:$0xff] }
 0x33f   : > { %v10427_v24 = vand.u32 4294901760, %v2739_v14 }
 0x340   : > { %9495 = verf.f32 %v2236_v51  ;;  %v10389_v51 = vsub.f32 %v2745_v2, %v10370_v42  ;;  %v10403_v2 = vand.u32 4294901760, %v2742_v1 }
 0x342   : > { %13794 = vst [vmem:[#allocation70_spill] sm:$0xff] %v10389_v51  ;;  %v10433_v57 = vsub.f32 %v2742_v1, %v10403_v2  ;;  %v2734_v1 = vld [vmem:[%s13277_s8 + $0xa0] sm:$0xff]  ;;  %v13795_v31 = vand.u32 4294901760, %v10389_v51 }
 0x343   : > { %v10483_v43 = vand.u32 4294901760, %v2734_v1 }
 0x344   : > { %v10454_v8 = vsub.f32 %v10389_v51, %v13795_v31  ;;  %v10472_v31 = vsub.f32 %v2739_v14, %v10427_v24  ;;  %v2731_v14 = vld [vmem:[%s13277_s8 + $0x88] sm:$0xff]  ;;  %v13798_v16 = vand.u32 4294901760, %v10433_v57 }
 0x346   : > { %v2877_v30 = vand.u32 4294901760, %v10454_v8  ;;  %v2894_v15 = vsub.f32 %v10433_v57, %v13798_v16  ;;  %v10535_v8 = vsub.f32 %v2734_v1, %v10483_v43  ;;  %v13802_v48 = vand.u32 4294901760, %v10472_v31 }
 0x34b   : > { %v9494_v53 = vpop.eup %9493 }
 0x34c   : > { %v2241_v26 = vadd.f32 1.0, %v9494_v53  ;;  %v10396_v53 = vsub.f32 %v2744_v29, %v10375_v40  ;;  %v10410_v29 = vsub.f32 %v2743_v37, %v10379_v33  ;;  %v2737_v37 = vld [vmem:[%s13277_s8 + $0xb8] sm:$0xff] }
 0x34d   : > { %v9496_v46 = vpop.eup %9495 }
 0x34e   : > { %v2243_v49 = vmul.f32 %v2241_v26, %v2235_v0  ;;  %v2240_v38 = vadd.f32 1.0, %v9496_v46  ;;  %v2740_v0 = vld [vmem:[%s13277_s8 + $0xd0] sm:$0xff] }
 0x34f   : > { %v10420_v27 = vand.u32 4294901760, %v2740_v0 }
 0x350   : > { %v10377_v44 = vand.u32 4294901760, %v2243_v49  ;;  %v2242_v58 = vmul.f32 %v2240_v38, %v2234_v9  ;;  %v2738_v9 = vld [vmem:[%s13277_s8 + $0xc0] sm:$0xff] }
 0x351   : > { %v10435_v50 = vand.u32 4294901760, %v2738_v9  ;;  %v10457_v61 = vsub.f32 %v2740_v0, %v10420_v27  ;;  %v10474_v0 = vand.u32 4294901760, %v2735_v54 }
 0x352   : > { %v2362_v52 = vsub.f32 %v2243_v49, %v10377_v44  ;;  %v10385_v60 = vand.u32 4294901760, %v2242_v58  ;;  %9017 = vmatpush3.msra.mxu0 %v10377_v44  ;;  %v10412_v49 = vand.u32 4294901760, %v2741_v7 }
 0x353   : > { %9018 = vmatprep.subr.mxu0 %v13791_v39  ;;  %v10481_v47 = vsub.f32 %v2738_v9, %v10435_v50 }
 0x354   : > { %v2369_v26 = vsub.f32 %v2242_v58, %v10385_v60  ;;  %9019 = vmatpush3.msra.mxu0 %v10385_v60  ;;  %v2363_v46 = vand.u32 4294901760, %v2362_v52  ;;  %v10444_v41 = vsub.f32 %v2741_v7, %v10412_v49  ;;  %v2733_v7 = vld [vmem:[%s13277_s8 + $0x98] sm:$0xff] }
 0x355   : > { %9030 = vmatprep.subr.mxu0 %v13791_v39  ;;  %9021 = vmatmul.mubr.f32.vlgmr.msra.gmra.mxu0 %v2326_v56  ;;  %v10459_v56 = vand.u32 4294901760, %v2736_v23  ;;  %v10497_v9 = vand.u32 4294901760, %v2733_v7  ;;  %v13803_v1 = vand.u32 4294901760, %v10481_v47 }
 0x356   : > { %9031 = vmatpush3.msra.mxu0 %v2362_v52  ;;  %9034 = vmatprep.mubr.msk.f32.mxu0 %vm9521_vm0, %v13791_v39  ;;  %v2364_v38 = vsub.f32 %v2362_v52, %v2363_v46  ;;  %v2370_v58 = vand.u32 4294901760, %v2369_v26  ;;  %v13800_v13 = vand.u32 4294901760, %v10444_v41 }
 0x357   : > { %9032 = vmatprep.subr.mxu0 %v13791_v39  ;;  %v10547_v16 = vsub.f32 %v2733_v7, %v10497_v9  ;;  %v2918_v35 = vsub.f32 %v10481_v47, %v13803_v1 }
 0x358   : > { %9033 = vmatpush3.msra.mxu0 %v2369_v26  ;;  %v2365_v52 = vand.u32 4294901760, %v2364_v38  ;;  %v2371_v22 = vsub.f32 %v2369_v26, %v2370_v58  ;;  %v10446_v38 = vand.u32 4294901760, %v2737_v37  ;;  %v2900_v63 = vsub.f32 %v10444_v41, %v13800_v13 }
 0x359   : > { %9044 = vmatprep.subr.mxu0 %v13791_v39  ;;  %9035 = vmatmul.mubr.f32.vlgmr.msra.gmra.mxu0 %v10358_v3 }
 0x35a   : > { %9024 = vmatpush3.msra.mxu1 %v2365_v52  ;;  %9045 = vmatpush3.msra.mxu0 %v2363_v46  ;;  %v2372_v26 = vand.u32 4294901760, %v2371_v22  ;;  %v13796_v22 = vand.u32 4294901760, %v10396_v53  ;;  %v2732_v52 = vld [vmem:[%s13277_s8 + $0x90] sm:$0xff]  ;;  %v10495_v55 = vsub.f32 %v2737_v37, %v10446_v38  ;;  %v2901_v45 = vand.u32 4294901760, %v2900_v63 }
 0x35b   : > { %9025 = vmatprep.subr.mxu1 %v13791_v39  ;;  %9046 = vmatprep.subr.mxu0 %v13791_v39  ;;  %v10510_v37 = vand.u32 4294901760, %v2732_v52  ;;  %v10595_v63 = vsub.f32 %v2728_v18, %v10561_v59 }
 0x35c   : > { %v10469_v46 = vsub.f32 %v10396_v53, %v13796_v22  ;;  %9026 = vmatpush3.msra.mxu1 %v2372_v26  ;;  %9047 = vmatpush3.msra.mxu0 %v2370_v58  ;;  %v13797_v22 = vand.u32 4294901760, %v10410_v29  ;;  %v10508_v58 = vsub.f32 %v2736_v23, %v10459_v56  ;;  %v10523_v23 = vand.u32 4294901760, %v2731_v14 }
 0x35d   : > { %9028 = vmatmul.mubr.f32.vlgmr.msra.gmra.mxu1 %v10355_v19  ;;  %9037 = vmatprep.subr.mxu1 %v13791_v39  ;;  %v10559_v13 = vsub.f32 %v2732_v52, %v10510_v37  ;;  %v2895_v52 = vand.u32 4294901760, %v2894_v15  ;;  %13806 = vst [vmem:[#allocation71_spill] sm:$0xff] %v10595_v63 }
 0x35e   : > { %v2888_v26 = vsub.f32 %v10410_v29, %v13797_v22  ;;  %9038 = vmatpush3.msra.mxu1 %v10377_v44  ;;  %9041 = vmatprep.mubr.msk.f32.mxu1 %vm9521_vm0, %v13791_v39  ;;  %v2883_v20 = vand.u32 4294901760, %v10469_v46  ;;  %v10521_v22 = vsub.f32 %v2735_v54, %v10474_v0  ;;  %v10537_v54 = vand.u32 4294901760, %v2730_v34 }
 0x35f   : > { %9039 = vmatprep.subr.mxu1 %v13791_v39  ;;  %9048 = vmatprep.mubr.msk.f32.mxu0 %vm9521_vm0, %v13791_v39  ;;  %v10549_v46 = vand.u32 4294901760, %v2729_v21 }
 0x360   : > { %9040 = vmatpush3.msra.mxu1 %v10385_v60  ;;  %9049 = vmatmul.mubr.f32.vlgmr.msra.gmra.mxu0 %v10355_v19  ;;  %v2889_v7 = vand.u32 4294901760, %v2888_v26  ;;  %v13805_v26 = vand.u32 4294901760, %v10508_v58 }
 0x361   : > { %9042 = vmatmul.mubr.f32.vlgmr.msra.gmra.mxu1 %v13799_v32  ;;  %9051 = vmatprep.subr.mxu1 %v13791_v39  ;;  %v13801_v32 = vand.u32 4294901760, %v10457_v61  ;;  %v10587_v28 = vsub.f32 %v2729_v21, %v10549_v46 }
 0x362   : > { %9052 = vmatpush3.msra.mxu1 %v10377_v44  ;;  %9055 = vmatprep.mubr.msk.f32.mxu1 %vm9521_vm0, %v13791_v39  ;;  %v2912_v44 = vsub.f32 %v10472_v31, %v13802_v48  ;;  %v10579_v48 = vsub.f32 %v2730_v34, %v10537_v54  ;;  %v2930_v34 = vsub.f32 %v10508_v58, %v13805_v26  ;;  %v13808_v26 = vand.u32 4294901760, %v10535_v8 }
 0x363   : > { %v2906_v3 = vsub.f32 %v10457_v61, %v13801_v32  ;;  %9053 = vmatprep.subr.mxu1 %v13791_v39  ;;  %2766 = vmatprep.subr.mxu0 %v10370_v42  ;;  %v10570_v32 = vsub.f32 %v2731_v14, %v10523_v23  ;;  %v13804_v14 = vand.u32 4294901760, %v10495_v55 }
 0x364   : > { %9054 = vmatpush3.msra.mxu1 %v10385_v60  ;;  %2768 = vmatpush1.msra.mxu0 %v10375_v40  ;;  %v2942_v15 = vsub.f32 %v10535_v8, %v13808_v26  ;;  %v13403_v18 = vand.u32 4294901760, %v10579_v48  ;;  %v13402_v26 = vand.u32 4294901760, %v10595_v63 }
 0x365   : > { %9056 = vmatmul.mubr.f32.vlgmr.msra.gmra.mxu1 %v10355_v19  ;;  %2878 = vmatprep.subr.mxu1 %v2877_v30  ;;  %v2924_v60 = vsub.f32 %v10495_v55, %v13804_v14  ;;  %v2907_v1 = vand.u32 4294901760, %v2906_v3  ;;  %v13401_v30 = vand.u32 4294901760, %v10559_v13  ;;  %v2913_v19 = vand.u32 4294901760, %v2912_v44 }
 0x366   : > { %2884 = vmatpush1.msra.mxu1 %v2883_v20  ;;  %2770 = vmatprep.subr.mxu0 %v10379_v33  ;;  %v13807_v14 = vand.u32 4294901760, %v10521_v22  ;;  %v2919_v3 = vand.u32 4294901760, %v2918_v35  ;;  %v13809_v44 = vand.u32 4294901760, %v10547_v16  ;;  %v2931_v35 = vand.u32 4294901760, %v2930_v34 }
 0x367   : > { %2890 = vmatprep.subr.mxu1 %v2889_v7  ;;  %2772 = vmatpush1.msra.mxu0 %v10403_v2  ;;  %v2925_v7 = vand.u32 4294901760, %v2924_v60  ;;  %v13810_v60 = vand.u32 4294901760, %v10570_v32  ;;  %v2943_v20 = vand.u32 4294901760, %v2942_v15  ;;  %v2978_v15 = vsub.f32 %v10595_v63, %v13402_v26 }
 0x368   : > { %v2936_v21 = vsub.f32 %v10521_v22, %v13807_v14  ;;  %2896 = vmatpush1.msra.mxu1 %v2895_v52  ;;  %2774 = vmatprep.subr.mxu0 %v10412_v49  ;;  %v2948_v14 = vsub.f32 %v10547_v16, %v13809_v44  ;;  %v2954_v52 = vsub.f32 %v10559_v13, %v13401_v30  ;;  %v13811_v30 = vand.u32 4294901760, %v10587_v28 }
 0x369   : > { %2902 = vmatprep.subr.mxu1 %v2901_v45  ;;  %2776 = vmatpush1.msra.mxu0 %v10420_v27  ;;  %v2960_v44 = vsub.f32 %v10570_v32, %v13810_v60  ;;  %v2725_v60 = vld [vmem:[%s13277_s8 + $0x58] sm:$0xff] }
 0x36a   : > { %2908 = vmatpush1.msra.mxu1 %v2907_v1  ;;  %2778 = vmatprep.subr.mxu0 %v10427_v24  ;;  %v2937_v45 = vand.u32 4294901760, %v2936_v21  ;;  %v2966_v1 = vsub.f32 %v10579_v48, %v13403_v18  ;;  %v2949_v34 = vand.u32 4294901760, %v2948_v14  ;;  %v2955_v21 = vand.u32 4294901760, %v2954_v52  ;;  %v2726_v52 = vld [vmem:[%s13277_s8 + $0x60] sm:$0xff] }
 0x36b   : > { %2914 = vmatprep.subr.mxu1 %v2913_v19  ;;  %2780 = vmatpush1.msra.mxu0 %v10435_v50  ;;  %v2972_v19 = vsub.f32 %v10587_v28, %v13811_v30  ;;  %v2979_v14 = vand.u32 4294901760, %v2978_v15  ;;  %v2723_v15 = vld [vmem:[%s13277_s8 + $0x48] sm:$0xff] }
 0x36c   : > { %2920 = vmatpush1.msra.mxu1 %v2919_v3  ;;  %2782 = vmatprep.subr.mxu0 %v10446_v38  ;;  %v2961_v3 = vand.u32 4294901760, %v2960_v44 }
 0x36d   : > { %2926 = vmatprep.subr.mxu1 %v2925_v7  ;;  %2784 = vmatpush1.msra.mxu0 %v10459_v56  ;;  %v2967_v7 = vand.u32 4294901760, %v2966_v1  ;;  %v2973_v30 = vand.u32 4294901760, %v2972_v19  ;;  %v10658_v1 = vand.u32 4294901760, %v2725_v60 }
 0x36e   : > { %2932 = vmatpush1.msra.mxu1 %v2931_v35  ;;  %2786 = vmatprep.subr.mxu0 %v10474_v0 }
 0x36f   : > { %2938 = vmatprep.subr.mxu1 %v2937_v45  ;;  %2788 = vmatpush1.msra.mxu0 %v10483_v43  ;;  %v10650_v45 = vand.u32 4294901760, %v2726_v52 }
 0x370   : > { %2944 = vmatpush1.msra.mxu1 %v2943_v20  ;;  %2790 = vmatprep.subr.mxu0 %v10497_v9  ;;  %v2727_v20 = vld [vmem:[%s13277_s8 + $0x68] sm:$0xff] }
 0x371   : > { %2950 = vmatprep.subr.mxu1 %v2949_v34  ;;  %2792 = vmatpush1.msra.mxu0 %v10510_v37  ;;  %v10645_v35 = vand.u32 4294901760, %v2727_v20  ;;  %v2724_v34 = vld [vmem:[%s13277_s8 + $0x50] sm:$0xff]  ;;  %v10665_v19 = vsub.f32 %v2726_v52, %v10650_v45 }
 0x372   : > { %2956 = vmatpush1.msra.mxu1 %v2955_v21  ;;  %2794 = vmatprep.subr.mxu0 %v10523_v23  ;;  %v10667_v21 = vand.u32 4294901760, %v2724_v34 }
 0x373   : > { %2962 = vmatprep.subr.mxu1 %v2961_v3  ;;  %2796 = vmatpush1.msra.mxu0 %v10537_v54  ;;  %v10656_v44 = vsub.f32 %v2727_v20, %v10645_v35  ;;  %13813 = vst [vmem:[#allocation73_spill] sm:$0xff] %v10665_v19  ;;  %v13818_v12 = vand.u32 4294901760, %v10665_v19 }
 0x374   : > { %2968 = vmatpush1.msra.mxu1 %v2967_v7  ;;  %2798 = vmatprep.subr.mxu0 %v10549_v46  ;;  %v10675_v7 = vsub.f32 %v2725_v60, %v10658_v1  ;;  %v10685_v52 = vsub.f32 %v2724_v34, %v10667_v21  ;;  %v2721_v60 = vld [vmem:[%s13277_s8 + $0x38] sm:$0xff]  ;;  %v2720_v34 = vld [vmem:[%s13277_s8 + $0x30] sm:$0xff] }
 0x375   : > { %2974 = vmatprep.subr.mxu1 %v2973_v30  ;;  %2800 = vmatpush1.msra.mxu0 %v10561_v59  ;;  %13812 = vst [vmem:[#allocation72_spill] sm:$0xff] %v10656_v44  ;;  %v13414_v3 = vand.u32 4294901760, %v10656_v44  ;;  %v10677_v30 = vand.u32 4294901760, %v2723_v15  ;;  %v10700_v20 = vand.u32 4294901760, %v2721_v60  ;;  %v2990_v11 = vsub.f32 %v10665_v19, %v13818_v12 }
 0x376   : > { %2980 = vmatpush1.msra.mxu1 %v2979_v14  ;;  %3097 = vmatprep.mubr.f32.mxu1 %v13791_v39  ;;  %13814 = vst [vmem:[#allocation74_spill] sm:$0xff] %v10675_v7  ;;  %v2722_v14 = vld [vmem:[%s13277_s8 + $0x40] sm:$0xff]  ;;  %13815 = vst [vmem:[#allocation75_spill] sm:$0xff] %v10685_v52  ;;  %v10713_v25 = vand.u32 4294901760, %v2720_v34  ;;  %v13821_v5 = vand.u32 4294901760, %v10675_v7  ;;  %v13823_v36 = vand.u32 4294901760, %v10685_v52 }
 0x377   : > { %2861 = vmatprep.mubr.f32.mxu0 %v13791_v39  ;;  %2802 = vmatprep.subr.mxu0 %v10645_v35  ;;  %v10687_v26 = vand.u32 4294901760, %v2722_v14  ;;  %v2984_v18 = vsub.f32 %v10656_v44, %v13414_v3  ;;  %v10698_v17 = vsub.f32 %v2723_v15, %v10677_v30  ;;  %13817 = vst [vmem:[#allocation77_spill] sm:$0xff] %v10700_v20  ;;  %v2719_v15 = vld [vmem:[%s13277_s8 + $0x28] sm:$0xff]  ;;  %v2991_v62 = vand.u32 4294901760, %v2990_v11 }
 0x378   : > { %2804 = vmatpush1.msra.mxu0 %v10650_v45  ;;  %13820 = vst [vmem:[#allocation79_spill] sm:$0xff] %v10713_v25  ;;  %v2996_v4 = vsub.f32 %v10675_v7, %v13821_v5  ;;  %v10724_v10 = vsub.f32 %v2721_v60, %v10700_v20  ;;  %v10735_v5 = vsub.f32 %v2720_v34, %v10713_v25  ;;  %v2717_v60 = vld [vmem:[%s13277_s8 + $0x18] sm:$0xff]  ;;  %v2716_v34 = vld [vmem:[%s13277_s8 + $0x10] sm:$0xff] }
 0x379   : > { %2806 = vmatprep.subr.mxu0 %v10658_v1  ;;  %13816 = vst [vmem:[#allocation76_spill] sm:$0xff] %v10698_v17  ;;  %v10711_v3 = vsub.f32 %v2722_v14, %v10687_v26  ;;  %v2985_v6 = vand.u32 4294901760, %v2984_v18  ;;  %v2718_v14 = vld [vmem:[%s13277_s8 + $0x20] sm:$0xff]  ;;  %v3002_v18 = vsub.f32 %v10685_v52, %v13823_v36  ;;  %v13825_v7 = vand.u32 4294901760, %v10698_v17 }
 0x37a   : > { %2808 = vmatpush1.msra.mxu0 %v10667_v21  ;;  %13822 = vst [vmem:[#allocation80_spill] sm:$0xff] %v10724_v10  ;;  %13824 = vst [vmem:[#allocation81_spill] sm:$0xff] %v10735_v5  ;;  %v2997_v12 = vand.u32 4294901760, %v2996_v4  ;;  %v10745_v36 = vand.u32 4294901760, %v2719_v15 }
 0x37b   : > { %2810 = vmatprep.subr.mxu0 %v10677_v30  ;;  %13819 = vst [vmem:[#allocation78_spill] sm:$0xff] %v10711_v3  ;;  %2986 = vmatprep.subr.mxu1 %v2985_v6  ;;  %v3008_v11 = vsub.f32 %v10698_v17, %v13825_v7  ;;  %v3003_v19 = vand.u32 4294901760, %v3002_v18  ;;  %v13826_v52 = vand.u32 4294901760, %v10711_v3  ;;  %v10754_v6 = vand.u32 4294901760, %v2718_v14  ;;  %v2715_v7 = vld [vmem:[%s13277_s8 + $0x8] sm:$0xff] }
 0x37c   : > { %2812 = vmatpush1.msra.mxu0 %v10687_v26  ;;  %2992 = vmatpush1.msra.mxu1 %v2991_v62  ;;  %v13827_v17 = vand.u32 4294901760, %v10724_v10  ;;  %v10763_v62 = vsub.f32 %v2719_v15, %v10745_v36  ;;  %v10765_v18 = vand.u32 4294901760, %v2717_v60 }
 0x37d   : > { %2814 = vmatprep.subr.mxu0 %v10700_v20  ;;  %2998 = vmatprep.subr.mxu1 %v2997_v12  ;;  %v3009_v44 = vand.u32 4294901760, %v3008_v11  ;;  %v13829_v12 = vand.u32 4294901760, %v10735_v5 }
 0x37e   : > { %2816 = vmatpush1.msra.mxu0 %v10713_v25  ;;  %v3014_v25 = vsub.f32 %v10711_v3, %v13826_v52  ;;  %v3020_v63 = vsub.f32 %v10724_v10, %v13827_v17  ;;  %13828 = vst [vmem:[#allocation82_spill] sm:$0xff] %v10763_v62  ;;  %v2714_v52 = vld [vmem:[%s13277_s8] sm:$0xff]  ;;  %3004 = vmatpush1.msra.mxu1 %v3003_v19  ;;  %v10777_v17 = vand.u32 4294901760, %v2716_v34  ;;  %v13447_v10 = vand.u32 4294901760, %v10763_v62 }
 0x37f   : > { %2818 = vmatprep.subr.mxu0 %v10745_v36  ;;  %v3026_v11 = vsub.f32 %v10735_v5, %v13829_v12  ;;  %v10775_v3 = vsub.f32 %v2718_v14, %v10754_v6  ;;  %3010 = vmatprep.subr.mxu1 %v3009_v44  ;;  %v10782_v20 = vsub.f32 %v2717_v60, %v10765_v18  ;;  %v10784_v19 = vand.u32 4294901760, %v2715_v7 }
 0x380   : > { %v3015_v4 = vand.u32 4294901760, %v3014_v25  ;;  %2820 = vmatpush1.msra.mxu0 %v10754_v6  ;;  %v3021_v15 = vand.u32 4294901760, %v3020_v63  ;;  %v10789_v12 = vsub.f32 %v2716_v34, %v10777_v17  ;;  %v10791_v5 = vand.u32 4294901760, %v2714_v52 }
 0x381   : > { %13830 = vst [vmem:[#allocation83_spill] sm:$0xff] %v10775_v3  ;;  %13831 = vst [vmem:[#allocation84_spill] sm:$0xff] %v10782_v20  ;;  %2822 = vmatprep.subr.mxu0 %v10765_v18  ;;  %v3027_v25 = vand.u32 4294901760, %v3026_v11  ;;  %v13448_v14 = vand.u32 4294901760, %v10775_v3  ;;  %v3032_v63 = vsub.f32 %v10763_v62, %v13447_v10  ;;  %v13453_v44 = vand.u32 4294901760, %v10782_v20 }
 0x382   : > { %13832 = vst [vmem:[#allocation85_spill] sm:$0xff] %v10784_v19  ;;  %3016 = vmatpush1.msra.mxu1 %v3015_v4  ;;  %13833 = vst [vmem:[#allocation86_spill] sm:$0xff] %v10789_v12  ;;  %2824 = vmatpush1.msra.mxu0 %v10777_v17  ;;  %v10799_v60 = vsub.f32 %v2715_v7, %v10784_v19  ;;  %v13455_v4 = vand.u32 4294901760, %v10789_v12  ;;  %v10807_v11 = vsub.f32 %v2714_v52, %v10791_v5 }
 0x383   : > { %13834 = vst [vmem:[#allocation87_spill] sm:$0xff] %v10791_v5  ;;  %3022 = vmatprep.subr.mxu1 %v3021_v15  ;;  %2826 = vmatprep.subr.mxu0 %v10784_v19  ;;  %v3038_v34 = vsub.f32 %v10775_v3, %v13448_v14  ;;  %v3033_v15 = vand.u32 4294901760, %v3032_v63  ;;  %v3044_v7 = vsub.f32 %v10782_v20, %v13453_v44 }
 0x384   : > { %13835 = vst [vmem:[#allocation88_spill] sm:$0xff] %v10799_v60  ;;  %3028 = vmatpush1.msra.mxu1 %v3027_v25  ;;  %13836 = vst [vmem:[#allocation89_spill] sm:$0xff] %v10807_v11  ;;  %2828 = vmatpush1.msra.mxu0 %v10791_v5  ;;  %v13460_v10 = vand.u32 4294901760, %v10799_v60  ;;  %v3050_v14 = vsub.f32 %v10789_v12, %v13455_v4  ;;  %v13467_v3 = vand.u32 4294901760, %v10807_v11 }
 0x385   : > { %3107 = vmatprep.subr.mxu0 %v10389_v51  ;;  %v3039_v25 = vand.u32 4294901760, %v3038_v34  ;;  %3034 = vmatprep.subr.mxu1 %v3033_v15  ;;  %v3045_v52 = vand.u32 4294901760, %v3044_v7  ;;  %v2249_v7 = vpop.permute.xlu1 %2248 }
 0x386   : > { %v3056_v63 = vsub.f32 %v10799_v60, %v13460_v10  ;;  %v3051_v62 = vand.u32 4294901760, %v3050_v14  ;;  %v3062_v44 = vsub.f32 %v10807_v11, %v13467_v3 }
 0x387   : > { %3040 = vmatpush1.msra.mxu1 %v3039_v25 }
 0x388   : > { %3046 = vmatprep.subr.mxu1 %v3045_v52  ;;  %v3057_v34 = vand.u32 4294901760, %v3056_v63  ;;  %v3063_v51 = vand.u32 4294901760, %v3062_v44 }
 0x389   : > { %3052 = vmatpush1.msra.mxu1 %v3051_v62 }
 0x38a   : > { %3058 = vmatprep.subr.mxu1 %v3057_v34 }
 0x38b   : > { %3064 = vmatpush1.msra.mxu1 %v3063_v51 }
 0x38c   : > { %3243 = vmatprep.subr.mxu1 %v10370_v42 }
 0x415   : > { %v2328_v15 = vpop.f32.mrf.mxu0 }
 0x416   : > { %v2329_v20 = vadd.f32 %v2328_v15, %v2249_v7  ;;  %v13843_v15 = vld [vmem:[#allocation74_spill] sm:$0xff]  ;;  %v13844_v7 = vld [vmem:[#allocation75_spill] sm:$0xff] }
 0x417   : > { %v9022_v4 = vpop.f32.mrf.mxu0 }
 0x419   : > { %v2485_v12 = vpop.f32.mrf.mxu0 }
 0x41b   : > { %v9036_v10 = vpop.f32.mrf.mxu0 }
 0x41d   : > { %v2409_v25 = vpop.f32.mrf.mxu1 }
 0x41e   : > { %v2410_v14 = vadd.f32 %v2409_v25, %v2329_v20  ;;  %v13845_v25 = vld [vmem:[#allocation76_spill] sm:$0xff] }
 0x41f   : > { %v9029_v60 = vpop.f32.mrf.mxu1 }
 0x420   : > { %v2486_v5 = vadd.f32 %v2485_v12, %v2410_v14  ;;  %v2637_v19 = vpop.f32.mrf.mxu0  ;;  %v13840_v12 = vld [vmem:[#allocation79_spill] sm:$0xff]  ;;  %v13841_v60 = vld [vmem:[#allocation72_spill] sm:$0xff]  ;;  %v13846_v14 = vld [vmem:[#allocation85_spill] sm:$0xff] }
 0x421   : > { %v2560_v3 = vpop.f32.mrf.mxu1 }
 0x422   : > { %v2561_v52 = vadd.f32 %v2560_v3, %v2486_v5  ;;  %v9050_v63 = vpop.f32.mrf.mxu0  ;;  %v13838_v5 = vld [vmem:[#allocation77_spill] sm:$0xff] }
 0x423   : > { %v9043_v62 = vpop.f32.mrf.mxu1  ;;  %v13848_v63 = vld [vmem:[#allocation87_spill] sm:$0xff] }
 0x424   : > { %v2638_v44 = vadd.f32 %v2637_v19, %v2561_v52  ;;  %v13839_v19 = vld [vmem:[#allocation71_spill] sm:$0xff]  ;;  %v13847_v52 = vld [vmem:[#allocation78_spill] sm:$0xff]  ;;  %v13849_v62 = vld [vmem:[#allocation80_spill] sm:$0xff] }
 0x425   : > { %v2710_v34 = vpop.f32.mrf.mxu1 }
 0x426   : > { %v2711_v51 = vadd.f32 %v2710_v34, %v2638_v44  ;;  %v13850_v44 = vld [vmem:[#allocation69_spill] sm:$0xff] }
 0x427   : > { %v9057_v11 = vpop.f32.mrf.mxu1  ;;  %v13851_v34 = vld [vmem:[#allocation81_spill] sm:$0xff] }
 0x428   : > { %v10826_v42 = vand.u32 4294901760, %v2711_v51  ;;  %v13842_v11 = vld [vmem:[#allocation73_spill] sm:$0xff] }
 0x42a   : > { %13837 = vst [vmem:[#allocation90_spill] sm:$0xff] %v10826_v42  ;;  %v10829_v4 = vsub.f32 %v2711_v51, %v10826_v42  ;;  %3099 = vmatmul.mubr.f32.vlgmr.msra.gmra.mxu1 %v10826_v42  ;;  %v13852_v51 = vld [vmem:[#allocation82_spill] sm:$0xff] }
 0x42b   : > { %3245 = vmatpush1.msra.mxu1 %v10375_v40  ;;  %3338 = vmatprep.mubr.f32.mxu1 %v13791_v39  ;;  %v13855_v42 = vld [vmem:[#allocation86_spill] sm:$0xff] }
 0x42c   : > { %v2864_v10 = vand.u32 4294901760, %v10829_v4  ;;  %3247 = vmatprep.subr.mxu1 %v10379_v33 }
 0x42d   : > { %3249 = vmatpush1.msra.mxu1 %v10403_v2 }
 0x42e   : > { %v2865_v3 = vsub.f32 %v10829_v4, %v2864_v10  ;;  %3251 = vmatprep.subr.mxu1 %v10412_v49 }
 0x42f   : > { %3253 = vmatpush1.msra.mxu1 %v10420_v27 }
 0x430   : > { %3255 = vmatprep.subr.mxu1 %v10427_v24  ;;  %v2866_v20 = vand.u32 4294901760, %v2865_v3  ;;  %v13853_v3 = vld [vmem:[#allocation83_spill] sm:$0xff] }
 0x431   : > { %3257 = vmatpush1.msra.mxu1 %v10435_v50 }
 0x432   : > { %3259 = vmatprep.subr.mxu1 %v10446_v38  ;;  %2867 = vmatmul.mubr.f32.vlgmr.msra.gmra.mxu0 %v2866_v20  ;;  %v13854_v20 = vld [vmem:[#allocation84_spill] sm:$0xff] }
 0x433   : > { %3110 = vmatpush1.msra.mxu0 %v10396_v53  ;;  %3261 = vmatpush1.msra.mxu1 %v10459_v56 }
 0x434   : > { %3113 = vmatprep.subr.mxu0 %v10410_v29  ;;  %3263 = vmatprep.subr.mxu1 %v10474_v0 }
 0x435   : > { %3116 = vmatpush1.msra.mxu0 %v10433_v57  ;;  %3265 = vmatpush1.msra.mxu1 %v10483_v43 }
 0x436   : > { %3119 = vmatprep.subr.mxu0 %v10444_v41  ;;  %3267 = vmatprep.subr.mxu1 %v10497_v9 }
 0x437   : > { %3122 = vmatpush1.msra.mxu0 %v10457_v61  ;;  %3269 = vmatpush1.msra.mxu1 %v10510_v37 }
 0x438   : > { %3125 = vmatprep.subr.mxu0 %v10472_v31  ;;  %3271 = vmatprep.subr.mxu1 %v10523_v23 }
 0x439   : > { %3128 = vmatpush1.msra.mxu0 %v10481_v47  ;;  %3273 = vmatpush1.msra.mxu1 %v10537_v54 }
 0x43a   : > { %3131 = vmatprep.subr.mxu0 %v10495_v55  ;;  %3275 = vmatprep.subr.mxu1 %v10549_v46 }
 0x43b   : > { %3134 = vmatpush1.msra.mxu0 %v10508_v58  ;;  %3277 = vmatpush1.msra.mxu1 %v10561_v59 }
 0x43c   : > { %3137 = vmatprep.subr.mxu0 %v10521_v22  ;;  %3279 = vmatprep.subr.mxu1 %v10645_v35 }
 0x43d   : > { %3140 = vmatpush1.msra.mxu0 %v10535_v8  ;;  %3281 = vmatpush1.msra.mxu1 %v10650_v45 }
 0x43e   : > { %3143 = vmatprep.subr.mxu0 %v10547_v16  ;;  %3283 = vmatprep.subr.mxu1 %v10658_v1 }
 0x43f   : > { %3146 = vmatpush1.msra.mxu0 %v10559_v13  ;;  %3285 = vmatpush1.msra.mxu1 %v10667_v21 }
 0x440   : > { %3149 = vmatprep.subr.mxu0 %v10570_v32  ;;  %3287 = vmatprep.subr.mxu1 %v10677_v30 }
 0x441   : > { %3152 = vmatpush1.msra.mxu0 %v10579_v48  ;;  %3289 = vmatpush1.msra.mxu1 %v10687_v26 }
 0x442   : > { %3155 = vmatprep.subr.mxu0 %v10587_v28  ;;  %3291 = vmatprep.subr.mxu1 %v13838_v5 }
 0x443   : > { %3158 = vmatpush1.msra.mxu0 %v13839_v19  ;;  %3293 = vmatpush1.msra.mxu1 %v13840_v12 }
 0x444   : > { %3161 = vmatprep.subr.mxu0 %v13841_v60  ;;  %3295 = vmatprep.subr.mxu1 %v10745_v36 }
 0x445   : > { %3164 = vmatpush1.msra.mxu0 %v13842_v11  ;;  %3297 = vmatpush1.msra.mxu1 %v10754_v6 }
 0x446   : > { %3167 = vmatprep.subr.mxu0 %v13843_v15  ;;  %3299 = vmatprep.subr.mxu1 %v10765_v18 }
 0x447   : > { %3170 = vmatpush1.msra.mxu0 %v13844_v7  ;;  %3301 = vmatpush1.msra.mxu1 %v10777_v17 }
 0x448   : > { %3173 = vmatprep.subr.mxu0 %v13845_v25  ;;  %3303 = vmatprep.subr.mxu1 %v13846_v14 }
 0x449   : > { %3176 = vmatpush1.msra.mxu0 %v13847_v52  ;;  %3305 = vmatpush1.msra.mxu1 %v13848_v63 }
 0x44a   : > { %3179 = vmatprep.subr.mxu0 %v13849_v62  ;;  %3342 = vmatmul.mubr.f32.vlgmr.msra.gmra.mxu1 %v2864_v10  ;;  %v13856_v10 = vld [vmem:[#allocation88_spill] sm:$0xff] }
 0x44b   : > { %3517 = vmatprep.subr.mxu1 %v13850_v44  ;;  %3182 = vmatpush1.msra.mxu0 %v13851_v34 }
 0x44c   : > { %3519 = vmatpush1.msra.mxu1 %v10375_v40  ;;  %3185 = vmatprep.subr.mxu0 %v13852_v51  ;;  %v13857_v40 = vld [vmem:[#allocation89_spill] sm:$0xff] }
 0x44d   : > { %3521 = vmatprep.subr.mxu1 %v10379_v33  ;;  %3188 = vmatpush1.msra.mxu0 %v13853_v3  ;;  %v13858_v33 = vld [vmem:[#allocation70_spill] sm:$0xff] }
 0x44e   : > { %3523 = vmatpush1.msra.mxu1 %v10403_v2  ;;  %3191 = vmatprep.subr.mxu0 %v13854_v20  ;;  %v13859_v2 = vand.u32 4294901760, %v13858_v33 }
 0x44f   : > { %3525 = vmatprep.subr.mxu1 %v10412_v49  ;;  %3194 = vmatpush1.msra.mxu0 %v13855_v42  ;;  %v13860_v49 = vand.u32 4294901760, %v10396_v53  ;;  %v13864_v53 = vand.u32 4294901760, %v10457_v61  ;;  %v13868_v61 = vand.u32 4294901760, %v10508_v58  ;;  %v13877_v58 = vand.u32 4294901760, %v13841_v60 }
 0x450   : > { %3527 = vmatpush1.msra.mxu1 %v10420_v27  ;;  %3197 = vmatprep.subr.mxu0 %v13856_v10  ;;  %v13862_v27 = vand.u32 4294901760, %v10433_v57  ;;  %v13866_v57 = vand.u32 4294901760, %v10481_v47  ;;  %v13870_v47 = vand.u32 4294901760, %v10535_v8  ;;  %v13882_v8 = vand.u32 4294901760, %v13847_v52 }
 0x451   : > { %3529 = vmatprep.subr.mxu1 %v10427_v24  ;;  %3200 = vmatpush1.msra.mxu0 %v13857_v40  ;;  %v13861_v24 = vand.u32 4294901760, %v10410_v29  ;;  %v13865_v29 = vand.u32 4294901760, %v10472_v31  ;;  %v13875_v31 = vand.u32 4294901760, %v10587_v28  ;;  %v13879_v28 = vand.u32 4294901760, %v13843_v15 }
 0x452   : > { %3233 = vmatprep.mubr.f32.mxu0 %v13791_v39  ;;  %3531 = vmatpush1.msra.mxu1 %v10435_v50  ;;  %v13863_v50 = vand.u32 4294901760, %v10444_v41  ;;  %v13869_v41 = vand.u32 4294901760, %v10521_v22  ;;  %v13880_v22 = vand.u32 4294901760, %v13844_v7 }
 0x453   : > { %3236 = vmatmul.mubr.f32.vlgmr.msra.gmra.mxu0 %v10829_v4  ;;  %3351 = vmatprep.subr.mxu0 %v13859_v2 }
 0x454   : > { %3533 = vmatprep.subr.mxu1 %v10446_v38  ;;  %3355 = vmatpush1.msra.mxu0 %v13860_v49  ;;  %v13874_v38 = vand.u32 4294901760, %v10579_v48  ;;  %v13889_v48 = vand.u32 4294901760, %v13855_v42 }
 0x455   : > { %3535 = vmatpush1.msra.mxu1 %v10459_v56  ;;  %3359 = vmatprep.subr.mxu0 %v13861_v24  ;;  %v13872_v56 = vand.u32 4294901760, %v10559_v13  ;;  %v13887_v13 = vand.u32 4294901760, %v13853_v3 }
 0x456   : > { %3537 = vmatprep.subr.mxu1 %v10474_v0  ;;  %3363 = vmatpush1.msra.mxu0 %v13862_v27  ;;  %v13876_v0 = vand.u32 4294901760, %v13839_v19  ;;  %v3641_v27 = vld [vmem:[%s13278_s9 + $0x58] sm:$0xff] }
 0x457   : > { %3539 = vmatpush1.msra.mxu1 %v10483_v43  ;;  %3367 = vmatprep.subr.mxu0 %v13863_v50  ;;  %v13867_v43 = vand.u32 4294901760, %v10495_v55  ;;  %v13871_v55 = vand.u32 4294901760, %v10547_v16  ;;  %v13886_v16 = vand.u32 4294901760, %v13852_v51 }
 0x458   : > { %3541 = vmatprep.subr.mxu1 %v10497_v9  ;;  %3371 = vmatpush1.msra.mxu0 %v13864_v53  ;;  %v13878_v9 = vand.u32 4294901760, %v13842_v11  ;;  %v3643_v11 = vld [vmem:[%s13278_s9 + $0x68] sm:$0xff] }
 0x459   : > { %3543 = vmatpush1.msra.mxu1 %v10510_v37  ;;  %3375 = vmatprep.subr.mxu0 %v13865_v29  ;;  %v13881_v37 = vand.u32 4294901760, %v13845_v25  ;;  %v11044_v25 = vand.u32 4294901760, %v3643_v11 }
 0x45a   : > { %3545 = vmatprep.subr.mxu1 %v10523_v23  ;;  %3379 = vmatpush1.msra.mxu0 %v13866_v57  ;;  %v13883_v23 = vand.u32 4294901760, %v13849_v62 }
 0x45b   : > { %3547 = vmatpush1.msra.mxu1 %v10537_v54  ;;  %3383 = vmatprep.subr.mxu0 %v13867_v43  ;;  %v13885_v54 = vand.u32 4294901760, %v13851_v34  ;;  %v3642_v34 = vld [vmem:[%s13278_s9 + $0x60] sm:$0xff]  ;;  %v3656_v43 = vld [vmem:[%s13278_s9 + $0xd0] sm:$0xff] }
 0x45c   : > { %3549 = vmatprep.subr.mxu1 %v10549_v46  ;;  %3387 = vmatpush1.msra.mxu0 %v13868_v61  ;;  %v13884_v46 = vld [vmem:[#allocation90_spill] sm:$0xff] }
 0x45d   : > { %3551 = vmatpush1.msra.mxu1 %v10561_v59  ;;  %3391 = vmatprep.subr.mxu0 %v13869_v41  ;;  %v13873_v59 = vand.u32 4294901760, %v10570_v32  ;;  %v13888_v32 = vand.u32 4294901760, %v13854_v20  ;;  %v11068_v20 = vsub.f32 %v3643_v11, %v11044_v25 }
 0x45e   : > { %3553 = vmatprep.subr.mxu1 %v10645_v35  ;;  %3395 = vmatpush1.msra.mxu0 %v13870_v47  ;;  %v13891_v35 = vand.u32 4294901760, %v13857_v40  ;;  %v3657_v40 = vld [vmem:[%s13278_s9 + $0xd8] sm:$0xff] }
 0x45f   : > { %3555 = vmatpush1.msra.mxu1 %v10650_v45  ;;  %3399 = vmatprep.subr.mxu0 %v13871_v55  ;;  %v3661_v45 = vld [vmem:[%s13278_s9 + $0xf8] sm:$0xff]  ;;  %v13485_v29 = vand.u32 4294901760, %v11068_v20  ;;  %v11102_v55 = vand.u32 4294901760, %v3657_v40 }
 0x460   : > { %3557 = vmatprep.subr.mxu1 %v10658_v1  ;;  %3403 = vmatpush1.msra.mxu0 %v13872_v56  ;;  %v11002_v1 = vand.u32 4294901760, %v3661_v45  ;;  %v3640_v56 = vld [vmem:[%s13278_s9 + $0x50] sm:$0xff] }
 0x461   : > { %3559 = vmatpush1.msra.mxu1 %v10667_v21  ;;  %3407 = vmatprep.subr.mxu0 %v13873_v59  ;;  %v3645_v21 = vld [vmem:[%s13278_s9 + $0x78] sm:$0xff] }
 0x462   : > { %3561 = vmatprep.subr.mxu1 %v10677_v30  ;;  %3411 = vmatpush1.msra.mxu0 %v13874_v38  ;;  %13892 = vst [vmem:[#allocation77_spill] sm:$0xff] %v11002_v1  ;;  %v11007_v42 = vand.u32 4294901760, %v3645_v21  ;;  %v3660_v30 = vld [vmem:[%s13278_s9 + $0xf0] sm:$0xff]  ;;  %v3796_v38 = vsub.f32 %v11068_v20, %v13485_v29 }
 0x463   : > { %3563 = vmatpush1.msra.mxu1 %v10687_v26  ;;  %3415 = vmatprep.subr.mxu0 %v13875_v31  ;;  %v13890_v26 = vand.u32 4294901760, %v13856_v10  ;;  %v11070_v10 = vand.u32 4294901760, %v3642_v34 }
 0x464   : > { %3565 = vmatprep.subr.mxu1 %v13838_v5  ;;  %3419 = vmatpush1.msra.mxu0 %v13876_v0  ;;  %v3659_v5 = vld [vmem:[%s13278_s9 + $0xe8] sm:$0xff]  ;;  %v11111_v0 = vand.u32 4294901760, %v3641_v27 }
 0x465   : > { %3567 = vmatpush1.msra.mxu1 %v13840_v12  ;;  %3423 = vmatprep.subr.mxu0 %v13877_v58  ;;  %v11034_v60 = vand.u32 4294901760, %v3659_v5  ;;  %v11092_v57 = vsub.f32 %v3642_v34, %v11070_v10  ;;  %v3655_v58 = vld [vmem:[%s13278_s9 + $0xc8] sm:$0xff] }
 0x466   : > { %3569 = vmatprep.subr.mxu1 %v10745_v36  ;;  %3427 = vmatpush1.msra.mxu0 %v13878_v9  ;;  %v11013_v36 = vsub.f32 %v3661_v45, %v11002_v1  ;;  %v3638_v45 = vld [vmem:[%s13278_s9 + $0x40] sm:$0xff] }
 0x467   : > { %3571 = vmatpush1.msra.mxu1 %v10754_v6  ;;  %3431 = vmatprep.subr.mxu0 %v13879_v28  ;;  %v11015_v6 = vand.u32 4294901760, %v3660_v30  ;;  %v11055_v62 = vsub.f32 %v3659_v5, %v11034_v60  ;;  %v13481_v31 = vand.u32 4294901760, %v11092_v57 }
 0x468   : > { %3573 = vmatprep.subr.mxu1 %v10765_v18  ;;  %3435 = vmatpush1.msra.mxu0 %v13880_v22  ;;  %13893 = vst [vmem:[#allocation71_spill] sm:$0xff] %v11013_v36  ;;  %v3644_v18 = vld [vmem:[%s13278_s9 + $0x70] sm:$0xff]  ;;  %v13492_v19 = vand.u32 4294901760, %v11013_v36  ;;  %v11120_v22 = vsub.f32 %v3657_v40, %v11102_v55 }
 0x469   : > { %3575 = vmatpush1.msra.mxu1 %v10777_v17  ;;  %3439 = vmatprep.subr.mxu0 %v13881_v37  ;;  %v11022_v17 = vsub.f32 %v3645_v21, %v11007_v42  ;;  %v11024_v4 = vand.u32 4294901760, %v3644_v18  ;;  %v11032_v12 = vsub.f32 %v3660_v30, %v11015_v6  ;;  %v13486_v49 = vand.u32 4294901760, %v11055_v62 }
 0x46a   : > { %3577 = vmatprep.subr.mxu1 %v13846_v14  ;;  %3443 = vmatpush1.msra.mxu0 %v13882_v8  ;;  %v3658_v14 = vld [vmem:[%s13278_s9 + $0xe0] sm:$0xff]  ;;  %v3894_v52 = vsub.f32 %v11013_v36, %v13492_v19  ;;  %v11122_v37 = vand.u32 4294901760, %v3656_v43  ;;  %v3639_v8 = vld [vmem:[%s13278_s9 + $0x48] sm:$0xff] }
 0x46b   : > { %3579 = vmatpush1.msra.mxu1 %v13848_v63  ;;  %3612 = vmatprep.mubr.f32.mxu1 %v13791_v39  ;;  %v13490_v15 = vand.u32 4294901760, %v11022_v17  ;;  %v11042_v7 = vsub.f32 %v3644_v18, %v11024_v4  ;;  %v13489_v63 = vand.u32 4294901760, %v11032_v12  ;;  %v11057_v44 = vand.u32 4294901760, %v3658_v14 }
 0x46c   : > { %3447 = vmatprep.subr.mxu0 %v13883_v23  ;;  %3614 = vmatmul.mubr.f32.vlgmr.msra.gmra.mxu1 %v13884_v46  ;;  %v3895_v33 = vand.u32 4294901760, %v3894_v52  ;;  %v3908_v41 = vsub.f32 %v11055_v62, %v13486_v49  ;;  %v3797_v23 = vand.u32 4294901760, %v3796_v38  ;;  %v11154_v5 = vand.u32 4294901760, %v3639_v8 }
 0x46d   : > { %3451 = vmatpush1.msra.mxu0 %v13885_v54  ;;  %3508 = vmatprep.mubr.f32.mxu0 %v13791_v39  ;;  %v3782_v51 = vsub.f32 %v11022_v17, %v13490_v15  ;;  %v13487_v3 = vand.u32 4294901760, %v11042_v7  ;;  %v3901_v2 = vsub.f32 %v11032_v12, %v13489_v63  ;;  %v11081_v24 = vsub.f32 %v3658_v14, %v11057_v44 }
 0x46e   : > { %3455 = vmatprep.subr.mxu0 %v13886_v16  ;;  %7977 = vmatprep.subr.mxu1 %v3895_v33  ;;  %v3909_v9 = vand.u32 4294901760, %v3908_v41  ;;  %v11132_v54 = vsub.f32 %v3641_v27, %v11111_v0  ;;  %v11134_v16 = vand.u32 4294901760, %v3640_v56  ;;  %v11172_v33 = vsub.f32 %v3639_v8, %v11154_v5  ;;  %v3653_v27 = vld [vmem:[%s13278_s9 + $0xb8] sm:$0xff] }
 0x46f   : > { %3459 = vmatpush1.msra.mxu0 %v13887_v13  ;;  %v3783_v50 = vand.u32 4294901760, %v3782_v51  ;;  %v3789_v53 = vsub.f32 %v11042_v7, %v13487_v3  ;;  %v3902_v61 = vand.u32 4294901760, %v3901_v2  ;;  %v13483_v47 = vand.u32 4294901760, %v11081_v24  ;;  %v3654_v13 = vld [vmem:[%s13278_s9 + $0xc0] sm:$0xff]  ;;  %v3637_v41 = vld [vmem:[%s13278_s9 + $0x38] sm:$0xff] }
 0x470   : > { %3463 = vmatprep.subr.mxu0 %v13888_v32  ;;  %v13479_v30 = vand.u32 4294901760, %v11132_v54  ;;  %v11152_v18 = vsub.f32 %v3640_v56, %v11134_v16  ;;  %v11164_v34 = vand.u32 4294901760, %v3654_v13  ;;  %v11174_v2 = vand.u32 4294901760, %v3638_v45 }
 0x471   : > { %3467 = vmatpush1.msra.mxu0 %v13889_v48  ;;  %7978 = vmatpush3.msra.mxu1 %v3783_v50  ;;  %v3790_v59 = vand.u32 4294901760, %v3789_v53  ;;  %v3915_v28 = vsub.f32 %v11081_v24, %v13483_v47  ;;  %v13480_v48 = vand.u32 4294901760, %v11120_v22  ;;  %v13473_v38 = vand.u32 4294901760, %v11172_v33 }
 0x472   : > { %3471 = vmatprep.subr.mxu0 %v13890_v26  ;;  %7979 = vmatprep.subr.mxu1 %v3902_v61  ;;  %v11142_v26 = vsub.f32 %v3656_v43, %v11122_v37  ;;  %v3810_v51 = vsub.f32 %v11132_v54, %v13479_v30  ;;  %v13476_v40 = vand.u32 4294901760, %v11152_v18  ;;  %v11185_v61 = vsub.f32 %v3654_v13, %v11164_v34  ;;  %v3636_v13 = vld [vmem:[%s13278_s9 + $0x30] sm:$0xff] }
 0x473   : > { %3475 = vmatpush1.msra.mxu0 %v13891_v35  ;;  %7980 = vmatpush3.msra.mxu1 %v3790_v59  ;;  %v3916_v32 = vand.u32 4294901760, %v3915_v28  ;;  %v11144_v35 = vand.u32 4294901760, %v3655_v58  ;;  %v3922_v11 = vsub.f32 %v11120_v22, %v13480_v48 }
 0x474   : > { %3510 = vmatmul.mubr.f32.vlgmr.msra.gmra.mxu0 %v13884_v46  ;;  %7942 = vmatprep.subr.mxu0 %v11002_v1  ;;  %v3803_v46 = vsub.f32 %v11092_v57, %v13481_v31  ;;  %v13477_v14 = vand.u32 4294901760, %v11142_v26  ;;  %v3811_v56 = vand.u32 4294901760, %v3810_v51  ;;  %v3817_v59 = vsub.f32 %v11152_v18, %v13476_v40  ;;  %v3651_v51 = vld [vmem:[%s13278_s9 + $0xa8] sm:$0xff] }
 0x475   : > { %7943 = vmatpush3.msra.mxu0 %v11007_v42  ;;  %7981 = vmatprep.subr.mxu1 %v3909_v9  ;;  %v11162_v52 = vsub.f32 %v3655_v58, %v11144_v35  ;;  %v3923_v50 = vand.u32 4294901760, %v3922_v11  ;;  %v11196_v58 = vsub.f32 %v3638_v45, %v11174_v2  ;;  %v3652_v9 = vld [vmem:[%s13278_s9 + $0xb0] sm:$0xff]  ;;  %v3824_v45 = vsub.f32 %v11172_v33, %v13473_v38  ;;  %v3635_v38 = vld [vmem:[%s13278_s9 + $0x28] sm:$0xff] }
 0x476   : > { %7944 = vmatprep.subr.mxu0 %v11015_v6  ;;  %7982 = vmatpush3.msra.mxu1 %v3797_v23  ;;  %v3804_v21 = vand.u32 4294901760, %v3803_v46  ;;  %v3929_v53 = vsub.f32 %v11142_v26, %v13477_v14  ;;  %v13475_v23 = vand.u32 4294901760, %v11185_v61  ;;  %v11206_v46 = vand.u32 4294901760, %v3653_v27 }
 0x477   : > { %7945 = vmatpush3.msra.mxu0 %v11024_v4  ;;  %7983 = vmatprep.subr.mxu1 %v3916_v32  ;;  %v13474_v43 = vand.u32 4294901760, %v11162_v52  ;;  %v3818_v32 = vand.u32 4294901760, %v3817_v59  ;;  %v11215_v11 = vand.u32 4294901760, %v3637_v41  ;;  %v11226_v59 = vand.u32 4294901760, %v3652_v9 }
 0x478   : > { %7946 = vmatprep.subr.mxu0 %v11034_v60  ;;  %7984 = vmatpush3.msra.mxu1 %v3804_v21  ;;  %v3930_v28 = vand.u32 4294901760, %v3929_v53  ;;  %v13478_v21 = vand.u32 4294901760, %v11196_v58  ;;  %v3943_v53 = vsub.f32 %v11185_v61, %v13475_v23  ;;  %v11238_v23 = vand.u32 4294901760, %v3636_v13 }
 0x479   : > { %7947 = vmatpush3.msra.mxu0 %v11044_v25  ;;  %7985 = vmatprep.subr.mxu1 %v3923_v50  ;;  %v3936_v8 = vsub.f32 %v11162_v52, %v13474_v43  ;;  %v3825_v43 = vand.u32 4294901760, %v3824_v45  ;;  %v11246_v45 = vsub.f32 %v3652_v9, %v11226_v59  ;;  %v11248_v14 = vand.u32 4294901760, %v3651_v51 }
 0x47a   : > { %7948 = vmatprep.subr.mxu0 %v11057_v44  ;;  %7986 = vmatpush3.msra.mxu1 %v3811_v56  ;;  %v11224_v56 = vsub.f32 %v3653_v27, %v11206_v46  ;;  %v3650_v27 = vld [vmem:[%s13278_s9 + $0xa0] sm:$0xff]  ;;  %v3944_v40 = vand.u32 4294901760, %v3943_v53  ;;  %v11258_v53 = vand.u32 4294901760, %v3635_v38 }
 0x47b   : > { %7949 = vmatpush3.msra.mxu0 %v11070_v10  ;;  %7987 = vmatprep.subr.mxu1 %v3930_v28  ;;  %v3937_v50 = vand.u32 4294901760, %v3936_v8  ;;  %v3831_v28 = vsub.f32 %v11196_v58, %v13478_v21  ;;  %v11236_v8 = vsub.f32 %v3637_v41, %v11215_v11  ;;  %13895 = vst [vmem:[#allocation72_spill] sm:$0xff] %v11246_v45  ;;  %v3634_v41 = vld [vmem:[%s13278_s9 + $0x20] sm:$0xff]  ;;  %v13488_v48 = vand.u32 4294901760, %v11246_v45 }
 0x47c   : > { %7950 = vmatprep.subr.mxu0 %v11102_v55  ;;  %7988 = vmatpush3.msra.mxu1 %v3818_v32  ;;  %v13482_v32 = vand.u32 4294901760, %v11224_v56  ;;  %v11266_v31 = vsub.f32 %v3651_v51, %v11248_v14  ;;  %v3649_v51 = vld [vmem:[%s13278_s9 + $0x98] sm:$0xff] }
 0x47d   : > { %7951 = vmatpush3.msra.mxu0 %v11111_v0  ;;  %13894 = vst [vmem:[#allocation79_spill] sm:$0xff] %v11236_v8  ;;  %7989 = vmatprep.subr.mxu1 %v3937_v50  ;;  %v3832_v21 = vand.u32 4294901760, %v3831_v28  ;;  %v13484_v30 = vand.u32 4294901760, %v11236_v8  ;;  %v11256_v50 = vsub.f32 %v3636_v13, %v11238_v23  ;;  %v11276_v28 = vsub.f32 %v3635_v38, %v11258_v53  ;;  %v3633_v38 = vld [vmem:[%s13278_s9 + $0x18] sm:$0xff] }
 0x47e   : > { %7952 = vmatprep.subr.mxu0 %v11122_v37  ;;  %7990 = vmatpush3.msra.mxu1 %v3825_v43  ;;  %v3950_v9 = vsub.f32 %v11224_v56, %v13482_v32  ;;  %13897 = vst [vmem:[#allocation74_spill] sm:$0xff] %v11266_v31  ;;  %v11268_v43 = vand.u32 4294901760, %v3650_v27  ;;  %v11278_v32 = vand.u32 4294901760, %v3634_v41 }
 0x47f   : > { %7953 = vmatpush3.msra.mxu0 %v11134_v16  ;;  %13896 = vst [vmem:[#allocation73_spill] sm:$0xff] %v11256_v50  ;;  %7991 = vmatprep.subr.mxu1 %v3944_v40  ;;  %v3838_v13 = vsub.f32 %v11236_v8, %v13484_v30  ;;  %v13491_v40 = vand.u32 4294901760, %v11256_v50  ;;  %13898 = vst [vmem:[#allocation75_spill] sm:$0xff] %v11276_v28  ;;  %v13494_v30 = vand.u32 4294901760, %v11266_v31  ;;  %v13499_v3 = vand.u32 4294901760, %v11276_v28 }
 0x480   : > { %7954 = vmatprep.subr.mxu0 %v11144_v35  ;;  %7992 = vmatpush3.msra.mxu1 %v3832_v21  ;;  %v3951_v47 = vand.u32 4294901760, %v3950_v9  ;;  %v3957_v21 = vsub.f32 %v11246_v45, %v13488_v48  ;;  %v11289_v29 = vsub.f32 %v3650_v27, %v11268_v43  ;;  %v11300_v48 = vsub.f32 %v3634_v41, %v11278_v32  ;;  %v3648_v27 = vld [vmem:[%s13278_s9 + $0x90] sm:$0xff] }
 0x481   : > { %7955 = vmatpush3.msra.mxu0 %v11154_v5  ;;  %v3839_v49 = vand.u32 4294901760, %v3838_v13  ;;  %v3845_v9 = vsub.f32 %v11256_v50, %v13491_v40  ;;  %v3964_v13 = vsub.f32 %v11266_v31, %v13494_v30  ;;  %v11310_v40 = vand.u32 4294901760, %v3649_v51  ;;  %v3632_v41 = vld [vmem:[%s13278_s9 + $0x10] sm:$0xff]  ;;  %v3647_v30 = vld [vmem:[%s13278_s9 + $0x88] sm:$0xff] }
 0x482   : > { %7956 = vmatprep.subr.mxu0 %v11164_v34  ;;  %13899 = vst [vmem:[#allocation76_spill] sm:$0xff] %v11289_v29  ;;  %13900 = vst [vmem:[#allocation85_spill] sm:$0xff] %v11300_v48  ;;  %7993 = vmatprep.subr.mxu1 %v3951_v47  ;;  %v3958_v63 = vand.u32 4294901760, %v3957_v21  ;;  %v3852_v39 = vsub.f32 %v11276_v28, %v13499_v3  ;;  %v11319_v21 = vand.u32 4294901760, %v3633_v38  ;;  %v13903_v31 = vand.u32 4294901760, %v11289_v29  ;;  %v3631_v3 = vld [vmem:[%s13278_s9 + $0x8] sm:$0xff] }
 0x483   : > { %7957 = vmatpush3.msra.mxu0 %v11174_v2  ;;  %13901 = vst [vmem:[#allocation78_spill] sm:$0xff] %v11310_v40  ;;  %7994 = vmatpush3.msra.mxu1 %v3839_v49  ;;  %v3846_v19 = vand.u32 4294901760, %v3845_v9  ;;  %v3965_v15 = vand.u32 4294901760, %v3964_v13  ;;  %v11328_v49 = vsub.f32 %v3649_v51, %v11310_v40  ;;  %v11330_v9 = vand.u32 4294901760, %v3648_v27  ;;  %v3646_v51 = vld [vmem:[%s13278_s9 + $0x80] sm:$0xff] }
 0x484   : > { %7958 = vmatprep.subr.mxu0 %v11206_v46  ;;  %13902 = vst [vmem:[#allocation87_spill] sm:$0xff] %v11319_v21  ;;  %7995 = vmatprep.subr.mxu1 %v3958_v63  ;;  %v3971_v50 = vsub.f32 %v11289_v29, %v13903_v31  ;;  %v3853_v47 = vand.u32 4294901760, %v3852_v39  ;;  %v13906_v63 = vand.u32 4294901760, %v11300_v48  ;;  %v11340_v28 = vsub.f32 %v3633_v38, %v11319_v21  ;;  %v3630_v38 = vld [vmem:[%s13278_s9] sm:$0xff] }
 0x485   : > { %7959 = vmatpush3.msra.mxu0 %v11215_v11  ;;  %13904 = vst [vmem:[#allocation80_spill] sm:$0xff] %v11328_v49  ;;  %13905 = vst [vmem:[#allocation69_spill] sm:$0xff] %v11330_v9  ;;  %7996 = vmatpush3.msra.mxu1 %v3846_v19  ;;  %v11342_v31 = vand.u32 4294901760, %v3632_v41  ;;  %v13512_v19 = vand.u32 4294901760, %v11328_v49  ;;  %v11350_v39 = vsub.f32 %v3648_v27, %v11330_v9  ;;  %v11352_v45 = vand.u32 4294901760, %v3647_v30 }
 0x486   : > { %7960 = vmatprep.subr.mxu0 %v11226_v59  ;;  %v3859_v13 = vsub.f32 %v11300_v48, %v13906_v63  ;;  %13907 = vst [vmem:[#allocation81_spill] sm:$0xff] %v11340_v28  ;;  %7997 = vmatprep.subr.mxu1 %v3965_v15  ;;  %v3972_v29 = vand.u32 4294901760, %v3971_v50  ;;  %v13517_v48 = vand.u32 4294901760, %v11340_v28  ;;  %v11362_v50 = vand.u32 4294901760, %v3631_v3 }
 0x487   : > { %7961 = vmatpush3.msra.mxu0 %v11238_v23  ;;  %13908 = vst [vmem:[#allocation82_spill] sm:$0xff] %v11342_v31  ;;  %13909 = vst [vmem:[#allocation83_spill] sm:$0xff] %v11350_v39  ;;  %7998 = vmatpush3.msra.mxu1 %v3853_v47  ;;  %v11360_v15 = vsub.f32 %v3632_v41, %v11342_v31  ;;  %v3978_v27 = vsub.f32 %v11328_v49, %v13512_v19  ;;  %v11372_v47 = vand.u32 4294901760, %v3646_v51 }
 0x488   : > { %7962 = vmatprep.subr.mxu0 %v11248_v14  ;;  %13910 = vst [vmem:[#allocation84_spill] sm:$0xff] %v11352_v45  ;;  %v3860_v63 = vand.u32 4294901760, %v3859_v13  ;;  %13912 = vst [vmem:[#allocation88_spill] sm:$0xff] %v11362_v50  ;;  %7999 = vmatprep.subr.mxu1 %v3972_v29  ;;  %v3866_v41 = vsub.f32 %v11340_v28, %v13517_v48  ;;  %v11380_v13 = vsub.f32 %v3631_v3, %v11362_v50 }
 0x489   : > { %7963 = vmatpush3.msra.mxu0 %v11258_v53  ;;  %13911 = vst [vmem:[#allocation86_spill] sm:$0xff] %v11360_v15  ;;  %13914 = vst [vmem:[#allocation70_spill] sm:$0xff] %v11372_v47  ;;  %v13523_v29 = vand.u32 4294901760, %v11360_v15  ;;  %v11382_v19 = vand.u32 4294901760, %v3630_v38 }
 0x48a   : > { %7964 = vmatprep.subr.mxu0 %v11268_v43  ;;  %8000 = vmatpush3.msra.mxu1 %v3860_v63  ;;  %13915 = vst [vmem:[#allocation90_spill] sm:$0xff] %v11380_v13  ;;  %v3867_v48 = vand.u32 4294901760, %v3866_v41  ;;  %v13528_v28 = vand.u32 4294901760, %v11380_v13 }
 0x48b   : > { %7965 = vmatpush3.msra.mxu0 %v11278_v32  ;;  %13916 = vst [vmem:[#allocation91_spill] sm:$0xff] %v11382_v19  ;;  %v3873_v3 = vsub.f32 %v11360_v15, %v13523_v29 }
 0x48c   : > { %7966 = vmatprep.subr.mxu0 %v11310_v40  ;;  %v3880_v29 = vsub.f32 %v11380_v13, %v13528_v28 }
 0x48d   : > { %7967 = vmatpush3.msra.mxu0 %v11319_v21  ;;  %v13520_v21 = vand.u32 4294901760, %v11350_v39  ;;  %v3874_v41 = vand.u32 4294901760, %v3873_v3 }
 0x48e   : > { %7968 = vmatprep.subr.mxu0 %v11330_v9  ;;  %v11370_v9 = vsub.f32 %v3647_v30, %v11352_v45  ;;  %v3979_v30 = vand.u32 4294901760, %v3978_v27  ;;  %v11398_v27 = vsub.f32 %v3630_v38, %v11382_v19 }
 0x48f   : > { %7969 = vmatpush3.msra.mxu0 %v11342_v31  ;;  %v3985_v49 = vsub.f32 %v11350_v39, %v13520_v21 }
 0x490   : > { %13913 = vst [vmem:[#allocation89_spill] sm:$0xff] %v11370_v9  ;;  %7970 = vmatprep.subr.mxu0 %v11352_v45  ;;  %v13526_v63 = vand.u32 4294901760, %v11370_v9  ;;  %v11390_v45 = vsub.f32 %v3646_v51, %v11372_v47  ;;  %13918 = vst [vmem:[#allocation93_spill] sm:$0xff] %v11398_v27  ;;  %8001 = vmatprep.subr.mxu1 %v3979_v30  ;;  %v13529_v38 = vand.u32 4294901760, %v11398_v27  ;;  %v3881_v30 = vand.u32 4294901760, %v3880_v29 }
 0x491   : > { %7971 = vmatpush3.msra.mxu0 %v11362_v50  ;;  %v3986_v21 = vand.u32 4294901760, %v3985_v49  ;;  %8002 = vmatpush3.msra.mxu1 %v3867_v48 }
 0x492   : > { %13917 = vst [vmem:[#allocation92_spill] sm:$0xff] %v11390_v45  ;;  %7972 = vmatprep.subr.mxu0 %v11372_v47  ;;  %v3992_v51 = vsub.f32 %v11370_v9, %v13526_v63  ;;  %v13527_v39 = vand.u32 4294901760, %v11390_v45  ;;  %v3887_v63 = vsub.f32 %v11398_v27, %v13529_v38 }
 0x493   : > { %7973 = vmatpush3.msra.mxu0 %v11382_v19  ;;  %8003 = vmatprep.subr.mxu1 %v3986_v21  ;;  %v427_v21 = vld [vmem:[%s13272_s3] sm:$0xf] }
 0x494   : > { %8012 = vmatprep.subr.mxu0 %v11013_v36  ;;  %v3993_v15 = vand.u32 4294901760, %v3992_v51  ;;  %v3999_v49 = vsub.f32 %v11390_v45, %v13527_v39  ;;  %8004 = vmatpush3.msra.mxu1 %v3874_v41  ;;  %v3888_v3 = vand.u32 4294901760, %v3887_v63  ;;  %v13919_v51 = vld [vmem:[#allocation33_spill] sm:$0xff]  ;;  %v13920_v41 = vld [vmem:[#allocation67_spill] sm:$0xff] }
 0x495   : > { %v13547_v39 = vsub.s32 2, %v13919_v51  ;;  %v2750_v29 = vrot.slane %v427_v21, %v13920_v41 }
 0x496   : > { %8005 = vmatprep.subr.mxu1 %v3993_v15  ;;  %v4000_v48 = vand.u32 4294901760, %v3999_v49 }
 0x497   : > { %8006 = vmatpush3.msra.mxu1 %v3881_v30  ;;  %v2754_v28 = vrot.slane %v427_v21, %v13547_v39  ;;  %v2760_v15 = vrot.slane %v2750_v29, %v13920_v41 }
 0x498   : > { %8007 = vmatprep.subr.mxu1 %v4000_v48 }
 0x499   : > { %8008 = vmatpush3.msra.mxu1 %v3888_v3  ;;  %v2764_v63 = vrot.slane %v2754_v28, %v13920_v41 }
 0x49a   : > { %8047 = vmatprep.subr.mxu1 %v11002_v1 }
 0x4ea   : > { %v3100_v49 = vpop.f32.mrf.mxu1 }
 0x4ec   : > { %v3102_v27 = vpop.f32.mrf.mxu1 }
 0x4f2   : > { %v2868_v38 = vpop.f32.mrf.mxu0 }
 0x4f3   : > { %v2869_v48 = vadd.f32 %v2868_v38, %v2760_v15 }
 0x4f4   : > { %v2870_v30 = vpop.f32.mrf.mxu0 }
 0x4f5   : > { %v2871_v36 = vadd.f32 %v2870_v30, %v2764_v63  ;;  %v3101_v45 = vadd.f32 %v3100_v49, %v2869_v48 }
 0x4f7   : > { %v3103_v19 = vadd.f32 %v3102_v27, %v2871_v36 }
 0x50a   : > { %v3343_v13 = vpop.f32.mrf.mxu1 }
 0x50c   : > { %v3345_v50 = vpop.f32.mrf.mxu1 }
 0x513   : > { %v3237_v3 = vpop.f32.mrf.mxu0 }
 0x514   : > { %v3238_v1 = vadd.f32 %v3237_v3, %v3101_v45 }
 0x515   : > { %v3239_v9 = vpop.f32.mrf.mxu0 }
 0x516   : > { %v3240_v47 = vadd.f32 %v3239_v9, %v3103_v19  ;;  %v3344_v51 = vadd.f32 %v3343_v13, %v3238_v1 }
 0x518   : > { %v3346_v29 = vadd.f32 %v3345_v50, %v3240_v47 }
 0x52c   : > { %v3615_v21 = vpop.f32.mrf.mxu1 }
 0x52e   : > { %v3617_v40 = vpop.f32.mrf.mxu1 }
 0x534   : > { %v3511_v39 = vpop.f32.mrf.mxu0 }
 0x535   : > { %v3512_v31 = vadd.f32 %v3511_v39, %v3344_v51 }
 0x536   : > { %v3513_v8 = vpop.f32.mrf.mxu0 }
 0x537   : > { %v3616_v28 = vadd.f32 %v3615_v21, %v3512_v31  ;;  %v3514_v41 = vadd.f32 %v3513_v8, %v3346_v29  ;;  %v13921_v21 = vld [vmem:[#allocation78_spill] sm:$0xff]  ;;  %v13922_v29 = vld [vmem:[#allocation79_spill] sm:$0xff] }
 0x539   : > { %v3622_v38 = vmul.f32 0.70710677, %v3616_v28  ;;  %v3618_v15 = vadd.f32 %v3617_v40, %v3514_v41  ;;  %v3620_v30 = vmul.f32 0.5, %v3616_v28  ;;  %v13923_v28 = vld [vmem:[#allocation87_spill] sm:$0xff]  ;;  %v13924_v41 = vld [vmem:[#allocation72_spill] sm:$0xff] }
 0x53b   : > { %9497 = verf.f32 %v3622_v38  ;;  %v3623_v63 = vmul.f32 0.70710677, %v3618_v15  ;;  %v3621_v19 = vmul.f32 0.5, %v3618_v15  ;;  %v13925_v38 = vld [vmem:[#allocation69_spill] sm:$0xff] }
 0x53c   : > { %v13926_v15 = vld [vmem:[#allocation73_spill] sm:$0xff] }
 0x53d   : > { %9499 = verf.f32 %v3623_v63  ;;  %v13927_v63 = vld [vmem:[#allocation82_spill] sm:$0xff] }
 0x548   : > { %v9498_v49 = vpop.eup %9497 }
 0x549   : > { %v3626_v45 = vadd.f32 1.0, %v9498_v49  ;;  %v13928_v49 = vld [vmem:[#allocation74_spill] sm:$0xff] }
 0x54a   : > { %v9500_v36 = vpop.eup %9499 }
 0x54b   : > { %v3628_v9 = vmul.f32 %v3626_v45, %v3620_v30  ;;  %v3627_v1 = vadd.f32 1.0, %v9500_v36  ;;  %v13929_v30 = vld [vmem:[#allocation84_spill] sm:$0xff]  ;;  %v13930_v45 = vld [vmem:[#allocation75_spill] sm:$0xff] }
 0x54c   : > { %v13931_v36 = vld [vmem:[#allocation88_spill] sm:$0xff] }
 0x54d   : > { %v3629_v13 = vmul.f32 %v3627_v1, %v3621_v19  ;;  %v11426_v27 = vand.u32 4294901760, %v3628_v9  ;;  %v13933_v19 = vld [vmem:[#allocation70_spill] sm:$0xff]  ;;  %v13934_v1 = vld [vmem:[#allocation85_spill] sm:$0xff] }
 0x54f   : > { %v11428_v39 = vand.u32 4294901760, %v3629_v13  ;;  %v11431_v8 = vsub.f32 %v3628_v9, %v11426_v27  ;;  %v13932_v9 = vld [vmem:[#allocation76_spill] sm:$0xff] }
 0x551   : > { %4003 = vmatprep.mubr.f32.mxu1 %v11428_v39  ;;  %v3763_v40 = vsub.f32 %v3629_v13, %v11428_v39  ;;  %v3770_v31 = vand.u32 4294901760, %v11431_v8  ;;  %v13935_v13 = vld [vmem:[#allocation91_spill] sm:$0xff] }
 0x552   : > { %4005 = vmatmul.mubr.f32.vlgmr.msra.gmra.mxu1 %v11426_v27 }
 0x553   : > { %8048 = vmatpush3.msra.mxu1 %v11007_v42  ;;  %v3764_v50 = vand.u32 4294901760, %v3763_v40  ;;  %v3771_v47 = vsub.f32 %v11431_v8, %v3770_v31 }
 0x554   : > { %8049 = vmatprep.subr.mxu1 %v11015_v6 }
 0x555   : > { %8050 = vmatpush3.msra.mxu1 %v11024_v4  ;;  %4247 = vmatprep.mubr.f32.mxu1 %v3764_v50  ;;  %v3765_v51 = vsub.f32 %v3763_v40, %v3764_v50  ;;  %v3772_v3 = vand.u32 4294901760, %v3771_v47  ;;  %v13937_v50 = vld [vmem:[#allocation77_spill] sm:$0xff] }
 0x556   : > { %8051 = vmatprep.subr.mxu1 %v11034_v60  ;;  %v13938_v47 = vld [vmem:[#allocation81_spill] sm:$0xff] }
 0x557   : > { %8052 = vmatpush3.msra.mxu1 %v11044_v25  ;;  %v3766_v48 = vand.u32 4294901760, %v3765_v51  ;;  %v13939_v51 = vld [vmem:[#allocation83_spill] sm:$0xff] }
 0x558   : > { %8053 = vmatprep.subr.mxu1 %v11057_v44 }
 0x559   : > { %8054 = vmatpush3.msra.mxu1 %v11070_v10  ;;  %3767 = vmatprep.mubr.f32.mxu0 %v3766_v48  ;;  %v13940_v48 = vld [vmem:[#allocation86_spill] sm:$0xff] }
 0x55a   : > { %8055 = vmatprep.subr.mxu1 %v11102_v55  ;;  %3773 = vmatmul.mubr.f32.vlgmr.msra.gmra.mxu0 %v3772_v3  ;;  %v13941_v3 = vld [vmem:[#allocation89_spill] sm:$0xff] }
 0x55b   : > { %8013 = vmatpush3.msra.mxu0 %v11022_v17  ;;  %8056 = vmatpush3.msra.mxu1 %v11111_v0 }
 0x55c   : > { %8014 = vmatprep.subr.mxu0 %v11032_v12  ;;  %4140 = vmatprep.mubr.f32.mxu0 %v3763_v40  ;;  %v13936_v40 = vld [vmem:[#allocation80_spill] sm:$0xff] }
 0x55d   : > { %8057 = vmatprep.subr.mxu1 %v11122_v37  ;;  %8015 = vmatpush3.msra.mxu0 %v11042_v7 }
 0x55e   : > { %8058 = vmatpush3.msra.mxu1 %v11134_v16  ;;  %8016 = vmatprep.subr.mxu0 %v11055_v62 }
 0x55f   : > { %8059 = vmatprep.subr.mxu1 %v11144_v35  ;;  %8017 = vmatpush3.msra.mxu0 %v11068_v20 }
 0x560   : > { %8060 = vmatpush3.msra.mxu1 %v11154_v5  ;;  %8018 = vmatprep.subr.mxu0 %v11081_v24 }
 0x561   : > { %8061 = vmatprep.subr.mxu1 %v11164_v34  ;;  %8019 = vmatpush3.msra.mxu0 %v11092_v57 }
 0x562   : > { %8062 = vmatpush3.msra.mxu1 %v11174_v2  ;;  %8020 = vmatprep.subr.mxu0 %v11120_v22 }
 0x563   : > { %8063 = vmatprep.subr.mxu1 %v11206_v46  ;;  %8021 = vmatpush3.msra.mxu0 %v11132_v54 }
 0x564   : > { %8064 = vmatpush3.msra.mxu1 %v11215_v11  ;;  %8022 = vmatprep.subr.mxu0 %v11142_v26 }
 0x565   : > { %8065 = vmatprep.subr.mxu1 %v11226_v59  ;;  %8023 = vmatpush3.msra.mxu0 %v11152_v18 }
 0x566   : > { %8066 = vmatpush3.msra.mxu1 %v11238_v23  ;;  %8024 = vmatprep.subr.mxu0 %v11162_v52 }
 0x567   : > { %8067 = vmatprep.subr.mxu1 %v11248_v14  ;;  %8025 = vmatpush3.msra.mxu0 %v11172_v33 }
 0x568   : > { %8068 = vmatpush3.msra.mxu1 %v11258_v53  ;;  %8026 = vmatprep.subr.mxu0 %v11185_v61 }
 0x569   : > { %8069 = vmatprep.subr.mxu1 %v11268_v43  ;;  %8027 = vmatpush3.msra.mxu0 %v11196_v58 }
 0x56a   : > { %8070 = vmatpush3.msra.mxu1 %v11278_v32  ;;  %8028 = vmatprep.subr.mxu0 %v11224_v56 }
 0x56b   : > { %8071 = vmatprep.subr.mxu1 %v13921_v21  ;;  %8029 = vmatpush3.msra.mxu0 %v13922_v29 }
 0x56c   : > { %8072 = vmatpush3.msra.mxu1 %v13923_v28  ;;  %8030 = vmatprep.subr.mxu0 %v13924_v41 }
 0x56d   : > { %8073 = vmatprep.subr.mxu1 %v13925_v38  ;;  %8031 = vmatpush3.msra.mxu0 %v13926_v15 }
 0x56e   : > { %8074 = vmatpush3.msra.mxu1 %v13927_v63  ;;  %8032 = vmatprep.subr.mxu0 %v13928_v49 }
 0x56f   : > { %8075 = vmatprep.subr.mxu1 %v13929_v30  ;;  %8033 = vmatpush3.msra.mxu0 %v13930_v45 }
 0x570   : > { %8076 = vmatpush3.msra.mxu1 %v13931_v36  ;;  %8034 = vmatprep.subr.mxu0 %v13932_v9 }
 0x571   : > { %8077 = vmatprep.subr.mxu1 %v13933_v19  ;;  %8035 = vmatpush3.msra.mxu0 %v13934_v1 }
 0x572   : > { %8078 = vmatpush3.msra.mxu1 %v13935_v13  ;;  %8036 = vmatprep.subr.mxu0 %v13936_v40 }
 0x573   : > { %4251 = vmatmul.mubr.f32.vlgmr.msra.gmra.mxu1 %v3770_v31  ;;  %8117 = vmatprep.subr.mxu1 %v13937_v50  ;;  %v13942_v31 = vld [vmem:[#allocation90_spill] sm:$0xff]  ;;  %v13943_v50 = vld [vmem:[#allocation92_spill] sm:$0xff] }
 0x574   : > { %8037 = vmatpush3.msra.mxu0 %v13938_v47  ;;  %8118 = vmatpush3.msra.mxu1 %v11007_v42  ;;  %v13944_v42 = vld [vmem:[#allocation93_spill] sm:$0xff] }
 0x575   : > { %4521 = vmatprep.mubr.f32.mxu1 %v11428_v39  ;;  %8038 = vmatprep.subr.mxu0 %v13939_v51 }
 0x576   : > { %8119 = vmatprep.subr.mxu1 %v11015_v6  ;;  %8039 = vmatpush3.msra.mxu0 %v13940_v48  ;;  %v13945_v6 = vld [vmem:[#allocation71_spill] sm:$0xff] }
 0x577   : > { %8120 = vmatpush3.msra.mxu1 %v11024_v4  ;;  %8040 = vmatprep.subr.mxu0 %v13941_v3  ;;  %v13946_v4 = vand.u32 4294901760, %v13945_v6  ;;  %v14009_v6 = vld [vmem:[#allocation45_spill] sm:$0xff] }
 0x578   : > { %8121 = vmatprep.subr.mxu1 %v11034_v60  ;;  %8041 = vmatpush3.msra.mxu0 %v13942_v31  ;;  %v13947_v60 = vand.u32 4294901760, %v11022_v17  ;;  %v13951_v17 = vand.u32 4294901760, %v11068_v20  ;;  %v13955_v20 = vand.u32 4294901760, %v11132_v54  ;;  %v13962_v54 = vand.u32 4294901760, %v11224_v56  ;;  %v13978_v56 = vld [vmem:[#allocation25_spill] sm:$0xff] }
 0x579   : > { %8122 = vmatpush3.msra.mxu1 %v11044_v25  ;;  %8042 = vmatprep.subr.mxu0 %v13943_v50  ;;  %v13948_v25 = vand.u32 4294901760, %v11032_v12  ;;  %v13952_v12 = vand.u32 4294901760, %v11081_v24  ;;  %v13956_v24 = vand.u32 4294901760, %v11142_v26  ;;  %v13964_v26 = vand.u32 4294901760, %v13924_v41  ;;  %v13989_v41 = vld [vmem:[#allocation5_spill] sm:$0xff] }
 0x57a   : > { %8123 = vmatprep.subr.mxu1 %v11057_v44  ;;  %8043 = vmatpush3.msra.mxu0 %v13944_v42  ;;  %v13949_v44 = vand.u32 4294901760, %v11042_v7  ;;  %v13953_v7 = vand.u32 4294901760, %v11092_v57  ;;  %v13957_v57 = vand.u32 4294901760, %v11152_v18  ;;  %v13966_v18 = vand.u32 4294901760, %v13928_v49  ;;  %v13993_v49 = vld [vmem:[#allocation7_spill] sm:$0xff] }
 0x57b   : > { %8124 = vmatpush3.msra.mxu1 %v11070_v10  ;;  %4143 = vmatmul.mubr.f32.vlgmr.msra.gmra.mxu0 %v11431_v8  ;;  %v13950_v10 = vand.u32 4294901760, %v11055_v62  ;;  %v13954_v62 = vand.u32 4294901760, %v11120_v22  ;;  %v13960_v22 = vand.u32 4294901760, %v11185_v61  ;;  %v13973_v61 = vmov 0.0   ;;  %v13984_v8 = vld [vmem:[#allocation37_spill] sm:$0xff] }
 0x57c   : > { %8082 = vmatprep.subr.mxu0 %v13946_v4  ;;  %8125 = vmatprep.subr.mxu1 %v11102_v55  ;;  %v13958_v55 = vand.u32 4294901760, %v11162_v52  ;;  %v13969_v52 = vand.u32 4294901760, %v13934_v1  ;;  %v13999_v1 = vld [vmem:[#allocation19_spill] sm:$0xff]  ;;  %v14010_v4 = vld [vmem:[#allocation49_spill] sm:$0xff] }
 0x57d   : > { %8083 = vmatpush3.msra.mxu0 %v13947_v60  ;;  %4417 = vmatprep.mubr.f32.mxu0 %v11428_v39  ;;  %v13983_v39 = vld [vmem:[#allocation2_spill] sm:$0xff] }
 0x57e   : > { %8126 = vmatpush3.msra.mxu1 %v11111_v0  ;;  %8084 = vmatprep.subr.mxu0 %v13948_v25  ;;  %v13959_v0 = vand.u32 4294901760, %v11172_v33  ;;  %v13971_v33 = vand.u32 4294901760, %v13938_v47  ;;  %v14002_v47 = vld [vmem:[#allocation64_spill] sm:$0xff]  ;;  %v14011_v25 = vld [vmem:[#allocation33_spill] sm:$0xff] }
 0x57f   : > { %8127 = vmatprep.subr.mxu1 %v11122_v37  ;;  %8085 = vmatpush3.msra.mxu0 %v13949_v44  ;;  %v13961_v37 = vand.u32 4294901760, %v11196_v58  ;;  %v13974_v58 = vand.u32 4294901760, %v13940_v48  ;;  %v14004_v48 = vld [vmem:[#allocation65_spill] sm:$0xff]  ;;  %v3664_v44 = vsub.s32 4, %v14011_v25  ;;  %v14041_v25 = vld [vmem:[#allocation54_spill] sm:$0xff] }
 0x580   : > { %8128 = vmatpush3.msra.mxu1 %v11134_v16  ;;  %8086 = vmatprep.subr.mxu0 %v13950_v10  ;;  %v13963_v16 = vand.u32 4294901760, %v13922_v29  ;;  %v13986_v29 = vld [vmem:[#allocation42_spill] sm:$0xff] }
 0x581   : > { %8129 = vmatprep.subr.mxu1 %v11144_v35  ;;  %8087 = vmatpush3.msra.mxu0 %v13951_v17  ;;  %v13965_v35 = vand.u32 4294901760, %v13926_v15  ;;  %v13991_v15 = vld [vmem:[#allocation6_spill] sm:$0xff] }
 0x582   : > { %8130 = vmatpush3.msra.mxu1 %v11154_v5  ;;  %8088 = vmatprep.subr.mxu0 %v13952_v12  ;;  %v13967_v5 = vand.u32 4294901760, %v13930_v45  ;;  %v13995_v45 = vld [vmem:[#allocation10_spill] sm:$0xff] }
 0x583   : > { %8131 = vmatprep.subr.mxu1 %v11164_v34  ;;  %8089 = vmatpush3.msra.mxu0 %v13953_v7  ;;  %v13970_v34 = vand.u32 4294901760, %v13936_v40  ;;  %v14001_v40 = vld [vmem:[#allocation23_spill] sm:$0xff]  ;;  %v9507_v7 = vld [vmem:[%s13271_s2] sm:$0x3f] }
 0x584   : > { %8132 = vmatpush3.msra.mxu1 %v11174_v2  ;;  %8090 = vmatprep.subr.mxu0 %v13954_v62  ;;  %v13972_v2 = vand.u32 4294901760, %v13939_v51  ;;  %v14003_v51 = vld [vmem:[#allocation29_spill] sm:$0xff]  ;;  %v3665_v62 = vrot.slane %v9507_v7, %v3664_v44 }
 0x585   : > { %8133 = vmatprep.subr.mxu1 %v11206_v46  ;;  %8091 = vmatpush3.msra.mxu0 %v13955_v20  ;;  %v13976_v46 = vand.u32 4294901760, %v13941_v3  ;;  %v14005_v3 = vld [vmem:[#allocation32_spill] sm:$0xff]  ;;  %v14014_v7 = vld [vmem:[#allocation9_spill] sm:$0xff] }
 0x586   : > { %8134 = vmatpush3.msra.mxu1 %v11215_v11  ;;  %8092 = vmatprep.subr.mxu0 %v13956_v24  ;;  %v13977_v11 = vand.u32 4294901760, %v13942_v31  ;;  %v14006_v31 = vld [vmem:[#allocation66_spill] sm:$0xff] }
 0x587   : > { %8135 = vmatprep.subr.mxu1 %v11226_v59  ;;  %8093 = vmatpush3.msra.mxu0 %v13957_v57  ;;  %v13979_v59 = vand.u32 4294901760, %v13943_v50  ;;  %v14007_v50 = vld [vmem:[#allocation39_spill] sm:$0xff] }
 0x588   : > { %8136 = vmatpush3.msra.mxu1 %v11238_v23  ;;  %8094 = vmatprep.subr.mxu0 %v13958_v55  ;;  %v13975_v23 = vld [vmem:[#allocation24_spill] sm:$0xff] }
 0x589   : > { %8137 = vmatprep.subr.mxu1 %v11248_v14  ;;  %8095 = vmatpush3.msra.mxu0 %v13959_v0  ;;  %v13968_v14 = vand.u32 4294901760, %v13932_v9  ;;  %v13997_v9 = vld [vmem:[#allocation17_spill] sm:$0xff] }
 0x58a   : > { %8138 = vmatpush3.msra.mxu1 %v11258_v53  ;;  %8096 = vmatprep.subr.mxu0 %v13960_v22  ;;  %v13981_v53 = vld [vmem:[#allocation28_spill] sm:$0xff] }
 0x58b   : > { %8139 = vmatprep.subr.mxu1 %v11268_v43  ;;  %8097 = vmatpush3.msra.mxu0 %v13961_v37  ;;  %v13982_v43 = vld [vmem:[#allocation34_spill] sm:$0xff] }
 0x58c   : > { %8140 = vmatpush3.msra.mxu1 %v11278_v32  ;;  %8098 = vmatprep.subr.mxu0 %v13962_v54  ;;  %v13980_v32 = vand.u32 4294901760, %v13944_v42  ;;  %v14008_v42 = vld [vmem:[#allocation41_spill] sm:$0xff] }
 0x58d   : > { %8141 = vmatprep.subr.mxu1 %v13921_v21  ;;  %8099 = vmatpush3.msra.mxu0 %v13963_v16  ;;  %v13985_v21 = vld [vmem:[#allocation3_spill] sm:$0xff] }
 0x58e   : > { %8142 = vmatpush3.msra.mxu1 %v13923_v28  ;;  %8100 = vmatprep.subr.mxu0 %v13964_v26  ;;  %v13988_v28 = vld [vmem:[#allocation46_spill] sm:$0xff] }
 0x58f   : > { %8143 = vmatprep.subr.mxu1 %v13925_v38  ;;  %8101 = vmatpush3.msra.mxu0 %v13965_v35  ;;  %v13990_v38 = vld [vmem:[#allocation50_spill] sm:$0xff] }
 0x590   : > { %8144 = vmatpush3.msra.mxu1 %v13927_v63  ;;  %8102 = vmatprep.subr.mxu0 %v13966_v18  ;;  %v13992_v63 = vld [vmem:[#allocation53_spill] sm:$0xff] }
 0x591   : > { %8145 = vmatprep.subr.mxu1 %v13929_v30  ;;  %8103 = vmatpush3.msra.mxu0 %v13967_v5  ;;  %v13994_v30 = vld [vmem:[#allocation56_spill] sm:$0xff] }
 0x592   : > { %8146 = vmatpush3.msra.mxu1 %v13931_v36  ;;  %8104 = vmatprep.subr.mxu0 %v13968_v14  ;;  %v13996_v36 = vld [vmem:[#allocation59_spill] sm:$0xff] }
 0x593   : > { %8147 = vmatprep.subr.mxu1 %v13933_v19  ;;  %8105 = vmatpush3.msra.mxu0 %v13969_v52  ;;  %v13998_v19 = vld [vmem:[#allocation61_spill] sm:$0xff] }
 0x594   : > { %8148 = vmatpush3.msra.mxu1 %v13935_v13  ;;  %8106 = vmatprep.subr.mxu0 %v13970_v34  ;;  %v14000_v13 = vld [vmem:[#allocation63_spill] sm:$0xff] }
 0x595   : > { %4523 = vmatmul.mubr.f32.vlgmr.msra.gmra.mxu1 %v11426_v27  ;;  %8107 = vmatpush3.msra.mxu0 %v13971_v33 }
 0x596   : > { %8108 = vmatprep.subr.mxu0 %v13972_v2  ;;  %9093 = vmatprep.subr.mxu1 %v13973_v61 }
 0x597   : > { %8109 = vmatpush3.msra.mxu0 %v13974_v58  ;;  %9094 = vmatpush3.msra.mxu1 %v13975_v23 }
 0x598   : > { %8110 = vmatprep.subr.mxu0 %v13976_v46  ;;  %9095 = vmatprep.subr.mxu1 %v13973_v61 }
 0x599   : > { %8111 = vmatpush3.msra.mxu0 %v13977_v11  ;;  %9096 = vmatpush3.msra.mxu1 %v13978_v56  ;;  %v9508_v11 = vld [vmem:[%s9734_s17] sm:$0xff] }
 0x59a   : > { %8112 = vmatprep.subr.mxu0 %v13979_v59  ;;  %9097 = vmatprep.subr.mxu1 %v13973_v61 }
 0x59b   : > { %8113 = vmatpush3.msra.mxu0 %v13980_v32  ;;  %9098 = vmatpush3.msra.mxu1 %v13981_v53 }
 0x59c   : > { %4419 = vmatmul.mubr.f32.vlgmr.msra.gmra.mxu0 %v11426_v27  ;;  %9099 = vmatprep.subr.mxu1 %v13973_v61  ;;  %v13987_v27 = vld [vmem:[#allocation4_spill] sm:$0xff] }
 0x59d   : > { %9100 = vmatpush3.msra.mxu1 %v13982_v43  ;;  %9058 = vmatprep.subr.mxu0 %v13973_v61 }
 0x59e   : > { %9101 = vmatprep.subr.mxu1 %v13973_v61  ;;  %9059 = vmatpush3.msra.mxu0 %v13983_v39 }
 0x59f   : > { %9102 = vmatpush3.msra.mxu1 %v13984_v8  ;;  %9060 = vmatprep.subr.mxu0 %v13973_v61 }
 0x5a0   : > { %9103 = vmatprep.subr.mxu1 %v13973_v61  ;;  %9061 = vmatpush3.msra.mxu0 %v13985_v21 }
 0x5a1   : > { %9104 = vmatpush3.msra.mxu1 %v13986_v29  ;;  %9062 = vmatprep.subr.mxu0 %v13973_v61 }
 0x5a2   : > { %9105 = vmatprep.subr.mxu1 %v13973_v61  ;;  %9063 = vmatpush3.msra.mxu0 %v13987_v27 }
 0x5a3   : > { %9106 = vmatpush3.msra.mxu1 %v13988_v28  ;;  %9064 = vmatprep.subr.mxu0 %v13973_v61 }
 0x5a4   : > { %9107 = vmatprep.subr.mxu1 %v13973_v61  ;;  %9065 = vmatpush3.msra.mxu0 %v13989_v41 }
 0x5a5   : > { %9108 = vmatpush3.msra.mxu1 %v13990_v38  ;;  %9066 = vmatprep.subr.mxu0 %v13973_v61 }
 0x5a6   : > { %9109 = vmatprep.subr.mxu1 %v13973_v61  ;;  %9067 = vmatpush3.msra.mxu0 %v13991_v15 }
 0x5a7   : > { %9110 = vmatpush3.msra.mxu1 %v13992_v63  ;;  %9068 = vmatprep.subr.mxu0 %v13973_v61 }
 0x5a8   : > { %9111 = vmatprep.subr.mxu1 %v13973_v61  ;;  %9069 = vmatpush3.msra.mxu0 %v13993_v49 }
 0x5a9   : > { %9112 = vmatpush3.msra.mxu1 %v13994_v30  ;;  %9070 = vmatprep.subr.mxu0 %v13973_v61 }
 0x5aa   : > { %9113 = vmatprep.subr.mxu1 %v13973_v61  ;;  %9071 = vmatpush3.msra.mxu0 %v13995_v45 }
 0x5ab   : > { %9114 = vmatpush3.msra.mxu1 %v13996_v36  ;;  %9072 = vmatprep.subr.mxu0 %v13973_v61 }
 0x5ac   : > { %9115 = vmatprep.subr.mxu1 %v13973_v61  ;;  %9073 = vmatpush3.msra.mxu0 %v13997_v9 }
 0x5ad   : > { %9116 = vmatpush3.msra.mxu1 %v13998_v19  ;;  %9074 = vmatprep.subr.mxu0 %v13973_v61 }
 0x5ae   : > { %9117 = vmatprep.subr.mxu1 %v13973_v61  ;;  %9075 = vmatpush3.msra.mxu0 %v13999_v1 }
 0x5af   : > { %9118 = vmatpush3.msra.mxu1 %v14000_v13  ;;  %9076 = vmatprep.subr.mxu0 %v13973_v61 }
 0x5b0   : > { %9119 = vmatprep.subr.mxu1 %v13973_v61  ;;  %9077 = vmatpush3.msra.mxu0 %v14001_v40 }
 0x5b1   : > { %9120 = vmatpush3.msra.mxu1 %v14002_v47  ;;  %9078 = vmatprep.subr.mxu0 %v13973_v61 }
 0x5b2   : > { %9121 = vmatprep.subr.mxu1 %v13973_v61  ;;  %9079 = vmatpush3.msra.mxu0 %v14003_v51 }
 0x5b3   : > { %9122 = vmatpush3.msra.mxu1 %v14004_v48  ;;  %9080 = vmatprep.subr.mxu0 %v13973_v61 }
 0x5b4   : > { %9123 = vmatprep.subr.mxu1 %v13973_v61  ;;  %9081 = vmatpush3.msra.mxu0 %v14005_v3 }
 0x5b5   : > { %9124 = vmatpush3.msra.mxu1 %v14006_v31  ;;  %9082 = vmatprep.subr.mxu0 %v13973_v61 }
 0x5b6   : > { %9125 = vmatprep.mubr.msk.f32.mxu1 %vm9521_vm0, %v13973_v61  ;;  %9163 = vmatprep.subr.mxu1 %v13973_v61 }
 0x5b7   : > { %9083 = vmatpush3.msra.mxu0 %v14007_v50  ;;  %9090 = vmatprep.mubr.msk.f32.mxu0 %vm9521_vm0, %v13973_v61 }
 0x5b8   : > { %9084 = vmatprep.subr.mxu0 %v13973_v61 }
 0x5b9   : > { %9085 = vmatpush3.msra.mxu0 %v14008_v42 }
 0x5ba   : > { %9086 = vmatprep.subr.mxu0 %v13973_v61 }
 0x5bb   : > { %9087 = vmatpush3.msra.mxu0 %v14009_v6 }
 0x5bc   : > { %9088 = vmatprep.subr.mxu0 %v13973_v61 }
 0x5bd   : > { %9089 = vmatpush3.msra.mxu0 %v14010_v4 }
 0x5be   : > { %9128 = vmatprep.subr.mxu0 %v13973_v61 }
 0x612   : > { %v8009_v10 = vpop.f32.mrf.mxu1 }
 0x614   : > { %v8010_v24 = vpop.f32.mrf.mxu1 }
 0x615   : > { %v8011_v22 = vadd.f32 %v8010_v24, %v8009_v10  ;;  %v14017_v24 = vld [vmem:[#allocation13_spill] sm:$0xff] }
 0x61a   : > { %v7974_v60 = vpop.f32.mrf.mxu0 }
 0x61c   : > { %v7975_v17 = vpop.f32.mrf.mxu0 }
 0x61d   : > { %v7976_v20 = vadd.f32 %v7975_v17, %v7974_v60 }
 0x61f   : > { %v3775_v0 = vadd.f32 %v7976_v20, %v3665_v62  ;;  %v14015_v62 = vld [vmem:[#allocation11_spill] sm:$0xff]  ;;  %v14016_v20 = vld [vmem:[#allocation12_spill] sm:$0xff] }
 0x621   : > { %v4007_v16 = vadd.f32 %v8011_v22, %v3775_v0  ;;  %v14020_v0 = vld [vmem:[#allocation27_spill] sm:$0xff] }
 0x622   : > { %v14021_v22 = vld [vmem:[#allocation31_spill] sm:$0xff] }
 0x633   : > { %v8079_v57 = vpop.f32.mrf.mxu1 }
 0x635   : > { %v8080_v54 = vpop.f32.mrf.mxu1 }
 0x636   : > { %v8081_v5 = vadd.f32 %v8080_v54, %v8079_v57  ;;  %v14018_v57 = vld [vmem:[#allocation21_spill] sm:$0xff]  ;;  %v14023_v54 = vld [vmem:[#allocation40_spill] sm:$0xff] }
 0x63b   : > { %v8044_v12 = vpop.f32.mrf.mxu0 }
 0x63d   : > { %v8045_v55 = vpop.f32.mrf.mxu0 }
 0x63e   : > { %v8046_v37 = vadd.f32 %v8045_v55, %v8044_v12  ;;  %v14013_v12 = vld [vmem:[#allocation8_spill] sm:$0xff]  ;;  %v14019_v55 = vld [vmem:[#allocation22_spill] sm:$0xff] }
 0x640   : > { %v4145_v35 = vadd.f32 %v8046_v37, %v4007_v16  ;;  %v14022_v37 = vld [vmem:[#allocation36_spill] sm:$0xff] }
 0x641   : > { %v14024_v16 = vld [vmem:[#allocation44_spill] sm:$0xff] }
 0x642   : > { %v4253_v34 = vadd.f32 %v8081_v5, %v4145_v35  ;;  %v14026_v35 = vld [vmem:[#allocation52_spill] sm:$0xff]  ;;  %v14028_v5 = vld [vmem:[#allocation58_spill] sm:$0xff] }
 0x655   : > { %v8149_v26 = vpop.f32.mrf.mxu1 }
 0x657   : > { %v8150_v14 = vpop.f32.mrf.mxu1 }
 0x658   : > { %v8151_v2 = vadd.f32 %v8150_v14, %v8149_v26  ;;  %v14025_v26 = vld [vmem:[#allocation48_spill] sm:$0xff]  ;;  %v14029_v14 = vld [vmem:[#allocation14_spill] sm:$0xff] }
 0x65c   : > { %v8114_v18 = vpop.f32.mrf.mxu0 }
 0x65e   : > { %v8115_v52 = vpop.f32.mrf.mxu0 }
 0x65f   : > { %v8116_v33 = vadd.f32 %v8115_v52, %v8114_v18  ;;  %v14027_v18 = vld [vmem:[#allocation55_spill] sm:$0xff] }
 0x660   : > { %v14030_v52 = vld [vmem:[#allocation15_spill] sm:$0xff] }
 0x661   : > { %v4421_v58 = vadd.f32 %v8116_v33, %v4253_v34  ;;  %v14031_v34 = vld [vmem:[#allocation16_spill] sm:$0xff]  ;;  %v14032_v33 = vld [vmem:[#allocation18_spill] sm:$0xff] }
 0x663   : > { %v4525_v46 = vadd.f32 %v8151_v2, %v4421_v58  ;;  %v14033_v2 = vld [vmem:[#allocation20_spill] sm:$0xff]  ;;  %v14034_v58 = vld [vmem:[#allocation26_spill] sm:$0xff] }
 0x665   : > { %v11680_v59 = vadd.f32 %v9508_v11, %v4525_v46  ;;  %v14035_v46 = vld [vmem:[#allocation30_spill] sm:$0xff]  ;;  %v14036_v11 = vld [vmem:[#allocation35_spill] sm:$0xff] }
 0x667   : > { %14012 = vst [vmem:[#allocation67_spill] sm:$0xff] %v11680_v59  ;;  %v11683_v32 = vand.u32 4294901760, %v11680_v59 }
 0x669   : > { %9126 = vmatmul.mubr.f32.vlgmr.msra.gmra.mxu1 %v11683_v32  ;;  %v11688_v60 = vsub.f32 %v11680_v59, %v11683_v32 }
 0x66a   : > { %9164 = vmatpush3.msra.mxu1 %v13983_v39  ;;  %9195 = vmatprep.mubr.msk.f32.mxu1 %vm9521_vm0, %v13973_v61 }
 0x66b   : > { %9165 = vmatprep.subr.mxu1 %v13973_v61  ;;  %v4612_v44 = vand.u32 4294901760, %v11688_v60 }
 0x66c   : > { %9166 = vmatpush3.msra.mxu1 %v13985_v21 }
 0x66d   : > { %9167 = vmatprep.subr.mxu1 %v13973_v61  ;;  %v4613_v10 = vsub.f32 %v11688_v60, %v4612_v44 }
 0x66e   : > { %9168 = vmatpush3.msra.mxu1 %v13987_v27 }
 0x66f   : > { %9169 = vmatprep.subr.mxu1 %v13973_v61  ;;  %v4614_v17 = vand.u32 4294901760, %v4613_v10  ;;  %v14039_v10 = vld [vmem:[#allocation47_spill] sm:$0xff] }
 0x670   : > { %9170 = vmatpush3.msra.mxu1 %v13989_v41 }
 0x671   : > { %9171 = vmatprep.subr.mxu1 %v13973_v61  ;;  %9091 = vmatmul.mubr.f32.vlgmr.msra.gmra.mxu0 %v4614_v17  ;;  %v14040_v17 = vld [vmem:[#allocation51_spill] sm:$0xff] }
 0x672   : > { %9129 = vmatpush3.msra.mxu0 %v14013_v12  ;;  %9172 = vmatpush3.msra.mxu1 %v13991_v15 }
 0x673   : > { %9130 = vmatprep.subr.mxu0 %v13973_v61  ;;  %9173 = vmatprep.subr.mxu1 %v13973_v61 }
 0x674   : > { %9131 = vmatpush3.msra.mxu0 %v14014_v7  ;;  %9174 = vmatpush3.msra.mxu1 %v13993_v49 }
 0x675   : > { %9132 = vmatprep.subr.mxu0 %v13973_v61  ;;  %9175 = vmatprep.subr.mxu1 %v13973_v61 }
 0x676   : > { %9133 = vmatpush3.msra.mxu0 %v14015_v62  ;;  %9176 = vmatpush3.msra.mxu1 %v13995_v45 }
 0x677   : > { %9134 = vmatprep.subr.mxu0 %v13973_v61  ;;  %9177 = vmatprep.subr.mxu1 %v13973_v61 }
 0x678   : > { %9135 = vmatpush3.msra.mxu0 %v14016_v20  ;;  %9178 = vmatpush3.msra.mxu1 %v13997_v9 }
 0x679   : > { %9136 = vmatprep.subr.mxu0 %v13973_v61  ;;  %9179 = vmatprep.subr.mxu1 %v13973_v61 }
 0x67a   : > { %9137 = vmatpush3.msra.mxu0 %v14017_v24  ;;  %9180 = vmatpush3.msra.mxu1 %v13999_v1 }
 0x67b   : > { %9138 = vmatprep.subr.mxu0 %v13973_v61  ;;  %9181 = vmatprep.subr.mxu1 %v13973_v61 }
 0x67c   : > { %9139 = vmatpush3.msra.mxu0 %v14018_v57  ;;  %9182 = vmatpush3.msra.mxu1 %v14001_v40 }
 0x67d   : > { %9140 = vmatprep.subr.mxu0 %v13973_v61  ;;  %9183 = vmatprep.subr.mxu1 %v13973_v61 }
 0x67e   : > { %9141 = vmatpush3.msra.mxu0 %v14019_v55  ;;  %9184 = vmatpush3.msra.mxu1 %v14003_v51 }
 0x67f   : > { %9142 = vmatprep.subr.mxu0 %v13973_v61  ;;  %9185 = vmatprep.subr.mxu1 %v13973_v61 }
 0x680   : > { %9143 = vmatpush3.msra.mxu0 %v14020_v0  ;;  %9186 = vmatpush3.msra.mxu1 %v14005_v3 }
 0x681   : > { %9144 = vmatprep.subr.mxu0 %v13973_v61  ;;  %9187 = vmatprep.subr.mxu1 %v13973_v61 }
 0x682   : > { %9145 = vmatpush3.msra.mxu0 %v14021_v22  ;;  %9188 = vmatpush3.msra.mxu1 %v14007_v50 }
 0x683   : > { %9146 = vmatprep.subr.mxu0 %v13973_v61  ;;  %9189 = vmatprep.subr.mxu1 %v13973_v61 }
 0x684   : > { %9147 = vmatpush3.msra.mxu0 %v14022_v37  ;;  %9190 = vmatpush3.msra.mxu1 %v14008_v42 }
 0x685   : > { %9148 = vmatprep.subr.mxu0 %v13973_v61  ;;  %9191 = vmatprep.subr.mxu1 %v13973_v61 }
 0x686   : > { %9149 = vmatpush3.msra.mxu0 %v14023_v54  ;;  %9192 = vmatpush3.msra.mxu1 %v14009_v6 }
 0x687   : > { %9150 = vmatprep.subr.mxu0 %v13973_v61  ;;  %9193 = vmatprep.subr.mxu1 %v13973_v61 }
 0x688   : > { %9151 = vmatpush3.msra.mxu0 %v14024_v16  ;;  %9194 = vmatpush3.msra.mxu1 %v14010_v4 }
 0x689   : > { %9152 = vmatprep.subr.mxu0 %v13973_v61  ;;  %9196 = vmatmul.mubr.f32.vlgmr.msra.gmra.mxu1 %v4612_v44  ;;  %v14038_v44 = vld [vmem:[#allocation43_spill] sm:$0xff] }
 0x68a   : > { %9233 = vmatprep.subr.mxu1 %v13973_v61  ;;  %9153 = vmatpush3.msra.mxu0 %v14025_v26 }
 0x68b   : > { %9234 = vmatpush3.msra.mxu1 %v13983_v39  ;;  %9154 = vmatprep.subr.mxu0 %v13973_v61 }
 0x68c   : > { %9235 = vmatprep.subr.mxu1 %v13973_v61  ;;  %9155 = vmatpush3.msra.mxu0 %v14026_v35 }
 0x68d   : > { %9236 = vmatpush3.msra.mxu1 %v13985_v21  ;;  %9156 = vmatprep.subr.mxu0 %v13973_v61 }
 0x68e   : > { %9237 = vmatprep.subr.mxu1 %v13973_v61  ;;  %9157 = vmatpush3.msra.mxu0 %v14027_v18 }
 0x68f   : > { %9238 = vmatpush3.msra.mxu1 %v13987_v27  ;;  %9158 = vmatprep.subr.mxu0 %v13973_v61 }
 0x690   : > { %9239 = vmatprep.subr.mxu1 %v13973_v61  ;;  %9159 = vmatpush3.msra.mxu0 %v14028_v5 }
 0x691   : > { %9160 = vmatprep.mubr.msk.f32.mxu0 %vm9521_vm0, %v13973_v61  ;;  %9240 = vmatpush3.msra.mxu1 %v13989_v41 }
 0x692   : > { %9161 = vmatmul.mubr.f32.vlgmr.msra.gmra.mxu0 %v11688_v60  ;;  %9198 = vmatprep.subr.mxu0 %v13973_v61  ;;  %v14037_v60 = vld [vmem:[#allocation38_spill] sm:$0xff] }
 0x693   : > { %9241 = vmatprep.subr.mxu1 %v13973_v61  ;;  %9199 = vmatpush3.msra.mxu0 %v14029_v14 }
 0x694   : > { %9242 = vmatpush3.msra.mxu1 %v13991_v15  ;;  %9200 = vmatprep.subr.mxu0 %v13973_v61 }
 0x695   : > { %9243 = vmatprep.subr.mxu1 %v13973_v61  ;;  %9201 = vmatpush3.msra.mxu0 %v14030_v52 }
 0x696   : > { %9244 = vmatpush3.msra.mxu1 %v13993_v49  ;;  %9202 = vmatprep.subr.mxu0 %v13973_v61 }
 0x697   : > { %9245 = vmatprep.subr.mxu1 %v13973_v61  ;;  %9203 = vmatpush3.msra.mxu0 %v14031_v34 }
 0x698   : > { %9246 = vmatpush3.msra.mxu1 %v13995_v45  ;;  %9204 = vmatprep.subr.mxu0 %v13973_v61 }
 0x699   : > { %9247 = vmatprep.subr.mxu1 %v13973_v61  ;;  %9205 = vmatpush3.msra.mxu0 %v14032_v33 }
 0x69a   : > { %9248 = vmatpush3.msra.mxu1 %v13997_v9  ;;  %9206 = vmatprep.subr.mxu0 %v13973_v61 }
 0x69b   : > { %9249 = vmatprep.subr.mxu1 %v13973_v61  ;;  %9207 = vmatpush3.msra.mxu0 %v14033_v2 }
 0x69c   : > { %9250 = vmatpush3.msra.mxu1 %v13999_v1  ;;  %9208 = vmatprep.subr.mxu0 %v13973_v61 }
 0x69d   : > { %9251 = vmatprep.subr.mxu1 %v13973_v61  ;;  %9209 = vmatpush3.msra.mxu0 %v14034_v58 }
 0x69e   : > { %9252 = vmatpush3.msra.mxu1 %v14001_v40  ;;  %9210 = vmatprep.subr.mxu0 %v13973_v61 }
 0x69f   : > { %9253 = vmatprep.subr.mxu1 %v13973_v61  ;;  %9211 = vmatpush3.msra.mxu0 %v14035_v46 }
 0x6a0   : > { %9254 = vmatpush3.msra.mxu1 %v14003_v51  ;;  %9212 = vmatprep.subr.mxu0 %v13973_v61 }
 0x6a1   : > { %9255 = vmatprep.subr.mxu1 %v13973_v61  ;;  %9213 = vmatpush3.msra.mxu0 %v14036_v11 }
 0x6a2   : > { %9256 = vmatpush3.msra.mxu1 %v14005_v3  ;;  %9214 = vmatprep.subr.mxu0 %v13973_v61 }
 0x6a3   : > { %9257 = vmatprep.subr.mxu1 %v13973_v61  ;;  %9215 = vmatpush3.msra.mxu0 %v14037_v60 }
 0x6a4   : > { %9258 = vmatpush3.msra.mxu1 %v14007_v50  ;;  %9216 = vmatprep.subr.mxu0 %v13973_v61 }
 0x6a5   : > { %9259 = vmatprep.subr.mxu1 %v13973_v61  ;;  %9217 = vmatpush3.msra.mxu0 %v14038_v44 }
 0x6a6   : > { %9260 = vmatpush3.msra.mxu1 %v14008_v42  ;;  %9218 = vmatprep.subr.mxu0 %v13973_v61 }
 0x6a7   : > { %9261 = vmatprep.subr.mxu1 %v13973_v61  ;;  %9219 = vmatpush3.msra.mxu0 %v14039_v10  ;;  %v14042_v10 = vld [vmem:[#allocation57_spill] sm:$0xff] }
 0x6a8   : > { %9262 = vmatpush3.msra.mxu1 %v14009_v6  ;;  %9220 = vmatprep.subr.mxu0 %v13973_v61 }
 0x6a9   : > { %9263 = vmatprep.subr.mxu1 %v13973_v61  ;;  %9221 = vmatpush3.msra.mxu0 %v14040_v17  ;;  %v14043_v17 = vld [vmem:[#allocation60_spill] sm:$0xff] }
 0x6aa   : > { %9264 = vmatpush3.msra.mxu1 %v14010_v4  ;;  %9265 = vmatprep.mubr.msk.f32.mxu1 %vm9521_vm0, %v13973_v61 }
 0x6ab   : > { %9222 = vmatprep.subr.mxu0 %v13973_v61  ;;  %9266 = vmatmul.mubr.f32.vlgmr.msra.gmra.mxu1 %v11683_v32 }
 0x6ac   : > { %9223 = vmatpush3.msra.mxu0 %v14041_v25  ;;  %9230 = vmatprep.mubr.msk.f32.mxu0 %vm9521_vm0, %v13973_v61  ;;  %v14044_v25 = vld [vmem:[#allocation62_spill] sm:$0xff] }
 0x6ad   : > { %9224 = vmatprep.subr.mxu0 %v13973_v61  ;;  %9303 = vmatprep.subr.mxu1 %v13973_v61 }
 0x6ae   : > { %9225 = vmatpush3.msra.mxu0 %v14042_v10  ;;  %9304 = vmatpush3.msra.mxu1 %v13975_v23 }
 0x6af   : > { %9226 = vmatprep.subr.mxu0 %v13973_v61  ;;  %9305 = vmatprep.subr.mxu1 %v13973_v61 }
 0x6b0   : > { %9227 = vmatpush3.msra.mxu0 %v14043_v17  ;;  %9306 = vmatpush3.msra.mxu1 %v13978_v56 }
 0x6b1   : > { %9228 = vmatprep.subr.mxu0 %v13973_v61  ;;  %9307 = vmatprep.subr.mxu1 %v13973_v61 }
 0x6b2   : > { %9229 = vmatpush3.msra.mxu0 %v14044_v25  ;;  %9308 = vmatpush3.msra.mxu1 %v13981_v53 }
 0x6b3   : > { %9231 = vmatmul.mubr.f32.vlgmr.msra.gmra.mxu0 %v11683_v32  ;;  %9309 = vmatprep.subr.mxu1 %v13973_v61 }
 0x6b4   : > { %9310 = vmatpush3.msra.mxu1 %v13982_v43  ;;  %9268 = vmatprep.subr.mxu0 %v13973_v61 }
 0x6b5   : > { %9311 = vmatprep.subr.mxu1 %v13973_v61  ;;  %9269 = vmatpush3.msra.mxu0 %v13983_v39 }
 0x6b6   : > { %9312 = vmatpush3.msra.mxu1 %v13984_v8  ;;  %9270 = vmatprep.subr.mxu0 %v13973_v61 }
 0x6b7   : > { %9313 = vmatprep.subr.mxu1 %v13973_v61  ;;  %9271 = vmatpush3.msra.mxu0 %v13985_v21 }
 0x6b8   : > { %9314 = vmatpush3.msra.mxu1 %v13986_v29  ;;  %9272 = vmatprep.subr.mxu0 %v13973_v61 }
 0x6b9   : > { %9315 = vmatprep.subr.mxu1 %v13973_v61  ;;  %9273 = vmatpush3.msra.mxu0 %v13987_v27 }
 0x6ba   : > { %9316 = vmatpush3.msra.mxu1 %v13988_v28  ;;  %9274 = vmatprep.subr.mxu0 %v13973_v61 }
 0x6bb   : > { %9317 = vmatprep.subr.mxu1 %v13973_v61  ;;  %9275 = vmatpush3.msra.mxu0 %v13989_v41 }
 0x6bc   : > { %9318 = vmatpush3.msra.mxu1 %v13990_v38  ;;  %9276 = vmatprep.subr.mxu0 %v13973_v61 }
 0x6bd   : > { %9319 = vmatprep.subr.mxu1 %v13973_v61  ;;  %9277 = vmatpush3.msra.mxu0 %v13991_v15 }
 0x6be   : > { %9320 = vmatpush3.msra.mxu1 %v13992_v63  ;;  %9278 = vmatprep.subr.mxu0 %v13973_v61 }
 0x6bf   : > { %9321 = vmatprep.subr.mxu1 %v13973_v61  ;;  %9279 = vmatpush3.msra.mxu0 %v13993_v49 }
 0x6c0   : > { %9322 = vmatpush3.msra.mxu1 %v13994_v30  ;;  %9280 = vmatprep.subr.mxu0 %v13973_v61 }
 0x6c1   : > { %9323 = vmatprep.subr.mxu1 %v13973_v61  ;;  %9281 = vmatpush3.msra.mxu0 %v13995_v45 }
 0x6c2   : > { %9324 = vmatpush3.msra.mxu1 %v13996_v36  ;;  %9282 = vmatprep.subr.mxu0 %v13973_v61 }
 0x6c3   : > { %9325 = vmatprep.subr.mxu1 %v13973_v61  ;;  %9283 = vmatpush3.msra.mxu0 %v13997_v9 }
 0x6c4   : > { %9326 = vmatpush3.msra.mxu1 %v13998_v19  ;;  %9284 = vmatprep.subr.mxu0 %v13973_v61 }
 0x6c5   : > { %9327 = vmatprep.subr.mxu1 %v13973_v61  ;;  %9285 = vmatpush3.msra.mxu0 %v13999_v1 }
 0x6c6   : > { %9328 = vmatpush3.msra.mxu1 %v14000_v13  ;;  %9286 = vmatprep.subr.mxu0 %v13973_v61 }
 0x6c7   : > { %9329 = vmatprep.subr.mxu1 %v13973_v61  ;;  %9287 = vmatpush3.msra.mxu0 %v14001_v40 }
 0x6c8   : > { %9330 = vmatpush3.msra.mxu1 %v14002_v47  ;;  %9288 = vmatprep.subr.mxu0 %v13973_v61 }
 0x6c9   : > { %9331 = vmatprep.subr.mxu1 %v13973_v61  ;;  %9289 = vmatpush3.msra.mxu0 %v14003_v51 }
 0x6ca   : > { %9332 = vmatpush3.msra.mxu1 %v14004_v48  ;;  %9290 = vmatprep.subr.mxu0 %v13973_v61 }
 0x6cb   : > { %9333 = vmatprep.subr.mxu1 %v13973_v61  ;;  %9291 = vmatpush3.msra.mxu0 %v14005_v3 }
 0x6cc   : > { %9334 = vmatpush3.msra.mxu1 %v14006_v31  ;;  %9292 = vmatprep.subr.mxu0 %v13973_v61 }
 0x6cd   : > { %9335 = vmatprep.mubr.msk.f32.mxu1 %vm9521_vm0, %v13973_v61  ;;  %9373 = vmatprep.subr.mxu1 %v13973_v61 }
 0x6ce   : > { %9293 = vmatpush3.msra.mxu0 %v14007_v50  ;;  %9300 = vmatprep.mubr.msk.f32.mxu0 %vm9521_vm0, %v13973_v61 }
 0x6cf   : > { %9294 = vmatprep.subr.mxu0 %v13973_v61 }
 0x6d0   : > { %9295 = vmatpush3.msra.mxu0 %v14008_v42 }
 0x6d1   : > { %9296 = vmatprep.subr.mxu0 %v13973_v61 }
 0x6d2   : > { %9297 = vmatpush3.msra.mxu0 %v14009_v6 }
 0x6d3   : > { %9298 = vmatprep.subr.mxu0 %v13973_v61 }
 0x6d4   : > { %9299 = vmatpush3.msra.mxu0 %v14010_v4 }
 0x6d5   : > { %9338 = vmatprep.subr.mxu0 %v13973_v61 }
 0x729   : > { %v4767_v23 = vpop.f32.mrf.mxu1 }
 0x72b   : > { %v9127_v56 = vpop.f32.mrf.mxu1 }
 0x731   : > { %v4616_v53 = vpop.f32.mrf.mxu0 }
 0x732   : > { %v4768_v30 = vadd.f32 %v4767_v23, %v4616_v53 }
 0x733   : > { %v9092_v43 = vpop.f32.mrf.mxu0 }
 0x749   : > { %v4960_v8 = vpop.f32.mrf.mxu1 }
 0x74b   : > { %v9197_v29 = vpop.f32.mrf.mxu1 }
 0x752   : > { %v4871_v28 = vpop.f32.mrf.mxu0 }
 0x753   : > { %v4872_v19 = vadd.f32 %v4871_v28, %v4768_v30  ;;  %v5845_v30 = vld [vmem:[%s13279_s10 + $0xa0] sm:$0xff] }
 0x754   : > { %v9162_v38 = vpop.f32.mrf.mxu0 }
 0x755   : > { %v4961_v13 = vadd.f32 %v4960_v8, %v4872_v19 }
 0x76b   : > { %v5166_v63 = vpop.f32.mrf.mxu1 }
 0x76d   : > { %v9267_v36 = vpop.f32.mrf.mxu1 }
 0x773   : > { %v5079_v47 = vpop.f32.mrf.mxu0 }
 0x774   : > { %v5080_v48 = vadd.f32 %v5079_v47, %v4961_v13 }
 0x775   : > { %v9232_v31 = vpop.f32.mrf.mxu0 }
 0x776   : > { %v5167_v32 = vadd.f32 %v5166_v63, %v5080_v48  ;;  %v5844_v48 = vld [vmem:[%s13279_s10 + $0x98] sm:$0xff] }
 0x778   : > { %v11900_v25 = vsub.f32 %v11680_v59, %v5167_v32 }
 0x77a   : > { %v5171_v56 = vmul.f32 %v11900_v25, %v11900_v25 }
 0x77c   : > { %v11904_v43 = vand.u32 4294901760, %v5171_v56 }
 0x77e   : > { %9336 = vmatmul.mubr.f32.vlgmr.msra.gmra.mxu1 %v11904_v43  ;;  %v11908_v29 = vsub.f32 %v5171_v56, %v11904_v43 }
 0x77f   : > { %9374 = vmatpush3.msra.mxu1 %v13983_v39  ;;  %9405 = vmatprep.mubr.msk.f32.mxu1 %vm9521_vm0, %v13973_v61 }
 0x780   : > { %9375 = vmatprep.subr.mxu1 %v13973_v61  ;;  %v5255_v23 = vand.u32 4294901760, %v11908_v29 }
 0x781   : > { %9376 = vmatpush3.msra.mxu1 %v13985_v21 }
 0x782   : > { %9377 = vmatprep.subr.mxu1 %v13973_v61  ;;  %v5256_v53 = vsub.f32 %v11908_v29, %v5255_v23 }
 0x783   : > { %9378 = vmatpush3.msra.mxu1 %v13987_v27 }
 0x784   : > { %9379 = vmatprep.subr.mxu1 %v13973_v61  ;;  %v5257_v8 = vand.u32 4294901760, %v5256_v53 }
 0x785   : > { %9380 = vmatpush3.msra.mxu1 %v13989_v41 }
 0x786   : > { %9381 = vmatprep.subr.mxu1 %v13973_v61  ;;  %9301 = vmatmul.mubr.f32.vlgmr.msra.gmra.mxu0 %v5257_v8 }
 0x787   : > { %9339 = vmatpush3.msra.mxu0 %v14013_v12  ;;  %9382 = vmatpush3.msra.mxu1 %v13991_v15 }
 0x788   : > { %9340 = vmatprep.subr.mxu0 %v13973_v61  ;;  %9383 = vmatprep.subr.mxu1 %v13973_v61 }
 0x789   : > { %9341 = vmatpush3.msra.mxu0 %v14014_v7  ;;  %9384 = vmatpush3.msra.mxu1 %v13993_v49 }
 0x78a   : > { %9342 = vmatprep.subr.mxu0 %v13973_v61  ;;  %9385 = vmatprep.subr.mxu1 %v13973_v61 }
 0x78b   : > { %9343 = vmatpush3.msra.mxu0 %v14015_v62  ;;  %9386 = vmatpush3.msra.mxu1 %v13995_v45  ;;  %v5851_v62 = vld [vmem:[%s13279_s10 + $0xd0] sm:$0xff] }
 0x78c   : > { %9344 = vmatprep.subr.mxu0 %v13973_v61  ;;  %9387 = vmatprep.subr.mxu1 %v13973_v61 }
 0x78d   : > { %9345 = vmatpush3.msra.mxu0 %v14016_v20  ;;  %9388 = vmatpush3.msra.mxu1 %v13997_v9 }
 0x78e   : > { %9346 = vmatprep.subr.mxu0 %v13973_v61  ;;  %9389 = vmatprep.subr.mxu1 %v13973_v61 }
 0x78f   : > { %9347 = vmatpush3.msra.mxu0 %v14017_v24  ;;  %9390 = vmatpush3.msra.mxu1 %v13999_v1 }
 0x790   : > { %9348 = vmatprep.subr.mxu0 %v13973_v61  ;;  %9391 = vmatprep.subr.mxu1 %v13973_v61 }
 0x791   : > { %9349 = vmatpush3.msra.mxu0 %v14018_v57  ;;  %9392 = vmatpush3.msra.mxu1 %v14001_v40  ;;  %v12096_v57 = vand.u32 4294901760, %v5851_v62 }
 0x792   : > { %9350 = vmatprep.subr.mxu0 %v13973_v61  ;;  %9393 = vmatprep.subr.mxu1 %v13973_v61 }
 0x793   : > { %9351 = vmatpush3.msra.mxu0 %v14019_v55  ;;  %9394 = vmatpush3.msra.mxu1 %v14003_v51  ;;  %v5850_v55 = vld [vmem:[%s13279_s10 + $0xc8] sm:$0xff] }
 0x794   : > { %9352 = vmatprep.subr.mxu0 %v13973_v61  ;;  %9395 = vmatprep.subr.mxu1 %v13973_v61 }
 0x795   : > { %9353 = vmatpush3.msra.mxu0 %v14020_v0  ;;  %9396 = vmatpush3.msra.mxu1 %v14005_v3 }
 0x796   : > { %9354 = vmatprep.subr.mxu0 %v13973_v61  ;;  %9397 = vmatprep.subr.mxu1 %v13973_v61 }
 0x797   : > { %9355 = vmatpush3.msra.mxu0 %v14021_v22  ;;  %9398 = vmatpush3.msra.mxu1 %v14007_v50 }
 0x798   : > { %9356 = vmatprep.subr.mxu0 %v13973_v61  ;;  %9399 = vmatprep.subr.mxu1 %v13973_v61 }
 0x799   : > { %9357 = vmatpush3.msra.mxu0 %v14022_v37  ;;  %9400 = vmatpush3.msra.mxu1 %v14008_v42 }
 0x79a   : > { %9358 = vmatprep.subr.mxu0 %v13973_v61  ;;  %9401 = vmatprep.subr.mxu1 %v13973_v61 }
 0x79b   : > { %9359 = vmatpush3.msra.mxu0 %v14023_v54  ;;  %9402 = vmatpush3.msra.mxu1 %v14009_v6  ;;  %v12109_v54 = vand.u32 4294901760, %v5850_v55 }
 0x79c   : > { %9360 = vmatprep.subr.mxu0 %v13973_v61  ;;  %9403 = vmatprep.subr.mxu1 %v13973_v61 }
 0x79d   : > { %9361 = vmatpush3.msra.mxu0 %v14024_v16  ;;  %9404 = vmatpush3.msra.mxu1 %v14010_v4  ;;  %v5849_v16 = vld [vmem:[%s13279_s10 + $0xc0] sm:$0xff] }
 0x79e   : > { %9362 = vmatprep.subr.mxu0 %v13973_v61  ;;  %9406 = vmatmul.mubr.f32.vlgmr.msra.gmra.mxu1 %v5255_v23 }
 0x79f   : > { %9443 = vmatprep.subr.mxu1 %v13973_v61  ;;  %9363 = vmatpush3.msra.mxu0 %v14025_v26 }
 0x7a0   : > { %9444 = vmatpush3.msra.mxu1 %v13983_v39  ;;  %9364 = vmatprep.subr.mxu0 %v13973_v61  ;;  %v14045_v39 = vld [vmem:[#allocation47_spill] sm:$0xff] }
 0x7a1   : > { %9445 = vmatprep.subr.mxu1 %v13973_v61  ;;  %9365 = vmatpush3.msra.mxu0 %v14026_v35 }
 0x7a2   : > { %9446 = vmatpush3.msra.mxu1 %v13985_v21  ;;  %9366 = vmatprep.subr.mxu0 %v13973_v61  ;;  %v14046_v21 = vld [vmem:[#allocation51_spill] sm:$0xff] }
 0x7a3   : > { %9447 = vmatprep.subr.mxu1 %v13973_v61  ;;  %9367 = vmatpush3.msra.mxu0 %v14027_v18  ;;  %v12120_v18 = vsub.f32 %v5851_v62, %v12096_v57 }
 0x7a4   : > { %9448 = vmatpush3.msra.mxu1 %v13987_v27  ;;  %9368 = vmatprep.subr.mxu0 %v13973_v61  ;;  %v14047_v27 = vld [vmem:[#allocation54_spill] sm:$0xff] }
 0x7a5   : > { %9449 = vmatprep.subr.mxu1 %v13973_v61  ;;  %9369 = vmatpush3.msra.mxu0 %v14028_v5  ;;  %v12122_v5 = vand.u32 4294901760, %v5849_v16 }
 0x7a6   : > { %9370 = vmatprep.mubr.msk.f32.mxu0 %vm9521_vm0, %v13973_v61  ;;  %9450 = vmatpush3.msra.mxu1 %v13989_v41  ;;  %v14048_v41 = vld [vmem:[#allocation62_spill] sm:$0xff] }
 0x7a7   : > { %9371 = vmatmul.mubr.f32.vlgmr.msra.gmra.mxu0 %v11908_v29  ;;  %9408 = vmatprep.subr.mxu0 %v13973_v61  ;;  %v5843_v29 = vld [vmem:[%s13279_s10 + $0x90] sm:$0xff] }
 0x7a8   : > { %9451 = vmatprep.subr.mxu1 %v13973_v61  ;;  %9409 = vmatpush3.msra.mxu0 %v14029_v14  ;;  %v5848_v14 = vld [vmem:[%s13279_s10 + $0xb8] sm:$0xff] }
 0x7a9   : > { %9452 = vmatpush3.msra.mxu1 %v13991_v15  ;;  %9410 = vmatprep.subr.mxu0 %v13973_v61  ;;  %v5856_v15 = vld [vmem:[%s13279_s10 + $0xf8] sm:$0xff]  ;;  %v12154_v63 = vand.u32 4294901760, %v5848_v14 }
 0x7aa   : > { %9453 = vmatprep.subr.mxu1 %v13973_v61  ;;  %9411 = vmatpush3.msra.mxu0 %v14030_v52 }
 0x7ab   : > { %9454 = vmatpush3.msra.mxu1 %v13993_v49  ;;  %9412 = vmatprep.subr.mxu0 %v13973_v61  ;;  %v12054_v49 = vand.u32 4294901760, %v5856_v15  ;;  %v12172_v56 = vsub.f32 %v5848_v14, %v12154_v63 }
 0x7ac   : > { %9455 = vmatprep.subr.mxu1 %v13973_v61  ;;  %9413 = vmatpush3.msra.mxu0 %v14031_v34 }
 0x7ad   : > { %9456 = vmatpush3.msra.mxu1 %v13995_v45  ;;  %9414 = vmatprep.subr.mxu0 %v13973_v61  ;;  %14049 = vst [vmem:[#allocation78_spill] sm:$0xff] %v12054_v49  ;;  %v5855_v45 = vld [vmem:[%s13279_s10 + $0xf0] sm:$0xff] }
 0x7ae   : > { %9457 = vmatprep.subr.mxu1 %v13973_v61  ;;  %9415 = vmatpush3.msra.mxu0 %v14032_v33 }
 0x7af   : > { %9458 = vmatpush3.msra.mxu1 %v13997_v9  ;;  %9416 = vmatprep.subr.mxu0 %v13973_v61  ;;  %v12059_v9 = vand.u32 4294901760, %v5855_v45 }
 0x7b0   : > { %9459 = vmatprep.subr.mxu1 %v13973_v61  ;;  %9417 = vmatpush3.msra.mxu0 %v14033_v2  ;;  %v12133_v2 = vsub.f32 %v5850_v55, %v12109_v54  ;;  %v12206_v55 = vand.u32 4294901760, %v5843_v29 }
 0x7b1   : > { %9460 = vmatpush3.msra.mxu1 %v13999_v1  ;;  %9418 = vmatprep.subr.mxu0 %v13973_v61  ;;  %v5854_v1 = vld [vmem:[%s13279_s10 + $0xe8] sm:$0xff] }
 0x7b2   : > { %9461 = vmatprep.subr.mxu1 %v13973_v61  ;;  %9419 = vmatpush3.msra.mxu0 %v14034_v58  ;;  %v5847_v58 = vld [vmem:[%s13279_s10 + $0xb0] sm:$0xff]  ;;  %v13563_v38 = vand.u32 4294901760, %v12133_v2 }
 0x7b3   : > { %9462 = vmatpush3.msra.mxu1 %v14001_v40  ;;  %9420 = vmatprep.subr.mxu0 %v13973_v61  ;;  %v12065_v40 = vsub.f32 %v5856_v15, %v12054_v49  ;;  %v12163_v47 = vand.u32 4294901760, %v5847_v58 }
 0x7b4   : > { %9463 = vmatprep.subr.mxu1 %v13973_v61  ;;  %9421 = vmatpush3.msra.mxu0 %v14035_v46  ;;  %v6022_v32 = vsub.f32 %v12133_v2, %v13563_v38 }
 0x7b5   : > { %9464 = vmatpush3.msra.mxu1 %v14003_v51  ;;  %9422 = vmatprep.subr.mxu0 %v13973_v61  ;;  %14050 = vst [vmem:[#allocation79_spill] sm:$0xff] %v12065_v40  ;;  %v12067_v51 = vand.u32 4294901760, %v5854_v1  ;;  %v12184_v8 = vsub.f32 %v5847_v58, %v12163_v47  ;;  %v12224_v58 = vsub.f32 %v5843_v29, %v12206_v55  ;;  %v5838_v29 = vld [vmem:[%s13279_s10 + $0x68] sm:$0xff] }
 0x7b6   : > { %9465 = vmatprep.subr.mxu1 %v13973_v61  ;;  %9423 = vmatpush3.msra.mxu0 %v14036_v11 }
 0x7b7   : > { %9466 = vmatpush3.msra.mxu1 %v14005_v3  ;;  %9424 = vmatprep.subr.mxu0 %v13973_v61  ;;  %v5853_v3 = vld [vmem:[%s13279_s10 + $0xe0] sm:$0xff]  ;;  %v12084_v12 = vsub.f32 %v5854_v1, %v12067_v51 }
 0x7b8   : > { %9467 = vmatprep.subr.mxu1 %v13973_v61  ;;  %9425 = vmatpush3.msra.mxu0 %v14037_v60  ;;  %v13564_v60 = vand.u32 4294901760, %v12120_v18  ;;  %v5841_v1 = vld [vmem:[%s13279_s10 + $0x80] sm:$0xff] }
 0x7b9   : > { %9468 = vmatpush3.msra.mxu1 %v14007_v50  ;;  %9426 = vmatprep.subr.mxu0 %v13973_v61  ;;  %v12074_v50 = vsub.f32 %v5855_v45, %v12059_v9  ;;  %v13569_v22 = vand.u32 4294901760, %v12084_v12  ;;  %v12196_v45 = vand.u32 4294901760, %v5844_v48 }
 0x7ba   : > { %9469 = vmatprep.subr.mxu1 %v13973_v61  ;;  %9427 = vmatpush3.msra.mxu0 %v14038_v44  ;;  %v12144_v44 = vsub.f32 %v5849_v16, %v12122_v5  ;;  %v6016_v19 = vsub.f32 %v12120_v18, %v13564_v60 }
 0x7bb   : > { %9470 = vmatpush3.msra.mxu1 %v14008_v42  ;;  %9428 = vmatprep.subr.mxu0 %v13973_v61  ;;  %v12076_v42 = vand.u32 4294901760, %v5853_v3  ;;  %v13570_v20 = vand.u32 4294901760, %v12074_v50  ;;  %v5998_v34 = vsub.f32 %v12084_v12, %v13569_v22 }
 0x7bc   : > { %9471 = vmatprep.subr.mxu1 %v13973_v61  ;;  %9429 = vmatpush3.msra.mxu0 %v14045_v39  ;;  %v13562_v13 = vand.u32 4294901760, %v12144_v44  ;;  %v6017_v23 = vand.u32 4294901760, %v6016_v19  ;;  %v12186_v39 = vand.u32 4294901760, %v5845_v30 }
 0x7bd   : > { %9472 = vmatpush3.msra.mxu1 %v14009_v6  ;;  %9430 = vmatprep.subr.mxu0 %v13973_v61  ;;  %v5852_v6 = vld [vmem:[%s13279_s10 + $0xd8] sm:$0xff]  ;;  %v12094_v24 = vsub.f32 %v5853_v3, %v12076_v42  ;;  %v5992_v26 = vsub.f32 %v12074_v50, %v13570_v20 }
 0x7be   : > { %9473 = vmatprep.subr.mxu1 %v13973_v61  ;;  %9431 = vmatpush3.msra.mxu0 %v14046_v21  ;;  %v12086_v7 = vand.u32 4294901760, %v5852_v6  ;;  %v6028_v53 = vsub.f32 %v12144_v44, %v13562_v13  ;;  %v5842_v21 = vld [vmem:[%s13279_s10 + $0x88] sm:$0xff]  ;;  %v12204_v62 = vsub.f32 %v5845_v30, %v12186_v39 }
 0x7bf   : > { %9474 = vmatpush3.msra.mxu1 %v14010_v4  ;;  %9475 = vmatprep.mubr.msk.f32.mxu1 %vm9521_vm0, %v13973_v61  ;;  %v13572_v4 = vand.u32 4294901760, %v12065_v40  ;;  %v13568_v35 = vand.u32 4294901760, %v12094_v24  ;;  %v5993_v46 = vand.u32 4294901760, %v5992_v26  ;;  %v12214_v26 = vsub.f32 %v5844_v48, %v12196_v45 }
 0x7c0   : > { %9432 = vmatprep.subr.mxu0 %v13973_v61  ;;  %9476 = vmatmul.mubr.f32.vlgmr.msra.gmra.mxu1 %v11904_v43  ;;  %v12107_v37 = vsub.f32 %v5852_v6, %v12086_v7  ;;  %v6029_v3 = vand.u32 4294901760, %v6028_v53  ;;  %v13559_v6 = vand.u32 4294901760, %v12184_v8  ;;  %v12216_v14 = vand.u32 4294901760, %v5842_v21 }
 0x7c1   : > { %9433 = vmatpush3.msra.mxu0 %v14047_v27  ;;  %9440 = vmatprep.mubr.msk.f32.mxu0 %vm9521_vm0, %v13973_v61  ;;  %v5986_v0 = vsub.f32 %v12065_v40, %v13572_v4  ;;  %v6004_v11 = vsub.f32 %v12094_v24, %v13568_v35  ;;  %v6023_v27 = vand.u32 4294901760, %v6022_v32 }
 0x7c2   : > { %9434 = vmatprep.subr.mxu0 %v13973_v61  ;;  %6207 = vmatprep.mubr.f32.mxu1 %v13973_v61  ;;  %v13566_v33 = vand.u32 4294901760, %v12107_v37  ;;  %v12237_v30 = vsub.f32 %v5842_v21, %v12216_v14 }
 0x7c3   : > { %9435 = vmatpush3.msra.mxu0 %v14042_v10  ;;  %v5987_v52 = vand.u32 4294901760, %v5986_v0  ;;  %v5846_v10 = vld [vmem:[%s13279_s10 + $0xa8] sm:$0xff]  ;;  %v6005_v36 = vand.u32 4294901760, %v6004_v11  ;;  %v5840_v11 = vld [vmem:[%s13279_s10 + $0x78] sm:$0xff] }
 0x7c4   : > { %9436 = vmatprep.subr.mxu0 %v13973_v61  ;;  %v6010_v28 = vsub.f32 %v12107_v37, %v13566_v33  ;;  %v13558_v21 = vand.u32 4294901760, %v12237_v30 }
 0x7c5   : > { %9437 = vmatpush3.msra.mxu0 %v14043_v17  ;;  %5988 = vmatprep.subr.mxu1 %v5987_v52  ;;  %v5999_v17 = vand.u32 4294901760, %v5998_v34  ;;  %v6040_v52 = vsub.f32 %v12184_v8, %v13559_v6  ;;  %v13555_v34 = vand.u32 4294901760, %v12204_v62 }
 0x7c6   : > { %9438 = vmatprep.subr.mxu0 %v13973_v61  ;;  %5994 = vmatpush1.msra.mxu1 %v5993_v46  ;;  %v6011_v31 = vand.u32 4294901760, %v6010_v28  ;;  %v12226_v46 = vand.u32 4294901760, %v5841_v1  ;;  %v13554_v28 = vand.u32 4294901760, %v12214_v26 }
 0x7c7   : > { %9439 = vmatpush3.msra.mxu0 %v14048_v41  ;;  %6000 = vmatprep.subr.mxu1 %v5999_v17  ;;  %v13560_v41 = vand.u32 4294901760, %v12172_v56  ;;  %v6041_v19 = vand.u32 4294901760, %v6040_v52  ;;  %v6052_v48 = vsub.f32 %v12204_v62, %v13555_v34  ;;  %v6070_v34 = vsub.f32 %v12237_v30, %v13558_v21 }
 0x7c8   : > { %9441 = vmatmul.mubr.f32.vlgmr.msra.gmra.mxu0 %v11904_v43  ;;  %5876 = vmatprep.subr.mxu0 %v12054_v49  ;;  %v12174_v43 = vand.u32 4294901760, %v5846_v10  ;;  %v12248_v32 = vsub.f32 %v5841_v1, %v12226_v46  ;;  %v6058_v53 = vsub.f32 %v12214_v26, %v13554_v28  ;;  %v5837_v1 = vld [vmem:[%s13279_s10 + $0x60] sm:$0xff] }
 0x7c9   : > { %5971 = vmatprep.mubr.f32.mxu0 %v13973_v61  ;;  %5878 = vmatpush1.msra.mxu0 %v12059_v9  ;;  %v6034_v0 = vsub.f32 %v12172_v56, %v13560_v41  ;;  %v12290_v21 = vand.u32 4294901760, %v5837_v1  ;;  %v6071_v6 = vand.u32 4294901760, %v6070_v34 }
 0x7ca   : > { %5880 = vmatprep.subr.mxu0 %v12067_v51  ;;  %6006 = vmatpush1.msra.mxu1 %v6005_v36  ;;  %v12194_v15 = vsub.f32 %v5846_v10, %v12174_v43  ;;  %v5839_v36 = vld [vmem:[%s13279_s10 + $0x70] sm:$0xff]  ;;  %v13561_v52 = vand.u32 4294901760, %v12248_v32  ;;  %v6059_v28 = vand.u32 4294901760, %v6058_v53 }
 0x7cb   : > { %5882 = vmatpush1.msra.mxu0 %v12076_v42  ;;  %6012 = vmatprep.subr.mxu1 %v6011_v31  ;;  %v6035_v10 = vand.u32 4294901760, %v6034_v0  ;;  %v13556_v31 = vand.u32 4294901760, %v12224_v58 }
 0x7cc   : > { %5884 = vmatprep.subr.mxu0 %v12086_v7  ;;  %6018 = vmatpush1.msra.mxu1 %v6017_v23  ;;  %v13557_v16 = vand.u32 4294901760, %v12194_v15 }
 0x7cd   : > { %5886 = vmatpush1.msra.mxu0 %v12096_v57  ;;  %6024 = vmatprep.subr.mxu1 %v6023_v27  ;;  %v12258_v27 = vand.u32 4294901760, %v5840_v11  ;;  %v6064_v0 = vsub.f32 %v12224_v58, %v13556_v31  ;;  %v5835_v31 = vld [vmem:[%s13279_s10 + $0x50] sm:$0xff] }
 0x7ce   : > { %5888 = vmatprep.subr.mxu0 %v12109_v54  ;;  %6030 = vmatpush1.msra.mxu1 %v6029_v3  ;;  %v6046_v17 = vsub.f32 %v12194_v15, %v13557_v16  ;;  %v6053_v3 = vand.u32 4294901760, %v6052_v48  ;;  %v12278_v48 = vand.u32 4294901760, %v5838_v29  ;;  %v12310_v34 = vand.u32 4294901760, %v5835_v31 }
 0x7cf   : > { %5890 = vmatpush1.msra.mxu0 %v12122_v5  ;;  %6036 = vmatprep.subr.mxu1 %v6035_v10  ;;  %v12267_v10 = vand.u32 4294901760, %v5839_v36  ;;  %v6065_v16 = vand.u32 4294901760, %v6064_v0 }
 0x7d0   : > { %5892 = vmatprep.subr.mxu0 %v12154_v63  ;;  %v6047_v23 = vand.u32 4294901760, %v6046_v17  ;;  %6042 = vmatpush1.msra.mxu1 %v6041_v19  ;;  %v5836_v17 = vld [vmem:[%s13279_s10 + $0x58] sm:$0xff]  ;;  %v12276_v19 = vsub.f32 %v5840_v11, %v12258_v27  ;;  %v5834_v11 = vld [vmem:[%s13279_s10 + $0x48] sm:$0xff]  ;;  %v12298_v0 = vsub.f32 %v5838_v29, %v12278_v48 }
 0x7d1   : > { %5894 = vmatpush1.msra.mxu0 %v12163_v47  ;;  %v12288_v53 = vsub.f32 %v5839_v36, %v12267_v10  ;;  %v12300_v41 = vand.u32 4294901760, %v5836_v17  ;;  %v5833_v36 = vld [vmem:[%s13279_s10 + $0x40] sm:$0xff] }
 0x7d2   : > { %5896 = vmatprep.subr.mxu0 %v12174_v43  ;;  %6048 = vmatprep.subr.mxu1 %v6047_v23  ;;  %v6076_v23 = vsub.f32 %v12248_v32, %v13561_v52  ;;  %14052 = vst [vmem:[#allocation72_spill] sm:$0xff] %v12298_v0  ;;  %v13571_v38 = vand.u32 4294901760, %v12298_v0 }
 0x7d3   : > { %5898 = vmatpush1.msra.mxu0 %v12186_v39  ;;  %6054 = vmatpush1.msra.mxu1 %v6053_v3  ;;  %14051 = vst [vmem:[#allocation87_spill] sm:$0xff] %v12288_v53  ;;  %v13565_v3 = vand.u32 4294901760, %v12276_v19  ;;  %v13567_v13 = vand.u32 4294901760, %v12288_v53  ;;  %v12318_v60 = vsub.f32 %v5836_v17, %v12300_v41  ;;  %v5832_v17 = vld [vmem:[%s13279_s10 + $0x38] sm:$0xff] }
 0x7d4   : > { %5900 = vmatprep.subr.mxu0 %v12196_v45  ;;  %6060 = vmatprep.subr.mxu1 %v6059_v28  ;;  %v6077_v52 = vand.u32 4294901760, %v6076_v23  ;;  %v12308_v28 = vsub.f32 %v5837_v1, %v12290_v21  ;;  %v12328_v23 = vsub.f32 %v5835_v31, %v12310_v34  ;;  %v5831_v31 = vld [vmem:[%s13279_s10 + $0x30] sm:$0xff] }
 0x7d5   : > { %5902 = vmatpush1.msra.mxu0 %v12206_v55  ;;  %6066 = vmatpush1.msra.mxu1 %v6065_v16  ;;  %v6082_v29 = vsub.f32 %v12276_v19, %v13565_v3  ;;  %14054 = vst [vmem:[#allocation73_spill] sm:$0xff] %v12318_v60  ;;  %v12320_v16 = vand.u32 4294901760, %v5834_v11  ;;  %v6088_v1 = vsub.f32 %v12288_v53, %v13567_v13  ;;  %v12330_v3 = vand.u32 4294901760, %v5833_v36 }
 0x7d6   : > { %5904 = vmatprep.subr.mxu0 %v12216_v14  ;;  %14053 = vst [vmem:[#allocation69_spill] sm:$0xff] %v12308_v28  ;;  %6072 = vmatprep.subr.mxu1 %v6071_v6  ;;  %v13574_v6 = vand.u32 4294901760, %v12308_v28  ;;  %14055 = vst [vmem:[#allocation82_spill] sm:$0xff] %v12328_v23  ;;  %v13579_v13 = vand.u32 4294901760, %v12318_v60 }
 0x7d7   : > { %5906 = vmatpush1.msra.mxu0 %v12226_v46  ;;  %6078 = vmatpush1.msra.mxu1 %v6077_v52  ;;  %v6083_v33 = vand.u32 4294901760, %v6082_v29  ;;  %v6094_v52 = vsub.f32 %v12298_v0, %v13571_v38  ;;  %v12341_v35 = vsub.f32 %v5834_v11, %v12320_v16  ;;  %v6089_v22 = vand.u32 4294901760, %v6088_v1  ;;  %v5830_v11 = vld [vmem:[%s13279_s10 + $0x28] sm:$0xff] }
 0x7d8   : > { %5908 = vmatprep.subr.mxu0 %v12258_v27  ;;  %v6100_v29 = vsub.f32 %v12308_v28, %v13574_v6  ;;  %v12352_v38 = vsub.f32 %v5833_v36, %v12330_v3  ;;  %v6106_v1 = vsub.f32 %v12318_v60, %v13579_v13  ;;  %v12362_v6 = vand.u32 4294901760, %v5832_v17  ;;  %v5829_v36 = vld [vmem:[%s13279_s10 + $0x20] sm:$0xff]  ;;  %v5828_v13 = vld [vmem:[%s13279_s10 + $0x18] sm:$0xff] }
 0x7d9   : > { %5910 = vmatpush1.msra.mxu0 %v12267_v10  ;;  %14056 = vst [vmem:[#allocation74_spill] sm:$0xff] %v12341_v35  ;;  %6084 = vmatprep.subr.mxu1 %v6083_v33  ;;  %v6095_v4 = vand.u32 4294901760, %v6094_v52  ;;  %v14059_v28 = vand.u32 4294901760, %v12328_v23  ;;  %v12371_v52 = vand.u32 4294901760, %v5831_v31  ;;  %v14061_v60 = vand.u32 4294901760, %v12341_v35 }
 0x7da   : > { %5912 = vmatprep.subr.mxu0 %v12278_v48  ;;  %14057 = vst [vmem:[#allocation84_spill] sm:$0xff] %v12352_v38  ;;  %14058 = vst [vmem:[#allocation75_spill] sm:$0xff] %v12362_v6  ;;  %6090 = vmatpush1.msra.mxu1 %v6089_v22  ;;  %v6101_v20 = vand.u32 4294901760, %v6100_v29  ;;  %v6107_v59 = vand.u32 4294901760, %v6106_v1  ;;  %v12380_v22 = vsub.f32 %v5832_v17, %v12362_v6  ;;  %v12382_v29 = vand.u32 4294901760, %v5830_v11  ;;  %v5826_v17 = vld [vmem:[%s13279_s10 + $0x8] sm:$0xff] }
 0x7db   : > { %5914 = vmatpush1.msra.mxu0 %v12290_v21  ;;  %v6112_v0 = vsub.f32 %v12328_v23, %v14059_v28  ;;  %14060 = vst [vmem:[#allocation88_spill] sm:$0xff] %v12371_v52  ;;  %6096 = vmatprep.subr.mxu1 %v6095_v4  ;;  %v6118_v53 = vsub.f32 %v12341_v35, %v14061_v60  ;;  %v5827_v28 = vld [vmem:[%s13279_s10 + $0x10] sm:$0xff]  ;;  %v14064_v4 = vand.u32 4294901760, %v12352_v38  ;;  %v12394_v60 = vand.u32 4294901760, %v5829_v36 }
 0x7dc   : > { %5916 = vmatprep.subr.mxu0 %v12300_v41  ;;  %14062 = vst [vmem:[#allocation76_spill] sm:$0xff] %v12380_v22  ;;  %14063 = vst [vmem:[#allocation70_spill] sm:$0xff] %v12382_v29  ;;  %6102 = vmatpush1.msra.mxu1 %v6101_v20  ;;  %v12392_v23 = vsub.f32 %v5831_v31, %v12371_v52  ;;  %v13596_v20 = vand.u32 4294901760, %v12380_v22  ;;  %v5825_v31 = vld [vmem:[%s13279_s10] sm:$0xff] }
 0x7dd   : > { %5918 = vmatpush1.msra.mxu0 %v12310_v34  ;;  %v6113_v33 = vand.u32 4294901760, %v6112_v0  ;;  %v6124_v1 = vsub.f32 %v12352_v38, %v14064_v4  ;;  %6108 = vmatprep.subr.mxu1 %v6107_v59  ;;  %v6119_v35 = vand.u32 4294901760, %v6118_v53  ;;  %v12402_v0 = vsub.f32 %v5830_v11, %v12382_v29 }
 0x7de   : > { %5920 = vmatprep.subr.mxu0 %v12320_v16  ;;  %14065 = vst [vmem:[#allocation85_spill] sm:$0xff] %v12392_v23  ;;  %v13601_v38 = vand.u32 4294901760, %v12392_v23  ;;  %v12412_v59 = vsub.f32 %v5829_v36, %v12394_v60  ;;  %v12414_v53 = vand.u32 4294901760, %v5827_v28  ;;  %v6130_v11 = vsub.f32 %v12380_v22, %v13596_v20 }
 0x7df   : > { %5922 = vmatpush1.msra.mxu0 %v12330_v3  ;;  %14066 = vst [vmem:[#allocation91_spill] sm:$0xff] %v12402_v0  ;;  %6114 = vmatpush1.msra.mxu1 %v6113_v33  ;;  %v6125_v4 = vand.u32 4294901760, %v6124_v1  ;;  %v12424_v33 = vand.u32 4294901760, %v5826_v17  ;;  %v12434_v20 = vand.u32 4294901760, %v5825_v31 }
 0x7e0   : > { %5924 = vmatprep.subr.mxu0 %v12362_v6  ;;  %v12404_v6 = vand.u32 4294901760, %v5828_v13  ;;  %14068 = vst [vmem:[#allocation77_spill] sm:$0xff] %v12412_v59  ;;  %6120 = vmatprep.subr.mxu1 %v6119_v35  ;;  %v6136_v36 = vsub.f32 %v12392_v23, %v13601_v38  ;;  %v13607_v35 = vand.u32 4294901760, %v12412_v59  ;;  %v12432_v1 = vsub.f32 %v5827_v28, %v12414_v53 }
 0x7e1   : > { %5926 = vmatpush1.msra.mxu0 %v12371_v52  ;;  %v13604_v52 = vand.u32 4294901760, %v12402_v0  ;;  %6126 = vmatpush1.msra.mxu1 %v6125_v4  ;;  %14071 = vst [vmem:[#allocation86_spill] sm:$0xff] %v12434_v20 }
 0x7e2   : > { %14067 = vst [vmem:[#allocation80_spill] sm:$0xff] %v12404_v6  ;;  %5928 = vmatprep.subr.mxu0 %v12382_v29  ;;  %v12422_v29 = vsub.f32 %v5828_v13, %v12404_v6  ;;  %14070 = vst [vmem:[#allocation83_spill] sm:$0xff] %v12432_v1  ;;  %v6131_v13 = vand.u32 4294901760, %v6130_v11  ;;  %v6137_v38 = vand.u32 4294901760, %v6136_v36  ;;  %v6148_v28 = vsub.f32 %v12412_v59, %v13607_v35 }
 0x7e3   : > { %5930 = vmatpush1.msra.mxu0 %v12394_v60  ;;  %v6142_v22 = vsub.f32 %v12402_v0, %v13604_v52  ;;  %v13611_v23 = vand.u32 4294901760, %v12432_v1  ;;  %v12450_v11 = vsub.f32 %v5825_v31, %v12434_v20 }
 0x7e4   : > { %14069 = vst [vmem:[#allocation81_spill] sm:$0xff] %v12422_v29  ;;  %5932 = vmatprep.subr.mxu0 %v12404_v6  ;;  %v13610_v4 = vand.u32 4294901760, %v12422_v29  ;;  %v12442_v6 = vsub.f32 %v5826_v17, %v12424_v33  ;;  %6132 = vmatprep.subr.mxu1 %v6131_v13  ;;  %v6149_v36 = vand.u32 4294901760, %v6148_v28 }
 0x7e5   : > { %5934 = vmatpush1.msra.mxu0 %v12414_v53  ;;  %14073 = vst [vmem:[#allocation90_spill] sm:$0xff] %v12450_v11  ;;  %v6143_v52 = vand.u32 4294901760, %v6142_v22  ;;  %6138 = vmatpush1.msra.mxu1 %v6137_v38  ;;  %v6160_v35 = vsub.f32 %v12432_v1, %v13611_v23  ;;  %v13622_v31 = vand.u32 4294901760, %v12450_v11 }
 0x7e6   : > { %14072 = vst [vmem:[#allocation89_spill] sm:$0xff] %v12442_v6  ;;  %5936 = vmatprep.subr.mxu0 %v12424_v33  ;;  %v6154_v17 = vsub.f32 %v12422_v29, %v13610_v4  ;;  %v13615_v0 = vand.u32 4294901760, %v12442_v6 }
 0x7e7   : > { %5938 = vmatpush1.msra.mxu0 %v12434_v20  ;;  %6144 = vmatprep.subr.mxu1 %v6143_v52  ;;  %v6161_v13 = vand.u32 4294901760, %v6160_v35  ;;  %v6172_v4 = vsub.f32 %v12450_v11, %v13622_v31  ;;  %v14074_v11 = vld [vmem:[#allocation33_spill] sm:$0xff] }
 0x7e8   : > { %6217 = vmatprep.subr.mxu0 %v12065_v40  ;;  %v6155_v59 = vand.u32 4294901760, %v6154_v17  ;;  %v6166_v22 = vsub.f32 %v12442_v6, %v13615_v0  ;;  %6150 = vmatpush1.msra.mxu1 %v6149_v36 }
 0x7e9   : > { %v6173_v28 = vand.u32 4294901760, %v6172_v4 }
 0x7ea   : > { %6156 = vmatprep.subr.mxu1 %v6155_v59  ;;  %v6167_v38 = vand.u32 4294901760, %v6166_v22 }
 0x7eb   : > { %6162 = vmatpush1.msra.mxu1 %v6161_v13 }
 0x7ec   : > { %6168 = vmatprep.subr.mxu1 %v6167_v38 }
 0x7ed   : > { %6174 = vmatpush1.msra.mxu1 %v6173_v28 }
 0x7ee   : > { %6353 = vmatprep.subr.mxu1 %v12054_v49  ;;  %v13626_v49 = vsub.s32 3, %v14074_v11 }
 0x83e   : > { %v5410_v52 = vpop.f32.mrf.mxu1 }
 0x840   : > { %v9337_v17 = vpop.f32.mrf.mxu1 }
 0x846   : > { %v5259_v23 = vpop.f32.mrf.mxu0 }
 0x847   : > { %v5260_v6 = vadd.f32 1e-05, %v5259_v23 }
 0x848   : > { %v9302_v40 = vpop.f32.mrf.mxu0 }
 0x849   : > { %v5411_v20 = vadd.f32 %v5410_v52, %v5260_v6  ;;  %v9509_v40 = vld [vmem:[%s13271_s2] sm:$0x3f] }
 0x85e   : > { %v5603_v1 = vpop.f32.mrf.mxu1 }
 0x860   : > { %v9407_v0 = vpop.f32.mrf.mxu1 }
 0x861   : > { %v14075_v0 = vsub.s32 2, %v14074_v11  ;;  %v14094_v11 = vld [vmem:[#allocation81_spill] sm:$0xff] }
 0x863   : > { %v5818_v17 = vrot.slane %v9509_v40, %v14075_v0  ;;  %v14084_v0 = vld [vmem:[#allocation80_spill] sm:$0xff] }
 0x867   : > { %v5514_v36 = vpop.f32.mrf.mxu0 }
 0x868   : > { %v5515_v59 = vadd.f32 %v5514_v36, %v5411_v20  ;;  %v5823_v20 = vrot.slane %v9509_v40, %v13626_v49  ;;  %v14083_v40 = vld [vmem:[#allocation73_spill] sm:$0xff] }
 0x869   : > { %v9372_v35 = vpop.f32.mrf.mxu0  ;;  %v14093_v49 = vld [vmem:[#allocation77_spill] sm:$0xff] }
 0x86a   : > { %v5604_v22 = vadd.f32 %v5603_v1, %v5515_v59  ;;  %v14077_v59 = vld [vmem:[#allocation75_spill] sm:$0xff] }
 0x880   : > { %v5809_v29 = vpop.f32.mrf.mxu1 }
 0x882   : > { %v9477_v31 = vpop.f32.mrf.mxu1 }
 0x888   : > { %v5722_v13 = vpop.f32.mrf.mxu0 }
 0x889   : > { %v5723_v4 = vadd.f32 %v5722_v13, %v5604_v22  ;;  %v14078_v22 = vld [vmem:[#allocation87_spill] sm:$0xff]  ;;  %v14079_v13 = vld [vmem:[#allocation88_spill] sm:$0xff] }
 0x88a   : > { %v9442_v38 = vpop.f32.mrf.mxu0 }
 0x88b   : > { %v5810_v28 = vadd.f32 %v5809_v29, %v5723_v4  ;;  %v14080_v4 = vld [vmem:[#allocation72_spill] sm:$0xff]  ;;  %v14081_v38 = vld [vmem:[#allocation70_spill] sm:$0xff] }
 0x88d   : > { %9501 = vrsqrt.f32 %v5810_v28  ;;  %v14082_v28 = vld [vmem:[#allocation69_spill] sm:$0xff] }
 0x89a   : > { %v9502_v23 = vpop.eup %9501 }
 0x89b   : > { %v5814_v6 = vmul.f32 %v9502_v23, %v11900_v25  ;;  %v14086_v23 = vld [vmem:[#allocation74_spill] sm:$0xff] }
 0x89d   : > { %v5819_v1 = vmul.f32 %v5818_v17, %v5814_v6  ;;  %v14085_v17 = vld [vmem:[#allocation82_spill] sm:$0xff]  ;;  %v14087_v6 = vld [vmem:[#allocation84_spill] sm:$0xff] }
 0x89f   : > { %v5824_v31 = vadd.f32 %v5823_v20, %v5819_v1  ;;  %v14088_v20 = vld [vmem:[#allocation86_spill] sm:$0xff]  ;;  %v14089_v1 = vld [vmem:[#allocation76_spill] sm:$0xff] }
 0x8a1   : > { %v12478_v52 = vand.u32 4294901760, %v5824_v31 }
 0x8a3   : > { %14076 = vst [vmem:[#allocation92_spill] sm:$0xff] %v12478_v52  ;;  %v12481_v29 = vsub.f32 %v5824_v31, %v12478_v52  ;;  %6209 = vmatmul.mubr.f32.vlgmr.msra.gmra.mxu1 %v12478_v52  ;;  %v14090_v31 = vld [vmem:[#allocation78_spill] sm:$0xff]  ;;  %v14095_v52 = vld [vmem:[#allocation83_spill] sm:$0xff] }
 0x8a4   : > { %6355 = vmatpush1.msra.mxu1 %v12059_v9  ;;  %6448 = vmatprep.mubr.f32.mxu1 %v13973_v61 }
 0x8a5   : > { %6357 = vmatprep.subr.mxu1 %v12067_v51  ;;  %v5974_v25 = vand.u32 4294901760, %v12481_v29 }
 0x8a6   : > { %6359 = vmatpush1.msra.mxu1 %v12076_v42 }
 0x8a7   : > { %6361 = vmatprep.subr.mxu1 %v12086_v7  ;;  %v5975_v36 = vsub.f32 %v12481_v29, %v5974_v25 }
 0x8a8   : > { %6363 = vmatpush1.msra.mxu1 %v12096_v57 }
 0x8a9   : > { %6365 = vmatprep.subr.mxu1 %v12109_v54  ;;  %v5976_v35 = vand.u32 4294901760, %v5975_v36  ;;  %v14091_v36 = vld [vmem:[#allocation85_spill] sm:$0xff] }
 0x8aa   : > { %6367 = vmatpush1.msra.mxu1 %v12122_v5 }
 0x8ab   : > { %6369 = vmatprep.subr.mxu1 %v12154_v63  ;;  %5977 = vmatmul.mubr.f32.vlgmr.msra.gmra.mxu0 %v5976_v35  ;;  %v14092_v35 = vld [vmem:[#allocation91_spill] sm:$0xff] }
 0x8ac   : > { %6220 = vmatpush1.msra.mxu0 %v12074_v50  ;;  %6371 = vmatpush1.msra.mxu1 %v12163_v47 }
 0x8ad   : > { %6223 = vmatprep.subr.mxu0 %v12084_v12  ;;  %6373 = vmatprep.subr.mxu1 %v12174_v43 }
 0x8ae   : > { %6226 = vmatpush1.msra.mxu0 %v12094_v24  ;;  %6375 = vmatpush1.msra.mxu1 %v12186_v39 }
 0x8af   : > { %6229 = vmatprep.subr.mxu0 %v12107_v37  ;;  %6377 = vmatprep.subr.mxu1 %v12196_v45 }
 0x8b0   : > { %6232 = vmatpush1.msra.mxu0 %v12120_v18  ;;  %6379 = vmatpush1.msra.mxu1 %v12206_v55 }
 0x8b1   : > { %6235 = vmatprep.subr.mxu0 %v12133_v2  ;;  %6381 = vmatprep.subr.mxu1 %v12216_v14 }
 0x8b2   : > { %6238 = vmatpush1.msra.mxu0 %v12144_v44  ;;  %6383 = vmatpush1.msra.mxu1 %v12226_v46 }
 0x8b3   : > { %6241 = vmatprep.subr.mxu0 %v12172_v56  ;;  %6385 = vmatprep.subr.mxu1 %v12258_v27 }
 0x8b4   : > { %6244 = vmatpush1.msra.mxu0 %v12184_v8  ;;  %6387 = vmatpush1.msra.mxu1 %v12267_v10 }
 0x8b5   : > { %6247 = vmatprep.subr.mxu0 %v12194_v15  ;;  %6389 = vmatprep.subr.mxu1 %v12278_v48 }
 0x8b6   : > { %6250 = vmatpush1.msra.mxu0 %v12204_v62  ;;  %6391 = vmatpush1.msra.mxu1 %v12290_v21 }
 0x8b7   : > { %6253 = vmatprep.subr.mxu0 %v12214_v26  ;;  %6393 = vmatprep.subr.mxu1 %v12300_v41 }
 0x8b8   : > { %6256 = vmatpush1.msra.mxu0 %v12224_v58  ;;  %6395 = vmatpush1.msra.mxu1 %v12310_v34 }
 0x8b9   : > { %6259 = vmatprep.subr.mxu0 %v12237_v30  ;;  %6397 = vmatprep.subr.mxu1 %v12320_v16 }
 0x8ba   : > { %6262 = vmatpush1.msra.mxu0 %v12248_v32  ;;  %6399 = vmatpush1.msra.mxu1 %v12330_v3 }
 0x8bb   : > { %6265 = vmatprep.subr.mxu0 %v12276_v19  ;;  %6401 = vmatprep.subr.mxu1 %v14077_v59 }
 0x8bc   : > { %6268 = vmatpush1.msra.mxu0 %v14078_v22  ;;  %6403 = vmatpush1.msra.mxu1 %v14079_v13 }
 0x8bd   : > { %6271 = vmatprep.subr.mxu0 %v14080_v4  ;;  %6405 = vmatprep.subr.mxu1 %v14081_v38 }
 0x8be   : > { %6274 = vmatpush1.msra.mxu0 %v14082_v28  ;;  %6407 = vmatpush1.msra.mxu1 %v12394_v60 }
 0x8bf   : > { %6277 = vmatprep.subr.mxu0 %v14083_v40  ;;  %6409 = vmatprep.subr.mxu1 %v14084_v0 }
 0x8c0   : > { %6280 = vmatpush1.msra.mxu0 %v14085_v17  ;;  %6411 = vmatpush1.msra.mxu1 %v12414_v53 }
 0x8c1   : > { %6283 = vmatprep.subr.mxu0 %v14086_v23  ;;  %6413 = vmatprep.subr.mxu1 %v12424_v33 }
 0x8c2   : > { %6286 = vmatpush1.msra.mxu0 %v14087_v6  ;;  %6415 = vmatpush1.msra.mxu1 %v14088_v20 }
 0x8c3   : > { %6289 = vmatprep.subr.mxu0 %v14089_v1  ;;  %6452 = vmatmul.mubr.f32.vlgmr.msra.gmra.mxu1 %v5974_v25  ;;  %v14096_v25 = vld [vmem:[#allocation89_spill] sm:$0xff] }
 0x8c4   : > { %6627 = vmatprep.subr.mxu1 %v14090_v31  ;;  %6292 = vmatpush1.msra.mxu0 %v14091_v36 }
 0x8c5   : > { %6629 = vmatpush1.msra.mxu1 %v12059_v9  ;;  %6295 = vmatprep.subr.mxu0 %v14092_v35  ;;  %v14097_v9 = vld [vmem:[#allocation90_spill] sm:$0xff] }
 0x8c6   : > { %6631 = vmatprep.subr.mxu1 %v12067_v51  ;;  %6298 = vmatpush1.msra.mxu0 %v14093_v49  ;;  %v14098_v51 = vld [vmem:[#allocation79_spill] sm:$0xff] }
 0x8c7   : > { %6633 = vmatpush1.msra.mxu1 %v12076_v42  ;;  %6301 = vmatprep.subr.mxu0 %v14094_v11  ;;  %v14099_v42 = vand.u32 4294901760, %v14098_v51 }
 0x8c8   : > { %6635 = vmatprep.subr.mxu1 %v12086_v7  ;;  %6304 = vmatpush1.msra.mxu0 %v14095_v52  ;;  %v14100_v7 = vand.u32 4294901760, %v12074_v50  ;;  %v14104_v50 = vand.u32 4294901760, %v12120_v18  ;;  %v14108_v18 = vand.u32 4294901760, %v12184_v8  ;;  %v14115_v8 = vand.u32 4294901760, %v12276_v19 }
 0x8c9   : > { %6637 = vmatpush1.msra.mxu1 %v12096_v57  ;;  %6307 = vmatprep.subr.mxu0 %v14096_v25  ;;  %v14101_v57 = vand.u32 4294901760, %v12084_v12  ;;  %v14105_v12 = vand.u32 4294901760, %v12133_v2  ;;  %v14109_v2 = vand.u32 4294901760, %v12194_v15  ;;  %v14118_v15 = vand.u32 4294901760, %v14082_v28 }
 0x8ca   : > { %6639 = vmatprep.subr.mxu1 %v12109_v54  ;;  %6310 = vmatpush1.msra.mxu0 %v14097_v9  ;;  %v14102_v54 = vand.u32 4294901760, %v12094_v24  ;;  %v14106_v24 = vand.u32 4294901760, %v12144_v44  ;;  %v14110_v44 = vand.u32 4294901760, %v12204_v62  ;;  %v14120_v62 = vand.u32 4294901760, %v14085_v17 }
 0x8cb   : > { %6343 = vmatprep.mubr.f32.mxu0 %v13973_v61  ;;  %6641 = vmatpush1.msra.mxu1 %v12122_v5  ;;  %v14103_v5 = vand.u32 4294901760, %v12107_v37  ;;  %v14107_v37 = vand.u32 4294901760, %v12172_v56  ;;  %v14113_v56 = vand.u32 4294901760, %v12237_v30  ;;  %v14126_v30 = vand.u32 4294901760, %v14092_v35 }
 0x8cc   : > { %6346 = vmatmul.mubr.f32.vlgmr.msra.gmra.mxu0 %v12481_v29  ;;  %6461 = vmatprep.subr.mxu0 %v14099_v42  ;;  %v14131_v19 = vand.u32 4294901760, %v14097_v9 }
 0x8cd   : > { %6643 = vmatprep.subr.mxu1 %v12154_v63  ;;  %6465 = vmatpush1.msra.mxu0 %v14100_v7  ;;  %v14111_v63 = vand.u32 4294901760, %v12214_v26  ;;  %v14122_v26 = vand.u32 4294901760, %v14087_v6 }
 0x8ce   : > { %6645 = vmatpush1.msra.mxu1 %v12163_v47  ;;  %6469 = vmatprep.subr.mxu0 %v14101_v57  ;;  %v14112_v47 = vand.u32 4294901760, %v12224_v58  ;;  %v14124_v58 = vld [vmem:[#allocation92_spill] sm:$0xff]  ;;  %v6751_v57 = vld [vmem:[%s13280_s11 + $0x58] sm:$0xff] }
 0x8cf   : > { %6647 = vmatprep.subr.mxu1 %v12174_v43  ;;  %6473 = vmatpush1.msra.mxu0 %v14102_v54  ;;  %v14114_v43 = vand.u32 4294901760, %v12248_v32  ;;  %v14127_v32 = vand.u32 4294901760, %v14093_v49 }
 0x8d0   : > { %6649 = vmatpush1.msra.mxu1 %v12186_v39  ;;  %6477 = vmatprep.subr.mxu0 %v14103_v5  ;;  %v14116_v39 = vand.u32 4294901760, %v14078_v22 }
 0x8d1   : > { %6651 = vmatprep.subr.mxu1 %v12196_v45  ;;  %6481 = vmatpush1.msra.mxu0 %v14104_v50  ;;  %v14119_v45 = vand.u32 4294901760, %v14083_v40  ;;  %v6768_v40 = vld [vmem:[%s13280_s11 + $0xe0] sm:$0xff] }
 0x8d2   : > { %6653 = vmatpush1.msra.mxu1 %v12206_v55  ;;  %6485 = vmatprep.subr.mxu0 %v14105_v12  ;;  %v14121_v55 = vand.u32 4294901760, %v14086_v23  ;;  %v12709_v6 = vand.u32 4294901760, %v6768_v40 }
 0x8d3   : > { %6655 = vmatprep.subr.mxu1 %v12216_v14  ;;  %6489 = vmatpush1.msra.mxu0 %v14106_v24  ;;  %v14123_v14 = vand.u32 4294901760, %v14089_v1  ;;  %v6766_v24 = vld [vmem:[%s13280_s11 + $0xd0] sm:$0xff] }
 0x8d4   : > { %6657 = vmatpush1.msra.mxu1 %v12226_v46  ;;  %6493 = vmatprep.subr.mxu0 %v14107_v37  ;;  %v14125_v46 = vand.u32 4294901760, %v14091_v36  ;;  %v12733_v7 = vsub.f32 %v6768_v40, %v12709_v6 }
 0x8d5   : > { %6659 = vmatprep.subr.mxu1 %v12258_v27  ;;  %6497 = vmatpush1.msra.mxu0 %v14108_v18  ;;  %v14129_v27 = vand.u32 4294901760, %v14095_v52  ;;  %v6769_v52 = vld [vmem:[%s13280_s11 + $0xe8] sm:$0xff] }
 0x8d6   : > { %6661 = vmatpush1.msra.mxu1 %v12267_v10  ;;  %6501 = vmatprep.subr.mxu0 %v14109_v2  ;;  %v14130_v10 = vand.u32 4294901760, %v14096_v25  ;;  %v12686_v22 = vand.u32 4294901760, %v6769_v52  ;;  %v6767_v25 = vld [vmem:[%s13280_s11 + $0xd8] sm:$0xff]  ;;  %v13641_v2 = vand.u32 4294901760, %v12733_v7 }
 0x8d7   : > { %6663 = vmatprep.subr.mxu1 %v12278_v48  ;;  %6505 = vmatpush1.msra.mxu0 %v14110_v44  ;;  %v6755_v48 = vld [vmem:[%s13280_s11 + $0x78] sm:$0xff]  ;;  %v12754_v44 = vand.u32 4294901760, %v6767_v25 }
 0x8d8   : > { %6665 = vmatpush1.msra.mxu1 %v12290_v21  ;;  %6509 = vmatprep.subr.mxu0 %v14111_v63  ;;  %v14128_v21 = vand.u32 4294901760, %v14094_v11  ;;  %v12707_v23 = vsub.f32 %v6769_v52, %v12686_v22  ;;  %v6750_v63 = vld [vmem:[%s13280_s11 + $0x50] sm:$0xff] }
 0x8d9   : > { %6667 = vmatprep.subr.mxu1 %v12300_v41  ;;  %6513 = vmatpush1.msra.mxu0 %v14112_v47  ;;  %v14117_v41 = vand.u32 4294901760, %v14080_v4 }
 0x8da   : > { %6669 = vmatpush1.msra.mxu1 %v12310_v34  ;;  %6517 = vmatprep.subr.mxu0 %v14113_v56  ;;  %v6770_v34 = vld [vmem:[%s13280_s11 + $0xf0] sm:$0xff]  ;;  %v13643_v42 = vand.u32 4294901760, %v12707_v23 }
 0x8db   : > { %6671 = vmatprep.subr.mxu1 %v12320_v16  ;;  %6521 = vmatpush1.msra.mxu0 %v14114_v43 }
 0x8dc   : > { %6673 = vmatpush1.msra.mxu1 %v12330_v3  ;;  %6525 = vmatprep.subr.mxu0 %v14115_v8  ;;  %v12659_v3 = vand.u32 4294901760, %v6755_v48  ;;  %v7018_v18 = vsub.f32 %v12707_v23, %v13643_v42  ;;  %v12763_v8 = vand.u32 4294901760, %v6751_v57 }
 0x8dd   : > { %6675 = vmatprep.subr.mxu1 %v14077_v59  ;;  %6529 = vmatpush1.msra.mxu0 %v14116_v39  ;;  %v6765_v39 = vld [vmem:[%s13280_s11 + $0xc8] sm:$0xff] }
 0x8de   : > { %6677 = vmatpush1.msra.mxu1 %v14079_v13  ;;  %6533 = vmatprep.subr.mxu0 %v14117_v41  ;;  %v6753_v13 = vld [vmem:[%s13280_s11 + $0x68] sm:$0xff]  ;;  %v7019_v41 = vand.u32 4294901760, %v7018_v18 }
 0x8df   : > { %6679 = vmatprep.subr.mxu1 %v14081_v38  ;;  %6537 = vmatpush1.msra.mxu0 %v14118_v15  ;;  %v12696_v28 = vand.u32 4294901760, %v6753_v13  ;;  %v7025_v15 = vsub.f32 %v12733_v7, %v13641_v2 }
 0x8e0   : > { %6681 = vmatpush1.msra.mxu1 %v12394_v60  ;;  %6541 = vmatprep.subr.mxu0 %v14119_v45  ;;  %v12667_v60 = vand.u32 4294901760, %v6770_v34  ;;  %v12772_v45 = vsub.f32 %v6767_v25, %v12754_v44 }
 0x8e1   : > { %6683 = vmatprep.subr.mxu1 %v14084_v0  ;;  %6545 = vmatpush1.msra.mxu0 %v14120_v62  ;;  %v12720_v36 = vsub.f32 %v6753_v13, %v12696_v28  ;;  %v12774_v62 = vand.u32 4294901760, %v6766_v24 }
 0x8e2   : > { %6685 = vmatpush1.msra.mxu1 %v12414_v53  ;;  %6549 = vmatprep.subr.mxu0 %v14121_v55  ;;  %v6754_v53 = vld [vmem:[%s13280_s11 + $0x70] sm:$0xff]  ;;  %v12684_v59 = vsub.f32 %v6770_v34, %v12667_v60  ;;  %v6749_v55 = vld [vmem:[%s13280_s11 + $0x48] sm:$0xff] }
 0x8e3   : > { %6687 = vmatprep.subr.mxu1 %v12424_v33  ;;  %6553 = vmatpush1.msra.mxu0 %v14122_v26  ;;  %v12674_v33 = vsub.f32 %v6755_v48, %v12659_v3  ;;  %v12676_v11 = vand.u32 4294901760, %v6754_v53  ;;  %v13642_v50 = vand.u32 4294901760, %v12720_v36 }
 0x8e4   : > { %6689 = vmatpush1.msra.mxu1 %v14088_v20  ;;  %6722 = vmatprep.mubr.f32.mxu1 %v13973_v61  ;;  %v13646_v17 = vand.u32 4294901760, %v12684_v59  ;;  %v6752_v20 = vld [vmem:[%s13280_s11 + $0x60] sm:$0xff] }
 0x8e5   : > { %6557 = vmatprep.subr.mxu0 %v14123_v14  ;;  %6724 = vmatmul.mubr.f32.vlgmr.msra.gmra.mxu1 %v14124_v58  ;;  %v13648_v4 = vand.u32 4294901760, %v12674_v33  ;;  %v12694_v38 = vsub.f32 %v6754_v53, %v12676_v11  ;;  %v12722_v35 = vand.u32 4294901760, %v6752_v20  ;;  %v6906_v56 = vsub.f32 %v12720_v36, %v13642_v50 }
 0x8e6   : > { %6561 = vmatpush1.msra.mxu0 %v14125_v46  ;;  %6618 = vmatprep.mubr.f32.mxu0 %v13973_v61  ;;  %v6771_v61 = vld [vmem:[%s13280_s11 + $0xf8] sm:$0xff]  ;;  %v7011_v51 = vsub.f32 %v12684_v59, %v13646_v17  ;;  %v12786_v46 = vand.u32 4294901760, %v6750_v63  ;;  %v12806_v53 = vand.u32 4294901760, %v6749_v55 }
 0x8e7   : > { %6565 = vmatprep.subr.mxu0 %v14126_v30  ;;  %v12654_v49 = vand.u32 4294901760, %v6771_v61  ;;  %v6892_v1 = vsub.f32 %v12674_v33, %v13648_v4  ;;  %v13645_v31 = vand.u32 4294901760, %v12694_v38  ;;  %v12744_v12 = vsub.f32 %v6752_v20, %v12722_v35  ;;  %v6764_v30 = vld [vmem:[%s13280_s11 + $0xc0] sm:$0xff] }
 0x8e8   : > { %6569 = vmatpush1.msra.mxu0 %v14127_v32  ;;  %v7012_v37 = vand.u32 4294901760, %v7011_v51  ;;  %v6907_v26 = vand.u32 4294901760, %v6906_v56  ;;  %v7026_v32 = vand.u32 4294901760, %v7025_v15  ;;  %v12804_v34 = vsub.f32 %v6750_v63, %v12786_v46  ;;  %v6763_v51 = vld [vmem:[%s13280_s11 + $0xb8] sm:$0xff] }
 0x8e9   : > { %6573 = vmatprep.subr.mxu0 %v14128_v21  ;;  %14132 = vst [vmem:[#allocation93_spill] sm:$0xff] %v12654_v49  ;;  %v12665_v16 = vsub.f32 %v6771_v61, %v12654_v49  ;;  %v6893_v54 = vand.u32 4294901760, %v6892_v1  ;;  %v6899_v5 = vsub.f32 %v12694_v38, %v13645_v31  ;;  %v13639_v43 = vand.u32 4294901760, %v12744_v12 }
 0x8ea   : > { %6577 = vmatpush1.msra.mxu0 %v14129_v27  ;;  %v13637_v21 = vand.u32 4294901760, %v12772_v45  ;;  %v12794_v27 = vsub.f32 %v6766_v24, %v12774_v62  ;;  %v13633_v1 = vand.u32 4294901760, %v12804_v34  ;;  %v12824_v25 = vsub.f32 %v6749_v55, %v12806_v53 }
 0x8eb   : > { %6581 = vmatprep.subr.mxu0 %v14130_v10  ;;  %14133 = vst [vmem:[#allocation71_spill] sm:$0xff] %v12665_v16  ;;  %v13649_v29 = vand.u32 4294901760, %v12665_v16  ;;  %v6900_v47 = vand.u32 4294901760, %v6899_v5  ;;  %v6913_v14 = vsub.f32 %v12744_v12, %v13639_v43  ;;  %v12796_v10 = vand.u32 4294901760, %v6765_v39 }
 0x8ec   : > { %6585 = vmatpush1.msra.mxu0 %v14131_v19  ;;  %v6748_v19 = vld [vmem:[%s13280_s11 + $0x40] sm:$0xff]  ;;  %v7032_v52 = vsub.f32 %v12772_v45, %v13637_v21  ;;  %v13635_v13 = vand.u32 4294901760, %v12794_v27  ;;  %v6927_v63 = vsub.f32 %v12804_v34, %v13633_v1 }
 0x8ed   : > { %6620 = vmatmul.mubr.f32.vlgmr.msra.gmra.mxu0 %v14124_v58  ;;  %8356 = vmatprep.subr.mxu0 %v12654_v49  ;;  %v7004_v0 = vsub.f32 %v12665_v16, %v13649_v29  ;;  %v12784_v58 = vsub.f32 %v6751_v57, %v12763_v8  ;;  %v6914_v61 = vand.u32 4294901760, %v6913_v14  ;;  %v12814_v40 = vsub.f32 %v6765_v39, %v12796_v10  ;;  %v6762_v39 = vld [vmem:[%s13280_s11 + $0xb0] sm:$0xff] }
 0x8ee   : > { %8357 = vmatpush3.msra.mxu0 %v12659_v3  ;;  %v7033_v57 = vand.u32 4294901760, %v7032_v52  ;;  %v6746_v14 = vld [vmem:[%s13280_s11 + $0x30] sm:$0xff]  ;;  %v6761_v52 = vld [vmem:[%s13280_s11 + $0xa8] sm:$0xff] }
 0x8ef   : > { %8358 = vmatprep.subr.mxu0 %v12667_v60  ;;  %v7005_v9 = vand.u32 4294901760, %v7004_v0  ;;  %v13636_v48 = vand.u32 4294901760, %v12784_v58  ;;  %v12816_v0 = vand.u32 4294901760, %v6764_v30  ;;  %v13632_v5 = vand.u32 4294901760, %v12814_v40 }
 0x8f0   : > { %8359 = vmatpush3.msra.mxu0 %v12676_v11  ;;  %v12900_v1 = vand.u32 4294901760, %v6761_v52 }
 0x8f1   : > { %8360 = vmatprep.subr.mxu0 %v12686_v22  ;;  %8391 = vmatprep.subr.mxu1 %v7005_v9  ;;  %v6920_v20 = vsub.f32 %v12784_v58, %v13636_v48  ;;  %v12826_v9 = vand.u32 4294901760, %v6748_v19  ;;  %v12837_v24 = vsub.f32 %v6764_v30, %v12816_v0  ;;  %v7046_v15 = vsub.f32 %v12814_v40, %v13632_v5 }
 0x8f2   : > { %8361 = vmatpush3.msra.mxu0 %v12696_v28  ;;  %8392 = vmatpush3.msra.mxu1 %v6893_v54  ;;  %v7039_v54 = vsub.f32 %v12794_v27, %v13635_v13  ;;  %v6928_v30 = vand.u32 4294901760, %v6927_v63  ;;  %v6745_v63 = vld [vmem:[%s13280_s11 + $0x28] sm:$0xff]  ;;  %v12918_v21 = vsub.f32 %v6761_v52, %v12900_v1  ;;  %v6759_v52 = vld [vmem:[%s13280_s11 + $0x98] sm:$0xff] }
 0x8f3   : > { %8362 = vmatprep.subr.mxu0 %v12709_v6  ;;  %8393 = vmatprep.subr.mxu1 %v7012_v37  ;;  %v6747_v37 = vld [vmem:[%s13280_s11 + $0x38] sm:$0xff]  ;;  %v6921_v18 = vand.u32 4294901760, %v6920_v20  ;;  %v12848_v56 = vsub.f32 %v6748_v19, %v12826_v9  ;;  %v13631_v55 = vand.u32 4294901760, %v12837_v24  ;;  %v7047_v20 = vand.u32 4294901760, %v7046_v15 }
 0x8f4   : > { %8363 = vmatpush3.msra.mxu0 %v12722_v35  ;;  %8394 = vmatpush3.msra.mxu1 %v6900_v47  ;;  %v13630_v47 = vand.u32 4294901760, %v12824_v25  ;;  %14137 = vst [vmem:[#allocation34_spill] sm:$0xff] %v12918_v21 }
 0x8f5   : > { %8364 = vmatprep.subr.mxu0 %v12754_v44  ;;  %8395 = vmatprep.subr.mxu1 %v7019_v41  ;;  %v7040_v41 = vand.u32 4294901760, %v7039_v54  ;;  %v13634_v19 = vand.u32 4294901760, %v12848_v56 }
 0x8f6   : > { %8365 = vmatpush3.msra.mxu0 %v12763_v8  ;;  %8396 = vmatpush3.msra.mxu1 %v6907_v26  ;;  %v12858_v26 = vand.u32 4294901760, %v6763_v51 }
 0x8f7   : > { %8366 = vmatprep.subr.mxu0 %v12774_v62  ;;  %8397 = vmatprep.subr.mxu1 %v7026_v32  ;;  %v6934_v32 = vsub.f32 %v12824_v25, %v13630_v47 }
 0x8f8   : > { %8367 = vmatpush3.msra.mxu0 %v12786_v46  ;;  %8398 = vmatpush3.msra.mxu1 %v6914_v61  ;;  %v12867_v61 = vand.u32 4294901760, %v6747_v37  ;;  %v12876_v54 = vsub.f32 %v6763_v51, %v12858_v26  ;;  %v6760_v51 = vld [vmem:[%s13280_s11 + $0xa0] sm:$0xff] }
 0x8f9   : > { %8368 = vmatprep.subr.mxu0 %v12796_v10  ;;  %8399 = vmatprep.subr.mxu1 %v7033_v57  ;;  %v7053_v57 = vsub.f32 %v12837_v24, %v13631_v55  ;;  %v6935_v47 = vand.u32 4294901760, %v6934_v32  ;;  %v12890_v55 = vand.u32 4294901760, %v6746_v14 }
 0x8fa   : > { %8369 = vmatpush3.msra.mxu0 %v12806_v53  ;;  %8400 = vmatpush3.msra.mxu1 %v6921_v18  ;;  %v12878_v18 = vand.u32 4294901760, %v6762_v39  ;;  %v12888_v15 = vsub.f32 %v6747_v37, %v12867_v61  ;;  %v6744_v37 = vld [vmem:[%s13280_s11 + $0x20] sm:$0xff] }
 0x8fb   : > { %8370 = vmatprep.subr.mxu0 %v12816_v0  ;;  %8401 = vmatprep.subr.mxu1 %v7040_v41  ;;  %v6941_v41 = vsub.f32 %v12848_v56, %v13634_v19  ;;  %v7054_v5 = vand.u32 4294901760, %v7053_v57  ;;  %v12910_v57 = vand.u32 4294901760, %v6745_v63 }
 0x8fc   : > { %8371 = vmatpush3.msra.mxu0 %v12826_v9  ;;  %8402 = vmatpush3.msra.mxu1 %v6928_v30  ;;  %14134 = vst [vmem:[#allocation24_spill] sm:$0xff] %v12888_v15  ;;  %v13638_v30 = vand.u32 4294901760, %v12876_v54  ;;  %v12898_v32 = vsub.f32 %v6762_v39, %v12878_v18  ;;  %v13640_v13 = vand.u32 4294901760, %v12888_v15 }
 0x8fd   : > { %8372 = vmatprep.subr.mxu0 %v12858_v26  ;;  %8403 = vmatprep.subr.mxu1 %v7047_v20  ;;  %v6942_v19 = vand.u32 4294901760, %v6941_v41  ;;  %v12908_v20 = vsub.f32 %v6746_v14, %v12890_v55  ;;  %v12928_v41 = vsub.f32 %v6745_v63, %v12910_v57  ;;  %v6743_v63 = vld [vmem:[%s13280_s11 + $0x18] sm:$0xff] }
 0x8fe   : > { %8373 = vmatpush3.msra.mxu0 %v12867_v61  ;;  %14135 = vst [vmem:[#allocation25_spill] sm:$0xff] %v12898_v32  ;;  %8404 = vmatpush3.msra.mxu1 %v6935_v47  ;;  %v7060_v39 = vsub.f32 %v12876_v54, %v13638_v30  ;;  %v13644_v48 = vand.u32 4294901760, %v12898_v32  ;;  %v12920_v47 = vand.u32 4294901760, %v6760_v51  ;;  %v6948_v14 = vsub.f32 %v12888_v15, %v13640_v13 }
 0x8ff   : > { %8374 = vmatprep.subr.mxu0 %v12878_v18  ;;  %14136 = vst [vmem:[#allocation28_spill] sm:$0xff] %v12908_v20  ;;  %8405 = vmatprep.subr.mxu1 %v7054_v5  ;;  %v13647_v5 = vand.u32 4294901760, %v12908_v20  ;;  %14138 = vst [vmem:[#allocation2_spill] sm:$0xff] %v12928_v41  ;;  %v12930_v30 = vand.u32 4294901760, %v6744_v37  ;;  %v13650_v13 = vand.u32 4294901760, %v12918_v21  ;;  %v13655_v42 = vand.u32 4294901760, %v12928_v41 }
 0x900   : > { %8375 = vmatpush3.msra.mxu0 %v12890_v55  ;;  %8406 = vmatpush3.msra.mxu1 %v6942_v19  ;;  %v7061_v43 = vand.u32 4294901760, %v7060_v39  ;;  %v7067_v19 = vsub.f32 %v12898_v32, %v13644_v48  ;;  %v12941_v2 = vsub.f32 %v6760_v51, %v12920_v47  ;;  %v6949_v50 = vand.u32 4294901760, %v6948_v14  ;;  %v6758_v51 = vld [vmem:[%s13280_s11 + $0x90] sm:$0xff] }
 0x901   : > { %8376 = vmatprep.subr.mxu0 %v12900_v1  ;;  %v6955_v39 = vsub.f32 %v12908_v20, %v13647_v5  ;;  %v12952_v48 = vsub.f32 %v6744_v37, %v12930_v30  ;;  %v7074_v14 = vsub.f32 %v12918_v21, %v13650_v13  ;;  %v12962_v5 = vand.u32 4294901760, %v6759_v52  ;;  %v6742_v37 = vld [vmem:[%s13280_s11 + $0x10] sm:$0xff]  ;;  %v6757_v13 = vld [vmem:[%s13280_s11 + $0x88] sm:$0xff] }
 0x902   : > { %8377 = vmatpush3.msra.mxu0 %v12910_v57  ;;  %14139 = vst [vmem:[#allocation37_spill] sm:$0xff] %v12941_v2  ;;  %8407 = vmatprep.subr.mxu1 %v7061_v43  ;;  %v7068_v31 = vand.u32 4294901760, %v7067_v19  ;;  %v6962_v29 = vsub.f32 %v12928_v41, %v13655_v42  ;;  %v12971_v19 = vand.u32 4294901760, %v6743_v63  ;;  %v14143_v21 = vand.u32 4294901760, %v12941_v2  ;;  %v6741_v42 = vld [vmem:[%s13280_s11 + $0x8] sm:$0xff] }
 0x903   : > { %8378 = vmatprep.subr.mxu0 %v12920_v47  ;;  %14140 = vst [vmem:[#allocation3_spill] sm:$0xff] %v12952_v48  ;;  %14141 = vst [vmem:[#allocation42_spill] sm:$0xff] %v12962_v5  ;;  %8408 = vmatpush3.msra.mxu1 %v6949_v50  ;;  %v6956_v4 = vand.u32 4294901760, %v6955_v39  ;;  %v7075_v17 = vand.u32 4294901760, %v7074_v14  ;;  %v12980_v50 = vsub.f32 %v6759_v52, %v12962_v5  ;;  %v12982_v39 = vand.u32 4294901760, %v6758_v51  ;;  %v6756_v52 = vld [vmem:[%s13280_s11 + $0x80] sm:$0xff] }
 0x904   : > { %8379 = vmatpush3.msra.mxu0 %v12930_v30  ;;  %14142 = vst [vmem:[#allocation4_spill] sm:$0xff] %v12971_v19  ;;  %8409 = vmatprep.subr.mxu1 %v7068_v31  ;;  %v7081_v20 = vsub.f32 %v12941_v2, %v14143_v21  ;;  %v6963_v43 = vand.u32 4294901760, %v6962_v29  ;;  %v14146_v31 = vand.u32 4294901760, %v12952_v48  ;;  %v12992_v41 = vsub.f32 %v6743_v63, %v12971_v19  ;;  %v6740_v63 = vld [vmem:[%s13280_s11] sm:$0xff] }
 0x905   : > { %14144 = vst [vmem:[#allocation46_spill] sm:$0xff] %v12980_v50  ;;  %14145 = vst [vmem:[#allocation5_spill] sm:$0xff] %v12982_v39  ;;  %8380 = vmatprep.subr.mxu0 %v12962_v5  ;;  %8410 = vmatpush3.msra.mxu1 %v6956_v4  ;;  %v12994_v21 = vand.u32 4294901760, %v6742_v37  ;;  %v13668_v4 = vand.u32 4294901760, %v12980_v50  ;;  %v13002_v29 = vsub.f32 %v6758_v51, %v12982_v39  ;;  %v13004_v32 = vand.u32 4294901760, %v6757_v13 }
 0x906   : > { %v6969_v14 = vsub.f32 %v12952_v48, %v14146_v31  ;;  %14147 = vst [vmem:[#allocation50_spill] sm:$0xff] %v12992_v41  ;;  %8381 = vmatpush3.msra.mxu0 %v12971_v19  ;;  %8411 = vmatprep.subr.mxu1 %v7075_v17  ;;  %v7082_v2 = vand.u32 4294901760, %v7081_v20  ;;  %v13673_v48 = vand.u32 4294901760, %v12992_v41  ;;  %v13014_v20 = vand.u32 4294901760, %v6741_v42 }
 0x907   : > { %14148 = vst [vmem:[#allocation6_spill] sm:$0xff] %v12994_v21  ;;  %14149 = vst [vmem:[#allocation53_spill] sm:$0xff] %v13002_v29  ;;  %8382 = vmatprep.subr.mxu0 %v12982_v39  ;;  %8412 = vmatpush3.msra.mxu1 %v6963_v43  ;;  %v13012_v17 = vsub.f32 %v6742_v37, %v12994_v21  ;;  %v7088_v51 = vsub.f32 %v12980_v50, %v13668_v4  ;;  %v13676_v19 = vand.u32 4294901760, %v13002_v29 }
 0x908   : > { %14150 = vst [vmem:[#allocation7_spill] sm:$0xff] %v13004_v32  ;;  %v6970_v31 = vand.u32 4294901760, %v6969_v14  ;;  %14152 = vst [vmem:[#allocation10_spill] sm:$0xff] %v13014_v20  ;;  %8383 = vmatpush3.msra.mxu0 %v12994_v21  ;;  %8413 = vmatprep.subr.mxu1 %v7082_v2  ;;  %v13022_v39 = vsub.f32 %v6757_v13, %v13004_v32  ;;  %v13024_v43 = vand.u32 4294901760, %v6756_v52  ;;  %v13034_v4 = vand.u32 4294901760, %v6740_v63 }
 0x909   : > { %14151 = vst [vmem:[#allocation56_spill] sm:$0xff] %v13012_v17  ;;  %8384 = vmatprep.subr.mxu0 %v13004_v32  ;;  %v6976_v37 = vsub.f32 %v12992_v41, %v13673_v48  ;;  %v13679_v2 = vand.u32 4294901760, %v13012_v17  ;;  %v13032_v14 = vsub.f32 %v6741_v42, %v13014_v20  ;;  %v7089_v13 = vand.u32 4294901760, %v7088_v51 }
 0x90a   : > { %14153 = vst [vmem:[#allocation59_spill] sm:$0xff] %v13022_v39  ;;  %14154 = vst [vmem:[#allocation17_spill] sm:$0xff] %v13024_v43  ;;  %8414 = vmatpush3.msra.mxu1 %v6970_v31  ;;  %8385 = vmatpush3.msra.mxu0 %v13014_v20  ;;  %v7095_v50 = vsub.f32 %v13002_v29, %v13676_v19  ;;  %v13682_v31 = vand.u32 4294901760, %v13022_v39  ;;  %v13042_v32 = vsub.f32 %v6756_v52, %v13024_v43 }
 0x90b   : > { %14155 = vst [vmem:[#allocation61_spill] sm:$0xff] %v13032_v14  ;;  %14156 = vst [vmem:[#allocation19_spill] sm:$0xff] %v13034_v4  ;;  %8386 = vmatprep.subr.mxu0 %v13024_v43  ;;  %v6977_v48 = vand.u32 4294901760, %v6976_v37  ;;  %v6983_v42 = vsub.f32 %v13012_v17, %v13679_v2  ;;  %v13684_v41 = vand.u32 4294901760, %v13032_v14  ;;  %v13050_v51 = vsub.f32 %v6740_v63, %v13034_v4 }
 0x90c   : > { %14157 = vst [vmem:[#allocation63_spill] sm:$0xff] %v13042_v32  ;;  %8387 = vmatpush3.msra.mxu0 %v13034_v4  ;;  %8415 = vmatprep.subr.mxu1 %v7089_v13  ;;  %v7096_v19 = vand.u32 4294901760, %v7095_v50  ;;  %v7102_v52 = vsub.f32 %v13022_v39, %v13682_v31  ;;  %v13683_v29 = vand.u32 4294901760, %v13042_v32 }
 0x90d   : > { %14158 = vst [vmem:[#allocation23_spill] sm:$0xff] %v13050_v51  ;;  %8426 = vmatprep.subr.mxu0 %v12665_v16  ;;  %8416 = vmatpush3.msra.mxu1 %v6977_v48  ;;  %v6984_v37 = vand.u32 4294901760, %v6983_v42  ;;  %v6990_v2 = vsub.f32 %v13032_v14, %v13684_v41  ;;  %v13686_v63 = vand.u32 4294901760, %v13050_v51 }
 0x90e   : > { %8417 = vmatprep.subr.mxu1 %v7096_v19  ;;  %v7103_v17 = vand.u32 4294901760, %v7102_v52  ;;  %v7109_v50 = vsub.f32 %v13042_v32, %v13683_v29  ;;  %v9510_v19 = vld [vmem:[%s13272_s3] sm:$0xf]  ;;  %v14159_v52 = vld [vmem:[#allocation68_spill] sm:$0xff] }
 0x90f   : > { %8418 = vmatpush3.msra.mxu1 %v6984_v37  ;;  %v6991_v13 = vand.u32 4294901760, %v6990_v2  ;;  %v6997_v31 = vsub.f32 %v13050_v51, %v13686_v63  ;;  %v5860_v29 = vrot.slane %v9510_v19, %v14159_v52  ;;  %v14160_v37 = vld [vmem:[#allocation33_spill] sm:$0xff] }
 0x910   : > { %8419 = vmatprep.subr.mxu1 %v7103_v17  ;;  %v7110_v48 = vand.u32 4294901760, %v7109_v50  ;;  %v14161_v2 = vsub.s32 3, %v14160_v37 }
 0x911   : > { %8420 = vmatpush3.msra.mxu1 %v6991_v13  ;;  %v6998_v42 = vand.u32 4294901760, %v6997_v31  ;;  %v5870_v63 = vrot.slane %v5860_v29, %v14159_v52 }
 0x912   : > { %8421 = vmatprep.subr.mxu1 %v7110_v48  ;;  %v5864_v41 = vrot.slane %v9510_v19, %v14161_v2 }
 0x913   : > { %8422 = vmatpush3.msra.mxu1 %v6998_v42 }
 0x914   : > { %8461 = vmatprep.subr.mxu1 %v12654_v49  ;;  %v5874_v17 = vrot.slane %v5864_v41, %v14159_v52 }
 0x963   : > { %v6210_v50 = vpop.f32.mrf.mxu1 }
 0x965   : > { %v6212_v51 = vpop.f32.mrf.mxu1 }
 0x96b   : > { %v5978_v16 = vpop.f32.mrf.mxu0 }
 0x96c   : > { %v5979_v13 = vadd.f32 %v5978_v16, %v5870_v63 }
 0x96d   : > { %v5980_v31 = vpop.f32.mrf.mxu0 }
 0x96e   : > { %v5981_v42 = vadd.f32 %v5980_v31, %v5874_v17  ;;  %v6211_v32 = vadd.f32 %v6210_v50, %v5979_v13 }
 0x970   : > { %v6213_v4 = vadd.f32 %v6212_v51, %v5981_v42 }
 0x983   : > { %v6453_v14 = vpop.f32.mrf.mxu1 }
 0x985   : > { %v6455_v20 = vpop.f32.mrf.mxu1 }
 0x98c   : > { %v6347_v48 = vpop.f32.mrf.mxu0 }
 0x98d   : > { %v6348_v49 = vadd.f32 %v6347_v48, %v6211_v32 }
 0x98e   : > { %v6349_v39 = vpop.f32.mrf.mxu0 }
 0x98f   : > { %v6350_v43 = vadd.f32 %v6349_v39, %v6213_v4  ;;  %v6454_v37 = vadd.f32 %v6453_v14, %v6348_v49 }
 0x991   : > { %v6456_v29 = vadd.f32 %v6455_v20, %v6350_v43 }
 0x9a5   : > { %v6725_v19 = vpop.f32.mrf.mxu1 }
 0x9a7   : > { %v6727_v5 = vpop.f32.mrf.mxu1 }
 0x9ad   : > { %v6621_v2 = vpop.f32.mrf.mxu0 }
 0x9ae   : > { %v6622_v21 = vadd.f32 %v6621_v2, %v6454_v37  ;;  %v14162_v2 = vld [vmem:[#allocation42_spill] sm:$0xff] }
 0x9af   : > { %v6623_v15 = vpop.f32.mrf.mxu0 }
 0x9b0   : > { %v6726_v41 = vadd.f32 %v6725_v19, %v6622_v21  ;;  %v6624_v52 = vadd.f32 %v6623_v15, %v6456_v29  ;;  %v14163_v29 = vld [vmem:[#allocation24_spill] sm:$0xff] }
 0x9b2   : > { %v6732_v16 = vmul.f32 0.70710677, %v6726_v41  ;;  %v6728_v63 = vadd.f32 %v6727_v5, %v6624_v52  ;;  %v6730_v31 = vmul.f32 0.5, %v6726_v41  ;;  %v14164_v41 = vld [vmem:[#allocation4_spill] sm:$0xff]  ;;  %v14165_v52 = vld [vmem:[#allocation25_spill] sm:$0xff] }
 0x9b4   : > { %9503 = verf.f32 %v6732_v16  ;;  %v6733_v17 = vmul.f32 0.70710677, %v6728_v63  ;;  %v6731_v4 = vmul.f32 0.5, %v6728_v63  ;;  %v14166_v16 = vld [vmem:[#allocation5_spill] sm:$0xff]  ;;  %v14167_v63 = vld [vmem:[#allocation28_spill] sm:$0xff] }
 0x9b6   : > { %9505 = verf.f32 %v6733_v17  ;;  %v14168_v17 = vld [vmem:[#allocation6_spill] sm:$0xff] }
 0x9c1   : > { %v9504_v50 = vpop.eup %9503 }
 0x9c2   : > { %v6736_v32 = vadd.f32 1.0, %v9504_v50  ;;  %v14169_v50 = vld [vmem:[#allocation34_spill] sm:$0xff] }
 0x9c3   : > { %v9506_v51 = vpop.eup %9505 }
 0x9c4   : > { %v6738_v39 = vmul.f32 %v6736_v32, %v6730_v31  ;;  %v6737_v49 = vadd.f32 1.0, %v9506_v51  ;;  %v14170_v31 = vld [vmem:[#allocation7_spill] sm:$0xff]  ;;  %v14171_v32 = vld [vmem:[#allocation2_spill] sm:$0xff] }
 0x9c5   : > { %v14172_v51 = vld [vmem:[#allocation10_spill] sm:$0xff] }
 0x9c6   : > { %v6739_v14 = vmul.f32 %v6737_v49, %v6731_v4  ;;  %v13077_v13 = vand.u32 4294901760, %v6738_v39  ;;  %v14174_v4 = vld [vmem:[#allocation17_spill] sm:$0xff]  ;;  %v14175_v49 = vld [vmem:[#allocation3_spill] sm:$0xff] }
 0x9c8   : > { %v13079_v20 = vand.u32 4294901760, %v6739_v14  ;;  %v13082_v15 = vsub.f32 %v6738_v39, %v13077_v13  ;;  %v14173_v39 = vld [vmem:[#allocation37_spill] sm:$0xff] }
 0x9ca   : > { %7113 = vmatprep.mubr.f32.mxu1 %v13079_v20  ;;  %v6873_v5 = vsub.f32 %v6739_v14, %v13079_v20  ;;  %v6880_v21 = vand.u32 4294901760, %v13082_v15  ;;  %v14176_v14 = vld [vmem:[#allocation19_spill] sm:$0xff] }
 0x9cb   : > { %7115 = vmatmul.mubr.f32.vlgmr.msra.gmra.mxu1 %v13077_v13 }
 0x9cc   : > { %8462 = vmatpush3.msra.mxu1 %v12659_v3  ;;  %v6874_v43 = vand.u32 4294901760, %v6873_v5  ;;  %v6881_v37 = vsub.f32 %v13082_v15, %v6880_v21 }
 0x9cd   : > { %8463 = vmatprep.subr.mxu1 %v12667_v60 }
 0x9ce   : > { %8464 = vmatpush3.msra.mxu1 %v12676_v11  ;;  %7357 = vmatprep.mubr.f32.mxu1 %v6874_v43  ;;  %v6875_v48 = vsub.f32 %v6873_v5, %v6874_v43  ;;  %v6882_v19 = vand.u32 4294901760, %v6881_v37  ;;  %v14178_v43 = vld [vmem:[#allocation93_spill] sm:$0xff]  ;;  %v14179_v37 = vld [vmem:[#allocation50_spill] sm:$0xff] }
 0x9cf   : > { %8465 = vmatprep.subr.mxu1 %v12686_v22 }
 0x9d0   : > { %8466 = vmatpush3.msra.mxu1 %v12696_v28  ;;  %v6876_v42 = vand.u32 4294901760, %v6875_v48  ;;  %v14180_v48 = vld [vmem:[#allocation53_spill] sm:$0xff] }
 0x9d1   : > { %8467 = vmatprep.subr.mxu1 %v12709_v6 }
 0x9d2   : > { %8468 = vmatpush3.msra.mxu1 %v12722_v35  ;;  %6877 = vmatprep.mubr.f32.mxu0 %v6876_v42  ;;  %v14181_v42 = vld [vmem:[#allocation56_spill] sm:$0xff] }
 0x9d3   : > { %8469 = vmatprep.subr.mxu1 %v12754_v44  ;;  %6883 = vmatmul.mubr.f32.vlgmr.msra.gmra.mxu0 %v6882_v19  ;;  %v14182_v19 = vld [vmem:[#allocation59_spill] sm:$0xff] }
 0x9d4   : > { %8427 = vmatpush3.msra.mxu0 %v12674_v33  ;;  %8470 = vmatpush3.msra.mxu1 %v12763_v8 }
 0x9d5   : > { %8428 = vmatprep.subr.mxu0 %v12684_v59  ;;  %7250 = vmatprep.mubr.f32.mxu0 %v6873_v5  ;;  %v14177_v5 = vld [vmem:[#allocation46_spill] sm:$0xff] }
 0x9d6   : > { %8471 = vmatprep.subr.mxu1 %v12774_v62  ;;  %8429 = vmatpush3.msra.mxu0 %v12694_v38 }
 0x9d7   : > { %8472 = vmatpush3.msra.mxu1 %v12786_v46  ;;  %8430 = vmatprep.subr.mxu0 %v12707_v23 }
 0x9d8   : > { %8473 = vmatprep.subr.mxu1 %v12796_v10  ;;  %8431 = vmatpush3.msra.mxu0 %v12720_v36 }
 0x9d9   : > { %8474 = vmatpush3.msra.mxu1 %v12806_v53  ;;  %8432 = vmatprep.subr.mxu0 %v12733_v7 }
 0x9da   : > { %8475 = vmatprep.subr.mxu1 %v12816_v0  ;;  %8433 = vmatpush3.msra.mxu0 %v12744_v12 }
 0x9db   : > { %8476 = vmatpush3.msra.mxu1 %v12826_v9  ;;  %8434 = vmatprep.subr.mxu0 %v12772_v45 }
 0x9dc   : > { %8477 = vmatprep.subr.mxu1 %v12858_v26  ;;  %8435 = vmatpush3.msra.mxu0 %v12784_v58 }
 0x9dd   : > { %8478 = vmatpush3.msra.mxu1 %v12867_v61  ;;  %8436 = vmatprep.subr.mxu0 %v12794_v27 }
 0x9de   : > { %8479 = vmatprep.subr.mxu1 %v12878_v18  ;;  %8437 = vmatpush3.msra.mxu0 %v12804_v34 }
 0x9df   : > { %8480 = vmatpush3.msra.mxu1 %v12890_v55  ;;  %8438 = vmatprep.subr.mxu0 %v12814_v40 }
 0x9e0   : > { %8481 = vmatprep.subr.mxu1 %v12900_v1  ;;  %8439 = vmatpush3.msra.mxu0 %v12824_v25 }
 0x9e1   : > { %8482 = vmatpush3.msra.mxu1 %v12910_v57  ;;  %8440 = vmatprep.subr.mxu0 %v12837_v24 }
 0x9e2   : > { %8483 = vmatprep.subr.mxu1 %v12920_v47  ;;  %8441 = vmatpush3.msra.mxu0 %v12848_v56 }
 0x9e3   : > { %8484 = vmatpush3.msra.mxu1 %v12930_v30  ;;  %8442 = vmatprep.subr.mxu0 %v12876_v54 }
 0x9e4   : > { %8485 = vmatprep.subr.mxu1 %v14162_v2  ;;  %8443 = vmatpush3.msra.mxu0 %v14163_v29 }
 0x9e5   : > { %8486 = vmatpush3.msra.mxu1 %v14164_v41  ;;  %8444 = vmatprep.subr.mxu0 %v14165_v52 }
 0x9e6   : > { %8487 = vmatprep.subr.mxu1 %v14166_v16  ;;  %8445 = vmatpush3.msra.mxu0 %v14167_v63 }
 0x9e7   : > { %8488 = vmatpush3.msra.mxu1 %v14168_v17  ;;  %8446 = vmatprep.subr.mxu0 %v14169_v50 }
 0x9e8   : > { %8489 = vmatprep.subr.mxu1 %v14170_v31  ;;  %8447 = vmatpush3.msra.mxu0 %v14171_v32 }
 0x9e9   : > { %8490 = vmatpush3.msra.mxu1 %v14172_v51  ;;  %8448 = vmatprep.subr.mxu0 %v14173_v39 }
 0x9ea   : > { %8491 = vmatprep.subr.mxu1 %v14174_v4  ;;  %8449 = vmatpush3.msra.mxu0 %v14175_v49 }
 0x9eb   : > { %8492 = vmatpush3.msra.mxu1 %v14176_v14  ;;  %8450 = vmatprep.subr.mxu0 %v14177_v5 }
 0x9ec   : > { %7361 = vmatmul.mubr.f32.vlgmr.msra.gmra.mxu1 %v6880_v21  ;;  %8531 = vmatprep.subr.mxu1 %v14178_v43  ;;  %v14183_v21 = vld [vmem:[#allocation61_spill] sm:$0xff]  ;;  %v14184_v43 = vld [vmem:[#allocation63_spill] sm:$0xff] }
 0x9ed   : > { %8451 = vmatpush3.msra.mxu0 %v14179_v37  ;;  %8532 = vmatpush3.msra.mxu1 %v12659_v3  ;;  %v14185_v3 = vld [vmem:[#allocation23_spill] sm:$0xff] }
 0x9ee   : > { %7631 = vmatprep.mubr.f32.mxu1 %v13079_v20  ;;  %8452 = vmatprep.subr.mxu0 %v14180_v48 }
 0x9ef   : > { %8533 = vmatprep.subr.mxu1 %v12667_v60  ;;  %8453 = vmatpush3.msra.mxu0 %v14181_v42  ;;  %v14186_v60 = vld [vmem:[#allocation71_spill] sm:$0xff] }
 0x9f0   : > { %8534 = vmatpush3.msra.mxu1 %v12676_v11  ;;  %8454 = vmatprep.subr.mxu0 %v14182_v19  ;;  %v14187_v11 = vand.u32 4294901760, %v14186_v60 }
 0x9f1   : > { %8535 = vmatprep.subr.mxu1 %v12686_v22  ;;  %8455 = vmatpush3.msra.mxu0 %v14183_v21  ;;  %v14188_v22 = vand.u32 4294901760, %v12674_v33  ;;  %v14192_v33 = vand.u32 4294901760, %v12720_v36  ;;  %v14196_v36 = vand.u32 4294901760, %v12784_v58  ;;  %v14203_v58 = vand.u32 4294901760, %v12876_v54 }
 0x9f2   : > { %8536 = vmatpush3.msra.mxu1 %v12696_v28  ;;  %8456 = vmatprep.subr.mxu0 %v14184_v43  ;;  %v14189_v28 = vand.u32 4294901760, %v12684_v59  ;;  %v14193_v59 = vand.u32 4294901760, %v12733_v7  ;;  %v14197_v7 = vand.u32 4294901760, %v12794_v27  ;;  %v14205_v27 = vand.u32 4294901760, %v14165_v52 }
 0x9f3   : > { %8537 = vmatprep.subr.mxu1 %v12709_v6  ;;  %8457 = vmatpush3.msra.mxu0 %v14185_v3  ;;  %v14190_v6 = vand.u32 4294901760, %v12694_v38  ;;  %v14194_v38 = vand.u32 4294901760, %v12744_v12  ;;  %v14198_v12 = vand.u32 4294901760, %v12804_v34  ;;  %v14207_v34 = vand.u32 4294901760, %v14169_v50 }
 0x9f4   : > { %8538 = vmatpush3.msra.mxu1 %v12722_v35  ;;  %7253 = vmatmul.mubr.f32.vlgmr.msra.gmra.mxu0 %v13082_v15  ;;  %v14191_v35 = vand.u32 4294901760, %v12707_v23  ;;  %v14195_v23 = vand.u32 4294901760, %v12772_v45  ;;  %v14201_v45 = vand.u32 4294901760, %v12837_v24  ;;  %v14214_v24 = vand.u32 4294901760, %v14181_v42  ;;  %v9511_v15 = vld [vmem:[%s13271_s2] sm:$0x3f] }
 0x9f5   : > { %8496 = vmatprep.subr.mxu0 %v14187_v11  ;;  %8539 = vmatprep.subr.mxu1 %v12754_v44  ;;  %v14199_v44 = vand.u32 4294901760, %v12814_v40  ;;  %v14209_v40 = vand.u32 4294901760, %v14173_v39 }
 0x9f6   : > { %8497 = vmatpush3.msra.mxu0 %v14188_v22  ;;  %7527 = vmatprep.mubr.f32.mxu0 %v13079_v20 }
 0x9f7   : > { %8540 = vmatpush3.msra.mxu1 %v12763_v8  ;;  %8498 = vmatprep.subr.mxu0 %v14189_v28  ;;  %v14200_v8 = vand.u32 4294901760, %v12824_v25  ;;  %v14212_v25 = vand.u32 4294901760, %v14179_v37 }
 0x9f8   : > { %8541 = vmatprep.subr.mxu1 %v12774_v62  ;;  %8499 = vmatpush3.msra.mxu0 %v14190_v6  ;;  %v14202_v62 = vand.u32 4294901760, %v12848_v56  ;;  %v14215_v56 = vand.u32 4294901760, %v14182_v19 }
 0x9f9   : > { %8542 = vmatpush3.msra.mxu1 %v12786_v46  ;;  %8500 = vmatprep.subr.mxu0 %v14191_v35  ;;  %v14204_v46 = vand.u32 4294901760, %v14163_v29 }
 0x9fa   : > { %8543 = vmatprep.subr.mxu1 %v12796_v10  ;;  %8501 = vmatpush3.msra.mxu0 %v14192_v33  ;;  %v14206_v10 = vand.u32 4294901760, %v14167_v63 }
 0x9fb   : > { %8544 = vmatpush3.msra.mxu1 %v12806_v53  ;;  %8502 = vmatprep.subr.mxu0 %v14193_v59  ;;  %v14208_v53 = vand.u32 4294901760, %v14171_v32 }
 0x9fc   : > { %8545 = vmatprep.subr.mxu1 %v12816_v0  ;;  %8503 = vmatpush3.msra.mxu0 %v14194_v38  ;;  %v14210_v0 = vand.u32 4294901760, %v14175_v49 }
 0x9fd   : > { %8546 = vmatpush3.msra.mxu1 %v12826_v9  ;;  %8504 = vmatprep.subr.mxu0 %v14195_v23  ;;  %v14213_v9 = vand.u32 4294901760, %v14180_v48 }
 0x9fe   : > { %8547 = vmatprep.subr.mxu1 %v12858_v26  ;;  %8505 = vmatpush3.msra.mxu0 %v14196_v36  ;;  %v14217_v26 = vand.u32 4294901760, %v14184_v43 }
 0x9ff   : > { %8548 = vmatpush3.msra.mxu1 %v12867_v61  ;;  %8506 = vmatprep.subr.mxu0 %v14197_v7  ;;  %v14218_v61 = vand.u32 4294901760, %v14185_v3 }
 0xa00   : > { %8549 = vmatprep.subr.mxu1 %v12878_v18  ;;  %8507 = vmatpush3.msra.mxu0 %v14198_v12  ;;  %v14219_v18 = vld [vmem:[#allocation33_spill] sm:$0xff] }
 0xa01   : > { %8550 = vmatpush3.msra.mxu1 %v12890_v55  ;;  %8508 = vmatprep.subr.mxu0 %v14199_v44  ;;  %v14216_v55 = vand.u32 4294901760, %v14183_v21  ;;  %v14220_v21 = vld [vmem:[#allocation67_spill] sm:$0xff] }
 0xa02   : > { %8551 = vmatprep.subr.mxu1 %v12900_v1  ;;  %8509 = vmatpush3.msra.mxu0 %v14200_v8  ;;  %v14211_v1 = vand.u32 4294901760, %v14177_v5 }
 0xa03   : > { %8552 = vmatpush3.msra.mxu1 %v12910_v57  ;;  %8510 = vmatprep.subr.mxu0 %v14201_v45 }
 0xa04   : > { %8553 = vmatprep.subr.mxu1 %v12920_v47  ;;  %8511 = vmatpush3.msra.mxu0 %v14202_v62 }
 0xa05   : > { %8554 = vmatpush3.msra.mxu1 %v12930_v30  ;;  %8512 = vmatprep.subr.mxu0 %v14203_v58  ;;  %v6774_v30 = vsub.s32 5, %v14219_v18 }
 0xa06   : > { %8555 = vmatprep.subr.mxu1 %v14162_v2  ;;  %8513 = vmatpush3.msra.mxu0 %v14204_v46 }
 0xa07   : > { %8556 = vmatpush3.msra.mxu1 %v14164_v41  ;;  %8514 = vmatprep.subr.mxu0 %v14205_v27  ;;  %v6775_v2 = vrot.slane %v9511_v15, %v6774_v30 }
 0xa08   : > { %8557 = vmatprep.subr.mxu1 %v14166_v16  ;;  %8515 = vmatpush3.msra.mxu0 %v14206_v10 }
 0xa09   : > { %8558 = vmatpush3.msra.mxu1 %v14168_v17  ;;  %8516 = vmatprep.subr.mxu0 %v14207_v34 }
 0xa0a   : > { %8559 = vmatprep.subr.mxu1 %v14170_v31  ;;  %8517 = vmatpush3.msra.mxu0 %v14208_v53 }
 0xa0b   : > { %8560 = vmatpush3.msra.mxu1 %v14172_v51  ;;  %8518 = vmatprep.subr.mxu0 %v14209_v40 }
 0xa0c   : > { %8561 = vmatprep.subr.mxu1 %v14174_v4  ;;  %8519 = vmatpush3.msra.mxu0 %v14210_v0 }
 0xa0d   : > { %8562 = vmatpush3.msra.mxu1 %v14176_v14  ;;  %8520 = vmatprep.subr.mxu0 %v14211_v1 }
 0xa0e   : > { %7633 = vmatmul.mubr.f32.vlgmr.msra.gmra.mxu1 %v13077_v13  ;;  %8521 = vmatpush3.msra.mxu0 %v14212_v25 }
 0xa0f   : > { %8522 = vmatprep.subr.mxu0 %v14213_v9 }
 0xa10   : > { %8523 = vmatpush3.msra.mxu0 %v14214_v24 }
 0xa11   : > { %8524 = vmatprep.subr.mxu0 %v14215_v56 }
 0xa12   : > { %8525 = vmatpush3.msra.mxu0 %v14216_v55 }
 0xa13   : > { %8526 = vmatprep.subr.mxu0 %v14217_v26 }
 0xa14   : > { %8527 = vmatpush3.msra.mxu0 %v14218_v61 }
 0xa15   : > { %7529 = vmatmul.mubr.f32.vlgmr.msra.gmra.mxu0 %v13077_v13 }
 0xa8b   : > { %v8423_v57 = vpop.f32.mrf.mxu1 }
 0xa8d   : > { %v8424_v41 = vpop.f32.mrf.mxu1 }
 0xa8e   : > { %v8425_v17 = vadd.f32 %v8424_v41, %v8423_v57 }
 0xa93   : > { %v8388_v54 = vpop.f32.mrf.mxu0 }
 0xa95   : > { %v8389_v47 = vpop.f32.mrf.mxu0 }
 0xa96   : > { %v8390_v29 = vadd.f32 %v8389_v47, %v8388_v54 }
 0xa98   : > { %v6885_v63 = vadd.f32 %v8390_v29, %v6775_v2 }
 0xa9a   : > { %v7117_v31 = vadd.f32 %v8425_v17, %v6885_v63 }
 0xaac   : > { %v8493_v52 = vpop.f32.mrf.mxu1 }
 0xaae   : > { %v8494_v13 = vpop.f32.mrf.mxu1 }
 0xaaf   : > { %v8495_v4 = vadd.f32 %v8494_v13, %v8493_v52 }
 0xab4   : > { %v8458_v20 = vpop.f32.mrf.mxu0 }
 0xab6   : > { %v8459_v16 = vpop.f32.mrf.mxu0 }
 0xab7   : > { %v8460_v50 = vadd.f32 %v8459_v16, %v8458_v20 }
 0xab9   : > { %v7255_v51 = vadd.f32 %v8460_v50, %v7117_v31 }
 0xabb   : > { %v7363_v5 = vadd.f32 %v8495_v4, %v7255_v51 }
 0xace   : > { %v8563_v32 = vpop.f32.mrf.mxu1 }
 0xad0   : > { %v8564_v49 = vpop.f32.mrf.mxu1 }
 0xad1   : > { %v8565_v48 = vadd.f32 %v8564_v49, %v8563_v32 }
 0xad5   : > { %v8528_v39 = vpop.f32.mrf.mxu0 }
 0xad7   : > { %v8529_v14 = vpop.f32.mrf.mxu0 }
 0xad8   : > { %v8530_v37 = vadd.f32 %v8529_v14, %v8528_v39 }
 0xada   : > { %v7531_v42 = vadd.f32 %v8530_v37, %v7363_v5 }
 0xadc   : > { %v7635_v19 = vadd.f32 %v8565_v48, %v7531_v42 }
 0xade   : > { %v7638_v43 = vadd.f32 %v7635_v19, %v14220_v21 }
 0xae0   : > { %7639 = vst [vmem:[%s408_s18] sm:$0xff] %v7638_v43 }
 0xae1 PF: > { %s22_s21 = sadd.s32 1, %s9518_s21  }
 0xae2   : > { %p19_p4 = scmp.ge.s32.totalorder %s22_s21, 4  }
 0xae4   :  { %21 = sbr.rel (!%p19_p4) target bundleno = 1 (0x1), region = 98 }

</bundles_post_ra>
